<compile_context>
chip_gen: v7x
topology: tpu7x:2x2x1
jax: 0.10.0
libtpu: 0.0.40
codegen_flags: <defaults>
</compile_context>

<pallas_src>
import functools

import jax
import jax.numpy as jnp
from jax import lax
from jax.experimental import pallas as pl
from jax.experimental.pallas import tpu as pltpu

_MATMUL_DTYPE = jnp.bfloat16           # MXU-native input dtype (f32 accumulation)
_VMEM_LIMIT = 48 * 1024 * 1024         # safe on v5e/v6e (128 MiB) and v7x (64 MiB)


def _cparams(n_parallel):
    return pltpu.CompilerParams(
        dimension_semantics=("parallel",) * n_parallel,
        vmem_limit_bytes=_VMEM_LIMIT)


def _round_up(x, m):
    return (x + m - 1) // m * m


def _pick_band(h):
    """Row-band height for the 3x3 kernels (caps VMEM independent of H)."""
    if h <= 32:
        return h
    for th in (32, 16, 8):
        if h % th == 0:
            return th
    return h


# ----------------------------------------------------------------------------
# Pallas kernels
# ----------------------------------------------------------------------------
def _conv1x1_bn_relu_kernel(x_ref, w_ref, s_ref, b_ref, o_ref):
    # x: [TM, Cin] bf16, w: [Cin, Cout] bf16, scale/bias: [1, Cout] f32
    y = jnp.dot(x_ref[...], w_ref[...], preferred_element_type=jnp.float32)
    y = jnp.maximum(y * s_ref[...] + b_ref[...], 0.0)
    o_ref[...] = y.astype(o_ref.dtype)


def _conv1x1_bn_add_relu_kernel(x_ref, w_ref, s_ref, b_ref, r_ref, o_ref):
    # conv3 + bn3 + residual add + relu (non-SAC path)
    y = jnp.dot(x_ref[...], w_ref[...], preferred_element_type=jnp.float32)
    o_ref[...] = jnp.maximum(y * s_ref[...] + b_ref[...] + r_ref[...], 0.0)


def _conv3x3_bn_relu_kernel(xb_ref, w_ref, s_ref, b_ref, o_ref, *, TH, W, Wp, Cout):
    # xb: [(TH+3)*Wp, C] zero-padded flattened band (bf16); w: [9, C, Cout] bf16.
    X = xb_ref[0, 0]
    L = (TH + 2) * Wp
    M = TH * Wp
    # The three column shifts are materialised once (2 copies) instead of a
    # relayout per tap; row shifts are aligned (multiples of Wp, Wp % 8 == 0).
    xs = [X[dx:dx + L] for dx in range(3)]
    acc = jnp.zeros((M, Cout), jnp.float32)
    for dy in range(3):
        base = dy * Wp
        for dx in range(3):
            acc = acc + jnp.dot(xs[dx][base:base + M], w_ref[dy * 3 + dx],
                                preferred_element_type=jnp.float32)
    y = jnp.maximum(acc * s_ref[...] + b_ref[...], 0.0)
    y = y.reshape(TH, Wp, Cout)[:, :W, :].reshape(TH * W, Cout)
    o_ref[0, 0] = y.astype(o_ref.dtype)


def _sac_conv3x3_kernel(xb_ref, w_ref, cb_ref, sw_ref, o_ref, ps_ref,
                        *, TH, W, Wp, Cout):
    # SAConv2d core (stride=1, use_deform=False):
    #   out_s = conv3x3(x, w_s, dilation=1) ; out_l = conv3x3(x, w_l, dilation=3)
    #   blend = switch*out_s + (1-switch)*out_l + conv_bias
    # Also emits the per-band channel sum for the (global) post-context pool.
    X = xb_ref[0, 0]                               # [(TH+7)*Wp, C] bf16
    L = (TH + 6) * Wp
    M = TH * Wp
    xs = {s: X[s:s + L] for s in (0, 2, 3, 4, 6)}  # distinct column shifts
    acc_s = jnp.zeros((M, Cout), jnp.float32)
    acc_l = jnp.zeros((M, Cout), jnp.float32)
    for ky in range(3):
        bs = (2 + ky) * Wp                         # dilation-1 branch row offset
        bl = (3 * ky) * Wp                         # dilation-3 branch row offset
        for kx in range(3):
            acc_s = acc_s + jnp.dot(xs[2 + kx][bs:bs + M], w_ref[ky * 3 + kx],
                                    preferred_element_type=jnp.float32)
            acc_l = acc_l + jnp.dot(xs[3 * kx][bl:bl + M], w_ref[9 + ky * 3 + kx],
                                    preferred_element_type=jnp.float32)
    sw = sw_ref[0, 0]                              # [M, 1] f32 (broadcast on lanes)
    out = sw * acc_s + (1.0 - sw) * acc_l + cb_ref[...]
    out = out.reshape(TH, Wp, Cout)[:, :W, :].reshape(TH * W, Cout)
    ps_ref[0, 0] = jnp.sum(out, axis=0, keepdims=True)
    o_ref[0, 0] = out.astype(o_ref.dtype)


def _sac_tail_kernel(x_ref, ctx_ref, s2_ref, b2_ref, w3_ref, s3_ref, b3_ref,
                     r_ref, o_ref):
    # Fused: (+post_context) -> bn2 -> relu -> conv3 -> bn3 -> +res -> relu.
    h = x_ref[0].astype(jnp.float32) + ctx_ref[0]
    h = jnp.maximum(h * s2_ref[...] + b2_ref[...], 0.0)
    y = jnp.dot(h.astype(_MATMUL_DTYPE), w3_ref[...],
                preferred_element_type=jnp.float32)
    o_ref[0] = jnp.maximum(y * s3_ref[...] + b3_ref[...] + r_ref[0], 0.0)


# ----------------------------------------------------------------------------
# Pallas wrappers
# ----------------------------------------------------------------------------
def conv1x1_bn_relu(x2d, w, scale, bias, tile=512):
    M, Cin = x2d.shape
    Cout = w.shape[1]
    tm = M if M <= tile else tile
    return pl.pallas_call(
        _conv1x1_bn_relu_kernel,
        out_shape=jax.ShapeDtypeStruct((M, Cout), _MATMUL_DTYPE),
        grid=(pl.cdiv(M, tm),),
        in_specs=[
            pl.BlockSpec((tm, Cin), lambda i: (i, 0)),
            pl.BlockSpec((Cin, Cout), lambda i: (0, 0)),
            pl.BlockSpec((1, Cout), lambda i: (0, 0)),
            pl.BlockSpec((1, Cout), lambda i: (0, 0)),
        ],
        out_specs=pl.BlockSpec((tm, Cout), lambda i: (i, 0)),
        compiler_params=_cparams(1),
    )(x2d, w, scale.reshape(1, Cout), bias.reshape(1, Cout))


def conv1x1_bn_add_relu(x2d, w, scale, bias, res2d, tile=512):
    M, Cin = x2d.shape
    Cout = w.shape[1]
    tm = M if M <= tile else tile
    return pl.pallas_call(
        _conv1x1_bn_add_relu_kernel,
        out_shape=jax.ShapeDtypeStruct((M, Cout), jnp.float32),
        grid=(pl.cdiv(M, tm),),
        in_specs=[
            pl.BlockSpec((tm, Cin), lambda i: (i, 0)),
            pl.BlockSpec((Cin, Cout), lambda i: (0, 0)),
            pl.BlockSpec((1, Cout), lambda i: (0, 0)),
            pl.BlockSpec((1, Cout), lambda i: (0, 0)),
            pl.BlockSpec((tm, Cout), lambda i: (i, 0)),
        ],
        out_specs=pl.BlockSpec((tm, Cout), lambda i: (i, 0)),
        compiler_params=_cparams(1),
    )(x2d, w, scale.reshape(1, Cout), bias.reshape(1, Cout), res2d)


def conv3x3_bn_relu(x_nhwc, w9, scale, bias, th):
    """3x3 conv (pad=1) + bn + relu.  x_nhwc: bf16, w9: [9, C, Cout] bf16."""
    N, H, W, C = x_nhwc.shape
    Cout = w9.shape[-1]
    TH = th
    NB = H // TH
    Wp = _round_up(W + 2, 8)
    # zero pad: 1 top / 2 bottom (halo + slack row), 1 left, lane-friendly right.
    xp = jnp.pad(x_nhwc, ((0, 0), (1, 2), (1, Wp - W - 1), (0, 0)))
    bands = jnp.stack([xp[:, b * TH: b * TH + TH + 3] for b in range(NB)], axis=1)
    xb = bands.reshape(N, NB, (TH + 3) * Wp, C)
    out = pl.pallas_call(
        functools.partial(_conv3x3_bn_relu_kernel, TH=TH, W=W, Wp=Wp, Cout=Cout),
        out_shape=jax.ShapeDtypeStruct((N, NB, TH * W, Cout), _MATMUL_DTYPE),
        grid=(N, NB),
        in_specs=[
            pl.BlockSpec((1, 1, (TH + 3) * Wp, C), lambda n, b: (n, b, 0, 0)),
            pl.BlockSpec((9, C, Cout), lambda n, b: (0, 0, 0)),
            pl.BlockSpec((1, Cout), lambda n, b: (0, 0)),
            pl.BlockSpec((1, Cout), lambda n, b: (0, 0)),
        ],
        out_specs=pl.BlockSpec((1, 1, TH * W, Cout), lambda n, b: (n, b, 0, 0)),
        compiler_params=_cparams(2),
    )(xb, w9, scale.reshape(1, Cout), bias.reshape(1, Cout))
    return out.reshape(N, H * W, Cout)


def sac_conv3x3_blend(x_nhwc, w18, conv_bias, switch, th):
    """SAC dual-branch 3x3 conv + switch blend.  Returns (blend, channel sums)."""
    N, H, W, C = x_nhwc.shape
    Cout = w18.shape[-1]
    TH = th
    NB = H // TH
    Wp = _round_up(W + 6, 8)
    xp = jnp.pad(x_nhwc, ((0, 0), (3, 4), (3, Wp - W - 3), (0, 0)))
    bands = jnp.stack([xp[:, b * TH: b * TH + TH + 7] for b in range(NB)], axis=1)
    xb = bands.reshape(N, NB, (TH + 7) * Wp, C)
    # switch in the same padded-width flattened band layout (sublane-major).
    swp = jnp.pad(switch, ((0, 0), (0, 0), (0, Wp - W), (0, 0)))
    swb = swp.reshape(N, NB, TH * Wp, 1)
    blend, psum = pl.pallas_call(
        functools.partial(_sac_conv3x3_kernel, TH=TH, W=W, Wp=Wp, Cout=Cout),
        out_shape=(jax.ShapeDtypeStruct((N, NB, TH * W, Cout), _MATMUL_DTYPE),
                   jax.ShapeDtypeStruct((N, NB, 1, Cout), jnp.float32)),
        grid=(N, NB),
        in_specs=[
            pl.BlockSpec((1, 1, (TH + 7) * Wp, C), lambda n, b: (n, b, 0, 0)),
            pl.BlockSpec((18, C, Cout), lambda n, b: (0, 0, 0)),
            pl.BlockSpec((1, Cout), lambda n, b: (0, 0)),
            pl.BlockSpec((1, 1, TH * Wp, 1), lambda n, b: (n, b, 0, 0)),
        ],
        out_specs=(pl.BlockSpec((1, 1, TH * W, Cout), lambda n, b: (n, b, 0, 0)),
                   pl.BlockSpec((1, 1, 1, Cout), lambda n, b: (n, b, 0, 0))),
        compiler_params=_cparams(2),
    )(xb, w18, conv_bias.reshape(1, Cout), swb)
    return blend.reshape(N, H * W, Cout), psum.reshape(N, NB, Cout).sum(axis=1)


def sac_tail(blend, ctx, s2, b2, w3, s3, b3, res, tile=512):
    N, HW, Cmid = blend.shape
    C4 = w3.shape[1]
    tm = HW if HW <= tile else tile
    return pl.pallas_call(
        _sac_tail_kernel,
        out_shape=jax.ShapeDtypeStruct((N, HW, C4), jnp.float32),
        grid=(N, pl.cdiv(HW, tm)),
        in_specs=[
            pl.BlockSpec((1, tm, Cmid), lambda n, i: (n, i, 0)),
            pl.BlockSpec((1, 1, Cmid), lambda n, i: (n, 0, 0)),
            pl.BlockSpec((1, Cmid), lambda n, i: (0, 0)),
            pl.BlockSpec((1, Cmid), lambda n, i: (0, 0)),
            pl.BlockSpec((Cmid, C4), lambda n, i: (0, 0)),
            pl.BlockSpec((1, C4), lambda n, i: (0, 0)),
            pl.BlockSpec((1, C4), lambda n, i: (0, 0)),
            pl.BlockSpec((1, tm, C4), lambda n, i: (n, i, 0)),
        ],
        out_specs=pl.BlockSpec((1, tm, C4), lambda n, i: (n, i, 0)),
        compiler_params=_cparams(2),
    )(blend, ctx.reshape(N, 1, Cmid), s2.reshape(1, Cmid), b2.reshape(1, Cmid),
      w3, s3.reshape(1, C4), b3.reshape(1, C4), res)


# ----------------------------------------------------------------------------
# Plain-JAX glue shared by the Pallas path and the reference
# ----------------------------------------------------------------------------
def _q(t):
    return t.astype(_MATMUL_DTYPE)


def bn_affine(gamma, beta, mean, var, eps=1e-5):
    scale = gamma / jnp.sqrt(var + eps)
    return scale, beta - mean * scale


def aws_standardize(w, gamma, beta):
    # w: [Cout, Cin, 3, 3]; matches ConvAWS2d._get_weight (ddof=1 variance).
    mean = jnp.mean(w, axis=(1, 2, 3), keepdims=True)
    wc = w - mean
    var = jnp.var(wc.reshape(w.shape[0], -1), axis=1, ddof=1).reshape(-1, 1, 1, 1)
    return gamma * (wc / jnp.sqrt(var + 1e-5)) + beta


def _oihw_to_kcm(w):
    # (O, C, 3, 3) -> (9, C, O) bf16, tap order ky*3 + kx
    return jnp.transpose(w, (2, 3, 1, 0)).reshape(9, w.shape[1], w.shape[0]).astype(_MATMUL_DTYPE)


def _sac_prep(x_nhwc, p):
    """Pre-context, switch map and AWS weights (shared by kernel path & ref)."""
    avg = jnp.mean(x_nhwc, axis=(1, 2), keepdims=True)
    pre = jnp.einsum("nijc,oc->nijo", avg, p["pre_w"][:, :, 0, 0]) + p["pre_b"]
    xin = x_nhwc + pre
    xr = jnp.pad(xin, ((0, 0), (2, 2), (2, 2), (0, 0)), mode="reflect")
    pooled = lax.reduce_window(xr, 0.0, lax.add, (1, 5, 5, 1), (1, 1, 1, 1), "VALID") / 25.0
    switch = jnp.einsum("nhwc,oc->nhwo", pooled, p["switch_w"][:, :, 0, 0]) + p["switch_b"]
    w_s = aws_standardize(p["weight"], p["weight_gamma"], p["weight_beta"])
    w_l = w_s + p["weight_diff"]
    return xin, switch, w_s, w_l


def bottleneck_forward(x_nchw, params, use_sac):
    """Bottleneck.forward (stride=1, downsample=None) built from Pallas kernels."""
    x = jnp.transpose(x_nchw, (0, 2, 3, 1)).astype(jnp.float32)         # NHWC
    N, H, W, Cin = x.shape
    planes = params["conv1_w"].shape[0]
    C4 = params["conv3_w"].shape[0]
    th = _pick_band(H)

    s1, b1 = bn_affine(params["bn1_g"], params["bn1_b"], params["bn1_m"], params["bn1_v"])
    s2, b2 = bn_affine(params["bn2_g"], params["bn2_b"], params["bn2_m"], params["bn2_v"])
    s3, b3 = bn_affine(params["bn3_g"], params["bn3_b"], params["bn3_m"], params["bn3_v"])

    # conv1 (1x1, no bias) + bn1 + relu  -> bf16 activations
    w1 = params["conv1_w"][:, :, 0, 0].T.astype(_MATMUL_DTYPE)
    out1 = conv1x1_bn_relu(x.reshape(N * H * W, Cin).astype(_MATMUL_DTYPE), w1, s1, b1)
    out1_nhwc = out1.reshape(N, H, W, planes)

    w3 = params["conv3_w"][:, :, 0, 0].T.astype(_MATMUL_DTYPE)
    res = x.reshape(N, H * W, Cin)                                       # residual (f32)

    if use_sac:
        p = params["sac"]
        xin, switch, w_s, w_l = _sac_prep(out1_nhwc.astype(jnp.float32), p)
        w18 = jnp.concatenate([_oihw_to_kcm(w_s), _oihw_to_kcm(w_l)], axis=0)
        blend, csum = sac_conv3x3_blend(_q(xin), w18, p["bias"], switch, th)
        avg = csum / float(H * W)                                        # (N, planes)
        ctx = avg @ p["post_w"][:, :, 0, 0].T + p["post_b"]              # post-context
        out = sac_tail(blend, ctx, s2, b2, w3, s3, b3, res)
    else:
        w9 = _oihw_to_kcm(params["conv2_w"])
        out2 = conv3x3_bn_relu(out1_nhwc, w9, s2, b2, th)                # bf16
        out = conv1x1_bn_add_relu(out2.reshape(N * H * W, planes), w3, s3, b3,
                                  res.reshape(N * H * W, C4)).reshape(N, H * W, C4)

    return jnp.transpose(out.reshape(N, H, W, C4), (0, 3, 1, 2))         # NCHW


# ----------------------------------------------------------------------------
# Pure-JAX reference (lax convs), mirroring the bf16 matmul staging points.
# ----------------------------------------------------------------------------
def _ref_conv3x3(x, w_oihw, dil):
    w = jnp.transpose(w_oihw, (2, 3, 1, 0))
    return lax.conv_general_dilated(
        _q(x), _q(w), (1, 1), [(dil, dil), (dil, dil)],
        rhs_dilation=(dil, dil),
        dimension_numbers=("NHWC", "HWIO", "NHWC"),
        preferred_element_type=jnp.float32)


def ref_forward(x_nchw, params, use_sac):
    x = jnp.transpose(x_nchw, (0, 2, 3, 1)).astype(jnp.float32)
    N, H, W, Cin = x.shape
    relu = lambda t: jnp.maximum(t, 0.0)
    s1, b1 = bn_affine(params["bn1_g"], params["bn1_b"], params["bn1_m"], params["bn1_v"])
    s2, b2 = bn_affine(params["bn2_g"], params["bn2_b"], params["bn2_m"], params["bn2_v"])
    s3, b3 = bn_affine(params["bn3_g"], params["bn3_b"], params["bn3_m"], params["bn3_v"])

    w1 = params["conv1_w"][:, :, 0, 0].T
    out1 = relu(jnp.dot(_q(x).reshape(-1, Cin), _q(w1),
                        preferred_element_type=jnp.float32) * s1 + b1)
    out1 = _q(out1).astype(jnp.float32).reshape(N, H, W, -1)

    if use_sac:
        p = params["sac"]
        xin, switch, w_s, w_l = _sac_prep(out1, p)
        out_s = _ref_conv3x3(xin, w_s, 1) + p["bias"]
        out_l = _ref_conv3x3(xin, w_l, 3) + p["bias"]
        blend = switch * out_s + (1.0 - switch) * out_l
        avg = jnp.mean(blend, axis=(1, 2), keepdims=True)
        ctx = jnp.einsum("nijc,oc->nijo", avg, p["post_w"][:, :, 0, 0]) + p["post_b"]
        blend = _q(blend).astype(jnp.float32)
        h = relu((blend + ctx) * s2 + b2)
    else:
        h = relu(_ref_conv3x3(out1, params["conv2_w"], 1) * s2 + b2)
        h = _q(h).astype(jnp.float32)

    w3 = params["conv3_w"][:, :, 0, 0].T
    y = jnp.dot(_q(h).reshape(N * H * W, -1), _q(w3), preferred_element_type=jnp.float32)
    y = relu(y * s3 + b3 + x.reshape(N * H * W, Cin))
    return jnp.transpose(y.reshape(N, H, W, -1), (0, 3, 1, 2))


# ----------------------------------------------------------------------------
# Deterministic parameter init (shapes from Bottleneck / SAConv2d)
# ----------------------------------------------------------------------------
def init_params(key, inplanes, planes):
    ks = iter(jax.random.split(key, 40))

    def nrm(shape, scale=0.05):
        return scale * jax.random.normal(next(ks), shape, jnp.float32)

    exp = 4
    p = dict(
        conv1_w=nrm((planes, inplanes, 1, 1)),
        bn1_g=1.0 + nrm((planes,), 0.1), bn1_b=nrm((planes,), 0.1),
        bn1_m=nrm((planes,), 0.1), bn1_v=0.8 + jnp.abs(nrm((planes,), 0.2)),
        conv2_w=nrm((planes, planes, 3, 3)),
        bn2_g=1.0 + nrm((planes,), 0.1), bn2_b=nrm((planes,), 0.1),
        bn2_m=nrm((planes,), 0.1), bn2_v=0.8 + jnp.abs(nrm((planes,), 0.2)),
        conv3_w=nrm((planes * exp, planes, 1, 1)),
        bn3_g=1.0 + nrm((planes * exp,), 0.1), bn3_b=nrm((planes * exp,), 0.1),
        bn3_m=nrm((planes * exp,), 0.1), bn3_v=0.8 + jnp.abs(nrm((planes * exp,), 0.2)),
    )
    p["sac"] = dict(
        weight=nrm((planes, planes, 3, 3), 0.1),
        bias=nrm((planes,), 0.05),
        weight_gamma=0.2 + nrm((planes, 1, 1, 1), 0.02),
        weight_beta=nrm((planes, 1, 1, 1), 0.02),
        weight_diff=nrm((planes, planes, 3, 3), 0.02),
        switch_w=nrm((1, planes, 1, 1), 0.1),
        switch_b=0.5 + nrm((1,), 0.1),
        pre_w=nrm((planes, planes, 1, 1), 0.05),
        pre_b=nrm((planes,), 0.05),
        post_w=nrm((planes, planes, 1, 1), 0.05),
        post_b=nrm((planes,), 0.05),
    )
    return p


if __name__ == "__main__":
    key = jax.random.PRNGKey(0)
    N, H, W = 2, 16, 16
    planes = 16
    inplanes = planes * 4          # downsample=None requires inplanes == planes*4

    params = init_params(key, inplanes, planes)
    x = jax.random.normal(jax.random.fold_in(key, 999), (N, inplanes, H, W), jnp.float32)

    fwd = jax.jit(bottleneck_forward, static_argnames=("use_sac",))
    ref_fn = jax.jit(ref_forward, static_argnames=("use_sac",))

    for use_sac in (False, True):
        out = jax.block_until_ready(fwd(x, params, use_sac=use_sac))
        assert out.shape == (N, planes * 4, H, W)
        ref = jax.block_until_ready(ref_fn(x, params, use_sac=use_sac))
        err = float(jnp.max(jnp.abs(out - ref)))
        if not err < 1e-2:
            raise AssertionError(f"use_sac={use_sac}: max abs error {err}")
    print("KERNEL_OK")
</pallas_src>

<mosaic_0001>
module attributes {stable_mosaic.version = 11 : i64} {
  func.func @_conv1x1_bn_relu_kernel(%arg0: i32, %arg1: memref<512x64xbf16, #tpu.memory_space<vmem>>, %arg2: memref<64x16xbf16, #tpu.memory_space<vmem>>, %arg3: memref<1x16xf32, #tpu.memory_space<vmem>>, %arg4: memref<1x16xf32, #tpu.memory_space<vmem>>, %arg5: memref<512x16xbf16, #tpu.memory_space<vmem>>) attributes {dimension_semantics = [#tpu.dimension_semantics<parallel>], iteration_bounds = array<i64: 1>, scalar_prefetch = 0 : i64, scratch_operands = 0 : i64, tpu.core_type = #tpu.core_type<tc>, window_params = [{transform_indices = @transform_0, window_bounds = array<i64: 512, 64>}, {pipeline_mode = #tpu.pipeline_mode<synchronous>, transform_indices = @transform_1, window_bounds = array<i64: 64, 16>}, {pipeline_mode = #tpu.pipeline_mode<synchronous>, transform_indices = @transform_2, window_bounds = array<i64: 1, 16>}, {pipeline_mode = #tpu.pipeline_mode<synchronous>, transform_indices = @transform_3, window_bounds = array<i64: 1, 16>}, {transform_indices = @transform_4, window_bounds = array<i64: 512, 16>}]} {
    %c0 = arith.constant 0 : index
    %c0_0 = arith.constant 0 : index
    %0 = vector.load %arg1[%c0, %c0_0] : memref<512x64xbf16, #tpu.memory_space<vmem>>, vector<512x64xbf16>
    %c0_1 = arith.constant 0 : index
    %c0_2 = arith.constant 0 : index
    %1 = vector.load %arg2[%c0_1, %c0_2] : memref<64x16xbf16, #tpu.memory_space<vmem>>, vector<64x16xbf16>
    %cst = arith.constant dense<0.000000e+00> : vector<512x16xf32>
    %2 = tpu.matmul %0, %1, %cst {dimension_numbers = #tpu.dot_dimension_numbers<[1], [0], [0], [1], [0, 0, 1, 1], [], []>} : vector<512x64xbf16>, vector<64x16xbf16>, vector<512x16xf32> -> vector<512x16xf32>
    %c0_3 = arith.constant 0 : index
    %c0_4 = arith.constant 0 : index
    %3 = vector.load %arg3[%c0_3, %c0_4] : memref<1x16xf32, #tpu.memory_space<vmem>>, vector<1x16xf32>
    %4 = vector.broadcast %3 : vector<1x16xf32> to vector<512x16xf32>
    %5 = arith.mulf %2, %4 : vector<512x16xf32>
    %c0_5 = arith.constant 0 : index
    %c0_6 = arith.constant 0 : index
    %6 = vector.load %arg4[%c0_5, %c0_6] : memref<1x16xf32, #tpu.memory_space<vmem>>, vector<1x16xf32>
    %7 = vector.broadcast %6 : vector<1x16xf32> to vector<512x16xf32>
    %8 = arith.addf %5, %7 : vector<512x16xf32>
    %cst_7 = arith.constant 0.000000e+00 : f32
    %9 = vector.broadcast %cst_7 : f32 to vector<512x16xf32>
    %10 = arith.maximumf %8, %9 : vector<512x16xf32>
    %11 = arith.truncf %10 : vector<512x16xf32> to vector<512x16xbf16>
    %c0_8 = arith.constant 0 : index
    %c0_9 = arith.constant 0 : index
    %12 = vector.load %arg5[%c0_8, %c0_9] : memref<512x16xbf16, #tpu.memory_space<vmem>>, vector<512x16xbf16>
    tpu.vector_store %arg5[%c0_8, %c0_9], %11 {strides = array<i32>} : memref<512x16xbf16, #tpu.memory_space<vmem>>, vector<512x16xbf16>,
    return
  }
  func.func @transform_0(%arg0: i32) -> (i32, i32) {
    %c0_i32 = arith.constant 0 : i32
    %c0_i32_0 = arith.constant 0 : i32
    return %arg0, %c0_i32 : i32, i32
  }
  func.func @transform_1(%arg0: i32) -> (i32, i32) {
    %c0_i32 = arith.constant 0 : i32
    %c0_i32_0 = arith.constant 0 : i32
    %c0_i32_1 = arith.constant 0 : i32
    return %c0_i32, %c0_i32_0 : i32, i32
  }
  func.func @transform_2(%arg0: i32) -> (i32, i32) {
    %c0_i32 = arith.constant 0 : i32
    %c0_i32_0 = arith.constant 0 : i32
    %c0_i32_1 = arith.constant 0 : i32
    return %c0_i32, %c0_i32_0 : i32, i32
  }
  func.func @transform_3(%arg0: i32) -> (i32, i32) {
    %c0_i32 = arith.constant 0 : i32
    %c0_i32_0 = arith.constant 0 : i32
    %c0_i32_1 = arith.constant 0 : i32
    return %c0_i32, %c0_i32_0 : i32, i32
  }
  func.func @transform_4(%arg0: i32) -> (i32, i32) {
    %c0_i32 = arith.constant 0 : i32
    %c0_i32_0 = arith.constant 0 : i32
    return %arg0, %c0_i32 : i32, i32
  }
}

module attributes {stable_mosaic.version = 11 : i64} {
  func.func @_conv3x3_bn_relu_kernel(%arg0: i32, %arg1: i32, %arg2: memref<1x1x456x16xbf16, #tpu.memory_space<vmem>>, %arg3: memref<9x16x16xbf16, #tpu.memory_space<vmem>>, %arg4: memref<1x16xf32, #tpu.memory_space<vmem>>, %arg5: memref<1x16xf32, #tpu.memory_space<vmem>>, %arg6: memref<1x1x256x16xbf16, #tpu.memory_space<vmem>>) attributes {dimension_semantics = [#tpu.dimension_semantics<parallel>, #tpu.dimension_semantics<parallel>], iteration_bounds = array<i64: 2, 1>, scalar_prefetch = 0 : i64, scratch_operands = 0 : i64, tpu.core_type = #tpu.core_type<tc>, window_params = [{transform_indices = @transform_0, window_bounds = array<i64: 1, 1, 456, 16>}, {pipeline_mode = #tpu.pipeline_mode<synchronous>, transform_indices = @transform_1, window_bounds = array<i64: 9, 16, 16>}, {pipeline_mode = #tpu.pipeline_mode<synchronous>, transform_indices = @transform_2, window_bounds = array<i64: 1, 16>}, {pipeline_mode = #tpu.pipeline_mode<synchronous>, transform_indices = @transform_3, window_bounds = array<i64: 1, 16>}, {transform_indices = @transform_4, window_bounds = array<i64: 1, 1, 256, 16>}]} {
    %c0 = arith.constant 0 : index
    %c0_0 = arith.constant 0 : index
    %c0_1 = arith.constant 0 : index
    %c0_2 = arith.constant 0 : index
    %0 = vector.load %arg2[%c0, %c0_0, %c0_1, %c0_2] : memref<1x1x456x16xbf16, #tpu.memory_space<vmem>>, vector<1x1x456x16xbf16>
    %1 = vector.shape_cast %0 : vector<1x1x456x16xbf16> to vector<456x16xbf16>
    %2 = vector.extract_strided_slice %1 {offsets = [0, 0], sizes = [432, 16], strides = [1, 1]} : vector<456x16xbf16> to vector<432x16xbf16>
    %3 = vector.extract_strided_slice %1 {offsets = [1, 0], sizes = [432, 16], strides = [1, 1]} : vector<456x16xbf16> to vector<432x16xbf16>
    %4 = vector.extract_strided_slice %1 {offsets = [2, 0], sizes = [432, 16], strides = [1, 1]} : vector<456x16xbf16> to vector<432x16xbf16>
    %cst = arith.constant 0.000000e+00 : f32
    %5 = vector.broadcast %cst : f32 to vector<384x16xf32>
    %6 = vector.extract_strided_slice %2 {offsets = [0, 0], sizes = [384, 16], strides = [1, 1]} : vector<432x16xbf16> to vector<384x16xbf16>
    %c0_3 = arith.constant 0 : index
    %c0_4 = arith.constant 0 : index
    %c0_5 = arith.constant 0 : index
    %7 = vector.load %arg3[%c0_3, %c0_4, %c0_5] : memref<9x16x16xbf16, #tpu.memory_space<vmem>>, vector<1x16x16xbf16>
    %8 = vector.shape_cast %7 : vector<1x16x16xbf16> to vector<16x16xbf16>
    %cst_6 = arith.constant dense<0.000000e+00> : vector<384x16xf32>
    %9 = tpu.matmul %6, %8, %cst_6 {dimension_numbers = #tpu.dot_dimension_numbers<[1], [0], [0], [1], [0, 0, 1, 1], [], []>} : vector<384x16xbf16>, vector<16x16xbf16>, vector<384x16xf32> -> vector<384x16xf32>
    %10 = arith.addf %5, %9 : vector<384x16xf32>
    %11 = vector.extract_strided_slice %3 {offsets = [0, 0], sizes = [384, 16], strides = [1, 1]} : vector<432x16xbf16> to vector<384x16xbf16>
    %c1 = arith.constant 1 : index
    %c0_7 = arith.constant 0 : index
    %c0_8 = arith.constant 0 : index
    %12 = vector.load %arg3[%c1, %c0_7, %c0_8] : memref<9x16x16xbf16, #tpu.memory_space<vmem>>, vector<1x16x16xbf16>
    %13 = vector.shape_cast %12 : vector<1x16x16xbf16> to vector<16x16xbf16>
    %cst_9 = arith.constant dense<0.000000e+00> : vector<384x16xf32>
    %14 = tpu.matmul %11, %13, %cst_9 {dimension_numbers = #tpu.dot_dimension_numbers<[1], [0], [0], [1], [0, 0, 1, 1], [], []>} : vector<384x16xbf16>, vector<16x16xbf16>, vector<384x16xf32> -> vector<384x16xf32>
    %15 = arith.addf %10, %14 : vector<384x16xf32>
    %16 = vector.extract_strided_slice %4 {offsets = [0, 0], sizes = [384, 16], strides = [1, 1]} : vector<432x16xbf16> to vector<384x16xbf16>
    %c2 = arith.constant 2 : index
    %c0_10 = arith.constant 0 : index
    %c0_11 = arith.constant 0 : index
    %17 = vector.load %arg3[%c2, %c0_10, %c0_11] : memref<9x16x16xbf16, #tpu.memory_space<vmem>>, vector<1x16x16xbf16>
    %18 = vector.shape_cast %17 : vector<1x16x16xbf16> to vector<16x16xbf16>
    %cst_12 = arith.constant dense<0.000000e+00> : vector<384x16xf32>
    %19 = tpu.matmul %16, %18, %cst_12 {dimension_numbers = #tpu.dot_dimension_numbers<[1], [0], [0], [1], [0, 0, 1, 1], [], []>} : vector<384x16xbf16>, vector<16x16xbf16>, vector<384x16xf32> -> vector<384x16xf32>
    %20 = arith.addf %15, %19 : vector<384x16xf32>
    %21 = vector.extract_strided_slice %2 {offsets = [24, 0], sizes = [384, 16], strides = [1, 1]} : vector<432x16xbf16> to vector<384x16xbf16>
    %c3 = arith.constant 3 : index
    %c0_13 = arith.constant 0 : index
    %c0_14 = arith.constant 0 : index
    %22 = vector.load %arg3[%c3, %c0_13, %c0_14] : memref<9x16x16xbf16, #tpu.memory_space<vmem>>, vector<1x16x16xbf16>
    %23 = vector.shape_cast %22 : vector<1x16x16xbf16> to vector<16x16xbf16>
    %cst_15 = arith.constant dense<0.000000e+00> : vector<384x16xf32>
    %24 = tpu.matmul %21, %23, %cst_15 {dimension_numbers = #tpu.dot_dimension_numbers<[1], [0], [0], [1], [0, 0, 1, 1], [], []>} : vector<384x16xbf16>, vector<16x16xbf16>, vector<384x16xf32> -> vector<384x16xf32>
    %25 = arith.addf %20, %24 : vector<384x16xf32>
    %26 = vector.extract_strided_slice %3 {offsets = [24, 0], sizes = [384, 16], strides = [1, 1]} : vector<432x16xbf16> to vector<384x16xbf16>
    %c4 = arith.constant 4 : index
    %c0_16 = arith.constant 0 : index
    %c0_17 = arith.constant 0 : index
    %27 = vector.load %arg3[%c4, %c0_16, %c0_17] : memref<9x16x16xbf16, #tpu.memory_space<vmem>>, vector<1x16x16xbf16>
    %28 = vector.shape_cast %27 : vector<1x16x16xbf16> to vector<16x16xbf16>
    %cst_18 = arith.constant dense<0.000000e+00> : vector<384x16xf32>
    %29 = tpu.matmul %26, %28, %cst_18 {dimension_numbers = #tpu.dot_dimension_numbers<[1], [0], [0], [1], [0, 0, 1, 1], [], []>} : vector<384x16xbf16>, vector<16x16xbf16>, vector<384x16xf32> -> vector<384x16xf32>
    %30 = arith.addf %25, %29 : vector<384x16xf32>
    %31 = vector.extract_strided_slice %4 {offsets = [24, 0], sizes = [384, 16], strides = [1, 1]} : vector<432x16xbf16> to vector<384x16xbf16>
    %c5 = arith.constant 5 : index
    %c0_19 = arith.constant 0 : index
    %c0_20 = arith.constant 0 : index
    %32 = vector.load %arg3[%c5, %c0_19, %c0_20] : memref<9x16x16xbf16, #tpu.memory_space<vmem>>, vector<1x16x16xbf16>
    %33 = vector.shape_cast %32 : vector<1x16x16xbf16> to vector<16x16xbf16>
    %cst_21 = arith.constant dense<0.000000e+00> : vector<384x16xf32>
    %34 = tpu.matmul %31, %33, %cst_21 {dimension_numbers = #tpu.dot_dimension_numbers<[1], [0], [0], [1], [0, 0, 1, 1], [], []>} : vector<384x16xbf16>, vector<16x16xbf16>, vector<384x16xf32> -> vector<384x16xf32>
    %35 = arith.addf %30, %34 : vector<384x16xf32>
    %36 = vector.extract_strided_slice %2 {offsets = [48, 0], sizes = [384, 16], strides = [1, 1]} : vector<432x16xbf16> to vector<384x16xbf16>
    %c6 = arith.constant 6 : index
    %c0_22 = arith.constant 0 : index
    %c0_23 = arith.constant 0 : index
    %37 = vector.load %arg3[%c6, %c0_22, %c0_23] : memref<9x16x16xbf16, #tpu.memory_space<vmem>>, vector<1x16x16xbf16>
    %38 = vector.shape_cast %37 : vector<1x16x16xbf16> to vector<16x16xbf16>
    %cst_24 = arith.constant dense<0.000000e+00> : vector<384x16xf32>
    %39 = tpu.matmul %36, %38, %cst_24 {dimension_numbers = #tpu.dot_dimension_numbers<[1], [0], [0], [1], [0, 0, 1, 1], [], []>} : vector<384x16xbf16>, vector<16x16xbf16>, vector<384x16xf32> -> vector<384x16xf32>
    %40 = arith.addf %35, %39 : vector<384x16xf32>
    %41 = vector.extract_strided_slice %3 {offsets = [48, 0], sizes = [384, 16], strides = [1, 1]} : vector<432x16xbf16> to vector<384x16xbf16>
    %c7 = arith.constant 7 : index
    %c0_25 = arith.constant 0 : index
    %c0_26 = arith.constant 0 : index
    %42 = vector.load %arg3[%c7, %c0_25, %c0_26] : memref<9x16x16xbf16, #tpu.memory_space<vmem>>, vector<1x16x16xbf16>
    %43 = vector.shape_cast %42 : vector<1x16x16xbf16> to vector<16x16xbf16>
    %cst_27 = arith.constant dense<0.000000e+00> : vector<384x16xf32>
    %44 = tpu.matmul %41, %43, %cst_27 {dimension_numbers = #tpu.dot_dimension_numbers<[1], [0], [0], [1], [0, 0, 1, 1], [], []>} : vector<384x16xbf16>, vector<16x16xbf16>, vector<384x16xf32> -> vector<384x16xf32>
    %45 = arith.addf %40, %44 : vector<384x16xf32>
    %46 = vector.extract_strided_slice %4 {offsets = [48, 0], sizes = [384, 16], strides = [1, 1]} : vector<432x16xbf16> to vector<384x16xbf16>
    %c8 = arith.constant 8 : index
    %c0_28 = arith.constant 0 : index
    %c0_29 = arith.constant 0 : index
    %47 = vector.load %arg3[%c8, %c0_28, %c0_29] : memref<9x16x16xbf16, #tpu.memory_space<vmem>>, vector<1x16x16xbf16>
    %48 = vector.shape_cast %47 : vector<1x16x16xbf16> to vector<16x16xbf16>
    %cst_30 = arith.constant dense<0.000000e+00> : vector<384x16xf32>
    %49 = tpu.matmul %46, %48, %cst_30 {dimension_numbers = #tpu.dot_dimension_numbers<[1], [0], [0], [1], [0, 0, 1, 1], [], []>} : vector<384x16xbf16>, vector<16x16xbf16>, vector<384x16xf32> -> vector<384x16xf32>
    %50 = arith.addf %45, %49 : vector<384x16xf32>
    %c0_31 = arith.constant 0 : index
    %c0_32 = arith.constant 0 : index
    %51 = vector.load %arg4[%c0_31, %c0_32] : memref<1x16xf32, #tpu.memory_space<vmem>>, vector<1x16xf32>
    %52 = vector.broadcast %51 : vector<1x16xf32> to vector<384x16xf32>
    %53 = arith.mulf %50, %52 : vector<384x16xf32>
    %c0_33 = arith.constant 0 : index
    %c0_34 = arith.constant 0 : index
    %54 = vector.load %arg5[%c0_33, %c0_34] : memref<1x16xf32, #tpu.memory_space<vmem>>, vector<1x16xf32>
    %55 = vector.broadcast %54 : vector<1x16xf32> to vector<384x16xf32>
    %56 = arith.addf %53, %55 : vector<384x16xf32>
    %cst_35 = arith.constant 0.000000e+00 : f32
    %57 = vector.broadcast %cst_35 : f32 to vector<384x16xf32>
    %58 = arith.maximumf %56, %57 : vector<384x16xf32>
    %59 = vector.shape_cast %58 : vector<384x16xf32> to vector<16x24x16xf32>
    %60 = vector.extract_strided_slice %59 {offsets = [0, 0, 0], sizes = [16, 16, 16], strides = [1, 1, 1]} : vector<16x24x16xf32> to vector<16x16x16xf32>
    %61 = vector.shape_cast %60 : vector<16x16x16xf32> to vector<256x16xf32>
    %62 = arith.truncf %61 : vector<256x16xf32> to vector<256x16xbf16>
    %c0_36 = arith.constant 0 : index
    %c0_37 = arith.constant 0 : index
    %c0_38 = arith.constant 0 : index
    %c0_39 = arith.constant 0 : index
    %63 = vector.load %arg6[%c0_36, %c0_37, %c0_38, %c0_39] : memref<1x1x256x16xbf16, #tpu.memory_space<vmem>>, vector<1x1x256x16xbf16>
    %64 = vector.shape_cast %63 : vector<1x1x256x16xbf16> to vector<256x16xbf16>
    %65 = vector.shape_cast %62 : vector<256x16xbf16> to vector<1x1x256x16xbf16>
    tpu.vector_store %arg6[%c0_36, %c0_37, %c0_38, %c0_39], %65 {strides = array<i32>} : memref<1x1x256x16xbf16, #tpu.memory_space<vmem>>, vector<1x1x256x16xbf16>,
    return
  }
  func.func @transform_0(%arg0: i32, %arg1: i32) -> (i32, i32, i32, i32) {
    %c0_i32 = arith.constant 0 : i32
    %c0_i32_0 = arith.constant 0 : i32
    %c0_i32_1 = arith.constant 0 : i32
    return %arg0, %arg1, %c0_i32, %c0_i32_0 : i32, i32, i32, i32
  }
  func.func @transform_1(%arg0: i32, %arg1: i32) -> (i32, i32, i32) {
    %c0_i32 = arith.constant 0 : i32
    %c0_i32_0 = arith.constant 0 : i32
    %c0_i32_1 = arith.constant 0 : i32
    %c0_i32_2 = arith.constant 0 : i32
    return %c0_i32, %c0_i32_0, %c0_i32_1 : i32, i32, i32
  }
  func.func @transform_2(%arg0: i32, %arg1: i32) -> (i32, i32) {
    %c0_i32 = arith.constant 0 : i32
    %c0_i32_0 = arith.constant 0 : i32
    %c0_i32_1 = arith.constant 0 : i32
    return %c0_i32, %c0_i32_0 : i32, i32
  }
  func.func @transform_3(%arg0: i32, %arg1: i32) -> (i32, i32) {
    %c0_i32 = arith.constant 0 : i32
    %c0_i32_0 = arith.constant 0 : i32
    %c0_i32_1 = arith.constant 0 : i32
    return %c0_i32, %c0_i32_0 : i32, i32
  }
  func.func @transform_4(%arg0: i32, %arg1: i32) -> (i32, i32, i32, i32) {
    %c0_i32 = arith.constant 0 : i32
    %c0_i32_0 = arith.constant 0 : i32
    %c0_i32_1 = arith.constant 0 : i32
    return %arg0, %arg1, %c0_i32, %c0_i32_0 : i32, i32, i32, i32
  }
}

module attributes {stable_mosaic.version = 11 : i64} {
  func.func @_conv1x1_bn_add_relu_kernel(%arg0: i32, %arg1: memref<512x16xbf16, #tpu.memory_space<vmem>>, %arg2: memref<16x64xbf16, #tpu.memory_space<vmem>>, %arg3: memref<1x64xf32, #tpu.memory_space<vmem>>, %arg4: memref<1x64xf32, #tpu.memory_space<vmem>>, %arg5: memref<512x64xf32, #tpu.memory_space<vmem>>, %arg6: memref<512x64xf32, #tpu.memory_space<vmem>>) attributes {dimension_semantics = [#tpu.dimension_semantics<parallel>], iteration_bounds = array<i64: 1>, scalar_prefetch = 0 : i64, scratch_operands = 0 : i64, tpu.core_type = #tpu.core_type<tc>, window_params = [{transform_indices = @transform_0, window_bounds = array<i64: 512, 16>}, {pipeline_mode = #tpu.pipeline_mode<synchronous>, transform_indices = @transform_1, window_bounds = array<i64: 16, 64>}, {pipeline_mode = #tpu.pipeline_mode<synchronous>, transform_indices = @transform_2, window_bounds = array<i64: 1, 64>}, {pipeline_mode = #tpu.pipeline_mode<synchronous>, transform_indices = @transform_3, window_bounds = array<i64: 1, 64>}, {transform_indices = @transform_4, window_bounds = array<i64: 512, 64>}, {transform_indices = @transform_5, window_bounds = array<i64: 512, 64>}]} {
    %c0 = arith.constant 0 : index
    %c0_0 = arith.constant 0 : index
    %0 = vector.load %arg1[%c0, %c0_0] : memref<512x16xbf16, #tpu.memory_space<vmem>>, vector<512x16xbf16>
    %c0_1 = arith.constant 0 : index
    %c0_2 = arith.constant 0 : index
    %1 = vector.load %arg2[%c0_1, %c0_2] : memref<16x64xbf16, #tpu.memory_space<vmem>>, vector<16x64xbf16>
    %cst = arith.constant dense<0.000000e+00> : vector<512x64xf32>
    %2 = tpu.matmul %0, %1, %cst {dimension_numbers = #tpu.dot_dimension_numbers<[1], [0], [0], [1], [0, 0, 1, 1], [], []>} : vector<512x16xbf16>, vector<16x64xbf16>, vector<512x64xf32> -> vector<512x64xf32>
    %c0_3 = arith.constant 0 : index
    %c0_4 = arith.constant 0 : index
    %3 = vector.load %arg3[%c0_3, %c0_4] : memref<1x64xf32, #tpu.memory_space<vmem>>, vector<1x64xf32>
    %4 = vector.broadcast %3 : vector<1x64xf32> to vector<512x64xf32>
    %5 = arith.mulf %2, %4 : vector<512x64xf32>
    %c0_5 = arith.constant 0 : index
    %c0_6 = arith.constant 0 : index
    %6 = vector.load %arg4[%c0_5, %c0_6] : memref<1x64xf32, #tpu.memory_space<vmem>>, vector<1x64xf32>
    %7 = vector.broadcast %6 : vector<1x64xf32> to vector<512x64xf32>
    %8 = arith.addf %5, %7 : vector<512x64xf32>
    %c0_7 = arith.constant 0 : index
    %c0_8 = arith.constant 0 : index
    %9 = vector.load %arg5[%c0_7, %c0_8] : memref<512x64xf32, #tpu.memory_space<vmem>>, vector<512x64xf32>
    %10 = arith.addf %8, %9 : vector<512x64xf32>
    %cst_9 = arith.constant 0.000000e+00 : f32
    %11 = vector.broadcast %cst_9 : f32 to vector<512x64xf32>
    %12 = arith.maximumf %10, %11 : vector<512x64xf32>
    %c0_10 = arith.constant 0 : index
    %c0_11 = arith.constant 0 : index
    %13 = vector.load %arg6[%c0_10, %c0_11] : memref<512x64xf32, #tpu.memory_space<vmem>>, vector<512x64xf32>
    tpu.vector_store %arg6[%c0_10, %c0_11], %12 {strides = array<i32>} : memref<512x64xf32, #tpu.memory_space<vmem>>, vector<512x64xf32>,
    return
  }
  func.func @transform_0(%arg0: i32) -> (i32, i32) {
    %c0_i32 = arith.constant 0 : i32
    %c0_i32_0 = arith.constant 0 : i32
    return %arg0, %c0_i32 : i32, i32
  }
  func.func @transform_1(%arg0: i32) -> (i32, i32) {
    %c0_i32 = arith.constant 0 : i32
    %c0_i32_0 = arith.constant 0 : i32
    %c0_i32_1 = arith.constant 0 : i32
    return %c0_i32, %c0_i32_0 : i32, i32
  }
  func.func @transform_2(%arg0: i32) -> (i32, i32) {
    %c0_i32 = arith.constant 0 : i32
    %c0_i32_0 = arith.constant 0 : i32
    %c0_i32_1 = arith.constant 0 : i32
    return %c0_i32, %c0_i32_0 : i32, i32
  }
  func.func @transform_3(%arg0: i32) -> (i32, i32) {
    %c0_i32 = arith.constant 0 : i32
    %c0_i32_0 = arith.constant 0 : i32
    %c0_i32_1 = arith.constant 0 : i32
    return %c0_i32, %c0_i32_0 : i32, i32
  }
  func.func @transform_4(%arg0: i32) -> (i32, i32) {
    %c0_i32 = arith.constant 0 : i32
    %c0_i32_0 = arith.constant 0 : i32
    return %arg0, %c0_i32 : i32, i32
  }
  func.func @transform_5(%arg0: i32) -> (i32, i32) {
    %c0_i32 = arith.constant 0 : i32
    %c0_i32_0 = arith.constant 0 : i32
    return %arg0, %c0_i32 : i32, i32
  }
}

</mosaic_0001>

<bundles_post_ra>
// kernel: bottleneck_forward.3
= control target key start
LH: loop header
LB: loop body
LE: loop exit
PB: predicated region body
PF: predicated region fallthrough
CT: control target
= control target key end

     0   :  { %vm274_vm0 = vcmask 523264   ;;  %vm1122_vm1 = vcmask 125952   ;;  %s2100_s1 = inlined_call_operand.vmem [shape: bf16[64,16], index: 1, kind: input, shape index: {}]   ;;  %s2101_s0 = inlined_call_operand.vmem [shape: bf16[512,64], index: 0, kind: input, shape index: {}]   ;;  %s2102_s2 = inlined_call_operand.vmem [shape: f32[1,16], index: 2, kind: input, shape index: {}]   ;;  %s2103_s3 = inlined_call_operand.vmem [shape: f32[1,16], index: 3, kind: input, shape index: {}]   ;;  %s2104_s4 = inlined_call_operand.vmem [shape: bf16[512,16], index: 4, kind: output, shape index: {}]  }
   0x1   :  { %v1505_v0 = vld [vmem:[%s2100_s1] sm:$0xff]   ;;  %v1506_v1 = vld [vmem:[%s2100_s1 + $0x8] sm:$0xff]   ;;  %v1507_v2 = vld [vmem:[%s2100_s1 + $0x10] sm:$0xff]  }
   0x2   :  { %1425 = vmatprep.subr.bf16.mxu0 %v1505_v0  ;;  %1497 = vmatprep.subr.bf16.mxu1 %v1505_v0  ;;  %v1509_v3 = vld [vmem:[%s2101_s0] sm:$0xff]   ;;  %v1508_v5 = vld [vmem:[%s2100_s1 + $0x18] sm:$0xff]   ;;  %v1511_v6 = vld [vmem:[%s2101_s0 + $0x8] sm:$0xff]  }
   0x3   :  { %1426 = vmatpush3.bf16.msra.mxu0 %v1505_v0  ;;  %1501 = vmatpush3.bf16.msra.mxu1 %v1505_v0  ;;  %v1510_v4 = vld [vmem:[%s2101_s0 + $0x80] sm:$0xff]   ;;  %v1512_v7 = vld [vmem:[%s2101_s0 + $0x88] sm:$0xff]   ;;  %v1513_v8 = vld [vmem:[%s2101_s0 + $0x10] sm:$0xff]  }
   0x4   :  { %1427 = vmatprep.subr.bf16.mxu0 %v1506_v1  ;;  %1498 = vmatprep.subr.bf16.mxu1 %v1506_v1  ;;  %v1514_v9 = vld [vmem:[%s2101_s0 + $0x90] sm:$0xff]   ;;  %v1515_v10 = vld [vmem:[%s2101_s0 + $0x18] sm:$0xff]   ;;  %v1517_v12 = vld [vmem:[%s2101_s0 + $0x20] sm:$0xff]  }
   0x5   :  { %1433 = vmatprep.mubr.msk.bf16.mxu0 %vm274_vm0, %v1509_v3  ;;  %1465 = vmatprep.mubr.msk.bf16.mxu1 %vm274_vm0, %v1510_v4  ;;  %v1516_v11 = vld [vmem:[%s2101_s0 + $0x98] sm:$0xff]   ;;  %v1518_v13 = vld [vmem:[%s2101_s0 + $0xa0] sm:$0xff]   ;;  %v1519_v14 = vld [vmem:[%s2101_s0 + $0x28] sm:$0xff]  }
   0x6   :  { %v1520_v15 = vld [vmem:[%s2101_s0 + $0xa8] sm:$0xff]   ;;  %v1521_v16 = vld [vmem:[%s2101_s0 + $0x30] sm:$0xff]   ;;  %v1523_v18 = vld [vmem:[%s2101_s0 + $0x38] sm:$0xff]  }
   0x7   :  { %1428 = vmatpush3.bf16.msra.mxu0 %v1506_v1  ;;  %1502 = vmatpush3.bf16.msra.mxu1 %v1506_v1  ;;  %v1522_v17 = vld [vmem:[%s2101_s0 + $0xb0] sm:$0xff]   ;;  %v1524_v19 = vld [vmem:[%s2101_s0 + $0xb8] sm:$0xff]   ;;  %v1525_v20 = vld [vmem:[%s2101_s0 + $0x40] sm:$0xff]  }
   0x8   :  { %1429 = vmatprep.subr.bf16.mxu0 %v1507_v2  ;;  %1499 = vmatprep.subr.bf16.mxu1 %v1507_v2  ;;  %v1526_v21 = vld [vmem:[%s2101_s0 + $0xc0] sm:$0xff]   ;;  %v1527_v22 = vld [vmem:[%s2101_s0 + $0x48] sm:$0xff]   ;;  %v1529_v24 = vld [vmem:[%s2101_s0 + $0x50] sm:$0xff]  }
   0x9   :  { %v1528_v23 = vld [vmem:[%s2101_s0 + $0xc8] sm:$0xff]   ;;  %v1530_v25 = vld [vmem:[%s2101_s0 + $0xd0] sm:$0xff]   ;;  %v1531_v26 = vld [vmem:[%s2101_s0 + $0x58] sm:$0xff]  }
   0xa   :  { %v1532_v27 = vld [vmem:[%s2101_s0 + $0xd8] sm:$0xff]   ;;  %v1533_v28 = vld [vmem:[%s2101_s0 + $0x60] sm:$0xff]   ;;  %v1535_v30 = vld [vmem:[%s2101_s0 + $0x68] sm:$0xff]  }
   0xb   :  { %1430 = vmatpush3.bf16.msra.mxu0 %v1507_v2  ;;  %1503 = vmatpush3.bf16.msra.mxu1 %v1507_v2  ;;  %v1534_v29 = vld [vmem:[%s2101_s0 + $0xe0] sm:$0xff]   ;;  %v1536_v31 = vld [vmem:[%s2101_s0 + $0xe8] sm:$0xff]   ;;  %v1537_v32 = vld [vmem:[%s2101_s0 + $0x70] sm:$0xff]  }
   0xc   :  { %1431 = vmatprep.subr.bf16.mxu0 %v1508_v5  ;;  %1500 = vmatprep.subr.bf16.mxu1 %v1508_v5  ;;  %v1538_v33 = vld [vmem:[%s2101_s0 + $0xf0] sm:$0xff]   ;;  %v1539_v34 = vld [vmem:[%s2101_s0 + $0x78] sm:$0xff]   ;;  %v1709_v36 = vld [vmem:[%s2102_s2] ss:$0 sm:$0xff] }
   0xd   :  { %v1540_v35 = vld [vmem:[%s2101_s0 + $0xf8] sm:$0xff]   ;;  %v1714_v38 = vld [vmem:[%s2103_s3] ss:$0 sm:$0xff] }
   0xf   :  { %1432 = vmatpush3.bf16.msra.mxu0 %v1508_v5  ;;  %1504 = vmatpush3.bf16.msra.mxu1 %v1508_v5 }
  0x12   :  { %1434 = vmatmul.mubr.msk.bf16.vlgmr.msra.gmra.mrb[0].mxu0 %vm274_vm0, %v1511_v6  ;;  %1466 = vmatmul.mubr.msk.bf16.vlgmr.msra.gmra.mrb[0].mxu1 %vm274_vm0, %v1512_v7 }
  0x13   :  { %1437 = vmatprep.mubr.msk.bf16.mxu0 %vm274_vm0, %v1513_v8  ;;  %1469 = vmatprep.mubr.msk.bf16.mxu1 %vm274_vm0, %v1514_v9 }
  0x1a   :  { %1438 = vmatmul.mubr.msk.bf16.gmra.mrb[4].mxu0 %vm274_vm0, %v1515_v10  ;;  %1470 = vmatmul.mubr.msk.bf16.gmra.mrb[4].mxu1 %vm274_vm0, %v1516_v11 }
  0x1b   :  { %1441 = vmatprep.mubr.msk.bf16.mxu0 %vm274_vm0, %v1517_v12  ;;  %1473 = vmatprep.mubr.msk.bf16.mxu1 %vm274_vm0, %v1518_v13 }
  0x22   :  { %1442 = vmatmul.mubr.msk.bf16.gmra.mrb[8].mxu0 %vm274_vm0, %v1519_v14  ;;  %1474 = vmatmul.mubr.msk.bf16.gmra.mrb[8].mxu1 %vm274_vm0, %v1520_v15 }
  0x23   :  { %1445 = vmatprep.mubr.msk.bf16.mxu0 %vm274_vm0, %v1521_v16  ;;  %1477 = vmatprep.mubr.msk.bf16.mxu1 %vm274_vm0, %v1522_v17 }
  0x2a   :  { %1446 = vmatmul.mubr.msk.bf16.gmra.mrb[12].mxu0 %vm274_vm0, %v1523_v18  ;;  %1478 = vmatmul.mubr.msk.bf16.gmra.mrb[12].mxu1 %vm274_vm0, %v1524_v19 }
  0x2b   :  { %1449 = vmatprep.mubr.msk.bf16.mxu0 %vm274_vm0, %v1525_v20  ;;  %1481 = vmatprep.mubr.msk.bf16.mxu1 %vm274_vm0, %v1526_v21 }
  0x32   :  { %1450 = vmatmul.mubr.msk.bf16.gmra.mrb[16].mxu0 %vm274_vm0, %v1527_v22  ;;  %1482 = vmatmul.mubr.msk.bf16.gmra.mrb[16].mxu1 %vm274_vm0, %v1528_v23 }
  0x33   :  { %1453 = vmatprep.mubr.msk.bf16.mxu0 %vm274_vm0, %v1529_v24  ;;  %1485 = vmatprep.mubr.msk.bf16.mxu1 %vm274_vm0, %v1530_v25 }
  0x3a   :  { %1454 = vmatmul.mubr.msk.bf16.gmra.mrb[20].mxu0 %vm274_vm0, %v1531_v26  ;;  %1486 = vmatmul.mubr.msk.bf16.gmra.mrb[20].mxu1 %vm274_vm0, %v1532_v27 }
  0x3b   :  { %1457 = vmatprep.mubr.msk.bf16.mxu0 %vm274_vm0, %v1533_v28  ;;  %1489 = vmatprep.mubr.msk.bf16.mxu1 %vm274_vm0, %v1534_v29 }
  0x42   :  { %1458 = vmatmul.mubr.msk.bf16.gmra.mrb[24].mxu0 %vm274_vm0, %v1535_v30  ;;  %1490 = vmatmul.mubr.msk.bf16.gmra.mrb[24].mxu1 %vm274_vm0, %v1536_v31 }
  0x43   :  { %1461 = vmatprep.mubr.msk.bf16.mxu0 %vm274_vm0, %v1537_v32  ;;  %1493 = vmatprep.mubr.msk.bf16.mxu1 %vm274_vm0, %v1538_v33 }
  0x4a   :  { %1462 = vmatmul.mubr.msk.bf16.gmra.mrb[28].mxu0 %vm274_vm0, %v1539_v34  ;;  %1494 = vmatmul.mubr.msk.bf16.gmra.mrb[28].mxu1 %vm274_vm0, %v1540_v35 }
  0xe5   :  { %v1435_v37 = vpop.f32.mrb[0].mxu0  ;;  %v1467_v39 = vpop.f32.mrb[0].mxu1 }
  0xe6   :  { %v669_v40 = vmul.f32 %v1435_v37, %v1709_v36  ;;  %v701_v41 = vmul.f32 %v1467_v39, %v1709_v36  ;;  %v405_v42 = vpop.f32.mrb[1].mxu0  ;;  %v533_v43 = vpop.f32.mrb[1].mxu1 }
  0xe7   :  { %v667_v44 = vmul.f32 %v1709_v36, %v405_v42  ;;  %v699_v45 = vmul.f32 %v1709_v36, %v533_v43  ;;  %v1436_v46 = vpop.f32.mrb[2].mxu0  ;;  %v1468_v47 = vpop.f32.mrb[2].mxu1 }
  0xe8   :  { %v740_v48 = vadd.f32 %v1714_v38, %v669_v40  ;;  %v772_v49 = vadd.f32 %v1714_v38, %v701_v41  ;;  %v670_v50 = vmul.f32 %v1436_v46, %v1709_v36  ;;  %v702_v51 = vmul.f32 %v1468_v47, %v1709_v36  ;;  %v408_v52 = vpop.f32.mrb[3].mxu0  ;;  %v536_v53 = vpop.f32.mrb[3].mxu1 }
  0xe9   :  { %v738_v54 = vadd.f32 %v1714_v38, %v667_v44  ;;  %v770_v55 = vadd.f32 %v1714_v38, %v699_v45  ;;  %v668_v56 = vmul.f32 %v1709_v36, %v408_v52  ;;  %v700_v57 = vmul.f32 %v1709_v36, %v536_v53 }
  0xea   :  { %v804_v58 = vmax.f32 %v740_v48, 0.0  ;;  %v836_v59 = vmax.f32 %v772_v49, 0.0  ;;  %v741_v60 = vadd.f32 %v1714_v38, %v670_v50  ;;  %v773_v61 = vadd.f32 %v1714_v38, %v702_v51 }
  0xeb   :  { %v802_v62 = vmax.f32 %v738_v54, 0.0  ;;  %v834_v63 = vmax.f32 %v770_v55, 0.0  ;;  %v739_v0 = vadd.f32 %v1714_v38, %v668_v56  ;;  %v771_v1 = vadd.f32 %v1714_v38, %v700_v57 }
  0xec   :  { %v1327_v2 = vpack.c.bf16 %v804_v58, %v804_v58  ;;  %v1359_v3 = vpack.c.bf16 %v836_v59, %v836_v59  ;;  %v805_v4 = vmax.f32 %v741_v60, 0.0  ;;  %v837_v5 = vmax.f32 %v773_v61, 0.0 }
  0xed   :  { %v1325_v6 = vpack.c.bf16 %v802_v62, %v802_v62  ;;  %v1357_v7 = vpack.c.bf16 %v834_v63, %v834_v63  ;;  %v803_v8 = vmax.f32 %v739_v0, 0.0  ;;  %v835_v9 = vmax.f32 %v771_v1, 0.0  ;;  %v1439_v10 = vpop.f32.mrb[4].mxu0  ;;  %v1471_v11 = vpop.f32.mrb[4].mxu1 }
  0xee   :  { %1125 = vst.msk [vmem:[%s2104_s4 + $0x8] sm:$0xf] %vm1122_vm1, %v1327_v2  ;;  %1157 = vst.msk [vmem:[%s2104_s4 + $0x88] sm:$0xf] %vm1122_vm1, %v1359_v3  ;;  %v1328_v12 = vpack.c.bf16 %v805_v4, %v805_v4  ;;  %v1360_v13 = vpack.c.bf16 %v837_v5, %v837_v5  ;;  %v673_v14 = vmul.f32 %v1439_v10, %v1709_v36  ;;  %v421_v16 = vpop.f32.mrb[5].mxu0  ;;  %v549_v17 = vpop.f32.mrb[5].mxu1 }
  0xef   :  { %v705_v15 = vmul.f32 %v1471_v11, %v1709_v36  ;;  %1123 = vst.msk [vmem:[%s2104_s4] sm:$0xf] %vm1122_vm1, %v1325_v6  ;;  %1155 = vst.msk [vmem:[%s2104_s4 + $0x80] sm:$0xf] %vm1122_vm1, %v1357_v7  ;;  %v1326_v18 = vpack.c.bf16 %v803_v8, %v803_v8  ;;  %v1358_v19 = vpack.c.bf16 %v835_v9, %v835_v9  ;;  %v1440_v22 = vpop.f32.mrb[6].mxu0  ;;  %v1472_v23 = vpop.f32.mrb[6].mxu1 }
  0xf0   :  { %v671_v20 = vmul.f32 %v1709_v36, %v421_v16  ;;  %v703_v21 = vmul.f32 %v1709_v36, %v549_v17  ;;  %1126 = vst.msk [vmem:[%s2104_s4 + $0xc] sm:$0xf] %vm1122_vm1, %v1328_v12  ;;  %1158 = vst.msk [vmem:[%s2104_s4 + $0x8c] sm:$0xf] %vm1122_vm1, %v1360_v13  ;;  %v744_v24 = vadd.f32 %v1714_v38, %v673_v14  ;;  %v424_v28 = vpop.f32.mrb[7].mxu0  ;;  %v552_v29 = vpop.f32.mrb[7].mxu1 }
  0xf1   :  { %v776_v25 = vadd.f32 %v1714_v38, %v705_v15  ;;  %v674_v26 = vmul.f32 %v1440_v22, %v1709_v36  ;;  %v706_v27 = vmul.f32 %v1472_v23, %v1709_v36  ;;  %1124 = vst.msk [vmem:[%s2104_s4 + $0x4] sm:$0xf] %vm1122_vm1, %v1326_v18  ;;  %1156 = vst.msk [vmem:[%s2104_s4 + $0x84] sm:$0xf] %vm1122_vm1, %v1358_v19 }
  0xf2   :  { %v742_v30 = vadd.f32 %v1714_v38, %v671_v20  ;;  %v774_v31 = vadd.f32 %v1714_v38, %v703_v21  ;;  %v672_v32 = vmul.f32 %v1709_v36, %v424_v28  ;;  %v704_v33 = vmul.f32 %v1709_v36, %v552_v29 }
  0xf3   :  { %v808_v34 = vmax.f32 %v744_v24, 0.0  ;;  %v840_v35 = vmax.f32 %v776_v25, 0.0  ;;  %v745_v37 = vadd.f32 %v1714_v38, %v674_v26  ;;  %v777_v39 = vadd.f32 %v1714_v38, %v706_v27 }
  0xf4   :  { %v806_v40 = vmax.f32 %v742_v30, 0.0  ;;  %v838_v41 = vmax.f32 %v774_v31, 0.0  ;;  %v743_v42 = vadd.f32 %v1714_v38, %v672_v32  ;;  %v775_v43 = vadd.f32 %v1714_v38, %v704_v33 }
  0xf5   :  { %v1331_v44 = vpack.c.bf16 %v808_v34, %v808_v34  ;;  %v1363_v45 = vpack.c.bf16 %v840_v35, %v840_v35  ;;  %v809_v46 = vmax.f32 %v745_v37, 0.0  ;;  %v841_v47 = vmax.f32 %v777_v39, 0.0  ;;  %v1443_v52 = vpop.f32.mrb[8].mxu0  ;;  %v1475_v53 = vpop.f32.mrb[8].mxu1 }
  0xf6   :  { %v1329_v48 = vpack.c.bf16 %v806_v40, %v806_v40  ;;  %v1361_v49 = vpack.c.bf16 %v838_v41, %v838_v41  ;;  %v807_v50 = vmax.f32 %v743_v42, 0.0  ;;  %v839_v51 = vmax.f32 %v775_v43, 0.0  ;;  %v437_v58 = vpop.f32.mrb[9].mxu0  ;;  %v565_v59 = vpop.f32.mrb[9].mxu1 }
  0xf7   :  { %1129 = vst.msk [vmem:[%s2104_s4 + $0x18] sm:$0xf] %vm1122_vm1, %v1331_v44  ;;  %1161 = vst.msk [vmem:[%s2104_s4 + $0x98] sm:$0xf] %vm1122_vm1, %v1363_v45  ;;  %v1332_v54 = vpack.c.bf16 %v809_v46, %v809_v46  ;;  %v1364_v55 = vpack.c.bf16 %v841_v47, %v841_v47  ;;  %v677_v56 = vmul.f32 %v1443_v52, %v1709_v36  ;;  %v1444_v0 = vpop.f32.mrb[10].mxu0  ;;  %v1476_v1 = vpop.f32.mrb[10].mxu1 }
  0xf8   :  { %v709_v57 = vmul.f32 %v1475_v53, %v1709_v36  ;;  %1127 = vst.msk [vmem:[%s2104_s4 + $0x10] sm:$0xf] %vm1122_vm1, %v1329_v48  ;;  %1159 = vst.msk [vmem:[%s2104_s4 + $0x90] sm:$0xf] %vm1122_vm1, %v1361_v49  ;;  %v1330_v60 = vpack.c.bf16 %v807_v50, %v807_v50  ;;  %v1362_v61 = vpack.c.bf16 %v839_v51, %v839_v51  ;;  %v440_v6 = vpop.f32.mrb[11].mxu0  ;;  %v568_v7 = vpop.f32.mrb[11].mxu1 }
  0xf9   :  { %v675_v62 = vmul.f32 %v1709_v36, %v437_v58  ;;  %v707_v63 = vmul.f32 %v1709_v36, %v565_v59  ;;  %1130 = vst.msk [vmem:[%s2104_s4 + $0x1c] sm:$0xf] %vm1122_vm1, %v1332_v54  ;;  %1162 = vst.msk [vmem:[%s2104_s4 + $0x9c] sm:$0xf] %vm1122_vm1, %v1364_v55  ;;  %v748_v2 = vadd.f32 %v1714_v38, %v677_v56 }
  0xfa   :  { %v780_v3 = vadd.f32 %v1714_v38, %v709_v57  ;;  %v678_v4 = vmul.f32 %v1444_v0, %v1709_v36  ;;  %v710_v5 = vmul.f32 %v1476_v1, %v1709_v36  ;;  %1128 = vst.msk [vmem:[%s2104_s4 + $0x14] sm:$0xf] %vm1122_vm1, %v1330_v60  ;;  %1160 = vst.msk [vmem:[%s2104_s4 + $0x94] sm:$0xf] %vm1122_vm1, %v1362_v61 }
  0xfb   :  { %v746_v8 = vadd.f32 %v1714_v38, %v675_v62  ;;  %v778_v9 = vadd.f32 %v1714_v38, %v707_v63  ;;  %v676_v10 = vmul.f32 %v1709_v36, %v440_v6  ;;  %v708_v11 = vmul.f32 %v1709_v36, %v568_v7 }
  0xfc   :  { %v812_v12 = vmax.f32 %v748_v2, 0.0  ;;  %v844_v13 = vmax.f32 %v780_v3, 0.0  ;;  %v749_v14 = vadd.f32 %v1714_v38, %v678_v4  ;;  %v781_v15 = vadd.f32 %v1714_v38, %v710_v5 }
  0xfd   :  { %v810_v16 = vmax.f32 %v746_v8, 0.0  ;;  %v842_v17 = vmax.f32 %v778_v9, 0.0  ;;  %v747_v18 = vadd.f32 %v1714_v38, %v676_v10  ;;  %v779_v19 = vadd.f32 %v1714_v38, %v708_v11  ;;  %v1447_v28 = vpop.f32.mrb[12].mxu0  ;;  %v1479_v29 = vpop.f32.mrb[12].mxu1 }
  0xfe   :  { %v1335_v20 = vpack.c.bf16 %v812_v12, %v812_v12  ;;  %v1367_v21 = vpack.c.bf16 %v844_v13, %v844_v13  ;;  %v813_v22 = vmax.f32 %v749_v14, 0.0  ;;  %v845_v23 = vmax.f32 %v781_v15, 0.0  ;;  %v453_v34 = vpop.f32.mrb[13].mxu0  ;;  %v581_v35 = vpop.f32.mrb[13].mxu1 }
  0xff   :  { %v1333_v24 = vpack.c.bf16 %v810_v16, %v810_v16  ;;  %v1365_v25 = vpack.c.bf16 %v842_v17, %v842_v17  ;;  %v811_v26 = vmax.f32 %v747_v18, 0.0  ;;  %v843_v27 = vmax.f32 %v779_v19, 0.0  ;;  %v1448_v42 = vpop.f32.mrb[14].mxu0  ;;  %v1480_v43 = vpop.f32.mrb[14].mxu1 }
 0x100   :  { %1133 = vst.msk [vmem:[%s2104_s4 + $0x28] sm:$0xf] %vm1122_vm1, %v1335_v20  ;;  %1165 = vst.msk [vmem:[%s2104_s4 + $0xa8] sm:$0xf] %vm1122_vm1, %v1367_v21  ;;  %v1336_v30 = vpack.c.bf16 %v813_v22, %v813_v22  ;;  %v1368_v31 = vpack.c.bf16 %v845_v23, %v845_v23  ;;  %v681_v32 = vmul.f32 %v1447_v28, %v1709_v36  ;;  %v456_v48 = vpop.f32.mrb[15].mxu0  ;;  %v584_v49 = vpop.f32.mrb[15].mxu1 }
 0x101   :  { %v713_v33 = vmul.f32 %v1479_v29, %v1709_v36  ;;  %1131 = vst.msk [vmem:[%s2104_s4 + $0x20] sm:$0xf] %vm1122_vm1, %v1333_v24  ;;  %1163 = vst.msk [vmem:[%s2104_s4 + $0xa0] sm:$0xf] %vm1122_vm1, %v1365_v25  ;;  %v1334_v37 = vpack.c.bf16 %v811_v26, %v811_v26  ;;  %v1366_v39 = vpack.c.bf16 %v843_v27, %v843_v27 }
 0x102   :  { %v679_v40 = vmul.f32 %v1709_v36, %v453_v34  ;;  %v711_v41 = vmul.f32 %v1709_v36, %v581_v35  ;;  %1134 = vst.msk [vmem:[%s2104_s4 + $0x2c] sm:$0xf] %vm1122_vm1, %v1336_v30  ;;  %1166 = vst.msk [vmem:[%s2104_s4 + $0xac] sm:$0xf] %vm1122_vm1, %v1368_v31  ;;  %v752_v44 = vadd.f32 %v1714_v38, %v681_v32 }
 0x103   :  { %v784_v45 = vadd.f32 %v1714_v38, %v713_v33  ;;  %v682_v46 = vmul.f32 %v1448_v42, %v1709_v36  ;;  %v714_v47 = vmul.f32 %v1480_v43, %v1709_v36  ;;  %1132 = vst.msk [vmem:[%s2104_s4 + $0x24] sm:$0xf] %vm1122_vm1, %v1334_v37  ;;  %1164 = vst.msk [vmem:[%s2104_s4 + $0xa4] sm:$0xf] %vm1122_vm1, %v1366_v39 }
 0x104   :  { %v750_v50 = vadd.f32 %v1714_v38, %v679_v40  ;;  %v782_v51 = vadd.f32 %v1714_v38, %v711_v41  ;;  %v680_v52 = vmul.f32 %v1709_v36, %v456_v48  ;;  %v712_v53 = vmul.f32 %v1709_v36, %v584_v49 }
 0x105   :  { %v816_v54 = vmax.f32 %v752_v44, 0.0  ;;  %v848_v55 = vmax.f32 %v784_v45, 0.0  ;;  %v753_v56 = vadd.f32 %v1714_v38, %v682_v46  ;;  %v785_v57 = vadd.f32 %v1714_v38, %v714_v47  ;;  %v1451_v6 = vpop.f32.mrb[16].mxu0  ;;  %v1483_v7 = vpop.f32.mrb[16].mxu1 }
 0x106   :  { %v814_v58 = vmax.f32 %v750_v50, 0.0  ;;  %v846_v59 = vmax.f32 %v782_v51, 0.0  ;;  %v751_v60 = vadd.f32 %v1714_v38, %v680_v52  ;;  %v783_v61 = vadd.f32 %v1714_v38, %v712_v53  ;;  %v469_v12 = vpop.f32.mrb[17].mxu0  ;;  %v597_v13 = vpop.f32.mrb[17].mxu1 }
 0x107   :  { %v1339_v62 = vpack.c.bf16 %v816_v54, %v816_v54  ;;  %v1371_v63 = vpack.c.bf16 %v848_v55, %v848_v55  ;;  %v817_v0 = vmax.f32 %v753_v56, 0.0  ;;  %v849_v1 = vmax.f32 %v785_v57, 0.0  ;;  %v1452_v18 = vpop.f32.mrb[18].mxu0  ;;  %v1484_v19 = vpop.f32.mrb[18].mxu1 }
 0x108   :  { %v1337_v2 = vpack.c.bf16 %v814_v58, %v814_v58  ;;  %v1369_v3 = vpack.c.bf16 %v846_v59, %v846_v59  ;;  %v815_v4 = vmax.f32 %v751_v60, 0.0  ;;  %v847_v5 = vmax.f32 %v783_v61, 0.0  ;;  %v472_v24 = vpop.f32.mrb[19].mxu0  ;;  %v600_v25 = vpop.f32.mrb[19].mxu1 }
 0x109   :  { %1137 = vst.msk [vmem:[%s2104_s4 + $0x38] sm:$0xf] %vm1122_vm1, %v1339_v62  ;;  %1169 = vst.msk [vmem:[%s2104_s4 + $0xb8] sm:$0xf] %vm1122_vm1, %v1371_v63  ;;  %v1340_v8 = vpack.c.bf16 %v817_v0, %v817_v0  ;;  %v1372_v9 = vpack.c.bf16 %v849_v1, %v849_v1  ;;  %v685_v10 = vmul.f32 %v1451_v6, %v1709_v36 }
 0x10a   :  { %v717_v11 = vmul.f32 %v1483_v7, %v1709_v36  ;;  %1135 = vst.msk [vmem:[%s2104_s4 + $0x30] sm:$0xf] %vm1122_vm1, %v1337_v2  ;;  %1167 = vst.msk [vmem:[%s2104_s4 + $0xb0] sm:$0xf] %vm1122_vm1, %v1369_v3  ;;  %v1338_v14 = vpack.c.bf16 %v815_v4, %v815_v4  ;;  %v1370_v15 = vpack.c.bf16 %v847_v5, %v847_v5 }
 0x10b   :  { %v683_v16 = vmul.f32 %v1709_v36, %v469_v12  ;;  %v715_v17 = vmul.f32 %v1709_v36, %v597_v13  ;;  %1138 = vst.msk [vmem:[%s2104_s4 + $0x3c] sm:$0xf] %vm1122_vm1, %v1340_v8  ;;  %1170 = vst.msk [vmem:[%s2104_s4 + $0xbc] sm:$0xf] %vm1122_vm1, %v1372_v9  ;;  %v756_v20 = vadd.f32 %v1714_v38, %v685_v10 }
 0x10c   :  { %v788_v21 = vadd.f32 %v1714_v38, %v717_v11  ;;  %v686_v22 = vmul.f32 %v1452_v18, %v1709_v36  ;;  %v718_v23 = vmul.f32 %v1484_v19, %v1709_v36  ;;  %1136 = vst.msk [vmem:[%s2104_s4 + $0x34] sm:$0xf] %vm1122_vm1, %v1338_v14  ;;  %1168 = vst.msk [vmem:[%s2104_s4 + $0xb4] sm:$0xf] %vm1122_vm1, %v1370_v15 }
 0x10d   :  { %v754_v26 = vadd.f32 %v1714_v38, %v683_v16  ;;  %v786_v27 = vadd.f32 %v1714_v38, %v715_v17  ;;  %v684_v28 = vmul.f32 %v1709_v36, %v472_v24  ;;  %v716_v29 = vmul.f32 %v1709_v36, %v600_v25  ;;  %v1455_v48 = vpop.f32.mrb[20].mxu0  ;;  %v1487_v49 = vpop.f32.mrb[20].mxu1 }
 0x10e   :  { %v820_v30 = vmax.f32 %v756_v20, 0.0  ;;  %v852_v31 = vmax.f32 %v788_v21, 0.0  ;;  %v757_v32 = vadd.f32 %v1714_v38, %v686_v22  ;;  %v789_v33 = vadd.f32 %v1714_v38, %v718_v23  ;;  %v485_v54 = vpop.f32.mrb[21].mxu0  ;;  %v613_v55 = vpop.f32.mrb[21].mxu1 }
 0x10f   :  { %v818_v34 = vmax.f32 %v754_v26, 0.0  ;;  %v850_v35 = vmax.f32 %v786_v27, 0.0  ;;  %v755_v37 = vadd.f32 %v1714_v38, %v684_v28  ;;  %v787_v39 = vadd.f32 %v1714_v38, %v716_v29  ;;  %v1456_v60 = vpop.f32.mrb[22].mxu0  ;;  %v1488_v61 = vpop.f32.mrb[22].mxu1 }
 0x110   :  { %v1343_v40 = vpack.c.bf16 %v820_v30, %v820_v30  ;;  %v1375_v41 = vpack.c.bf16 %v852_v31, %v852_v31  ;;  %v821_v42 = vmax.f32 %v757_v32, 0.0  ;;  %v853_v43 = vmax.f32 %v789_v33, 0.0  ;;  %v488_v2 = vpop.f32.mrb[23].mxu0  ;;  %v616_v3 = vpop.f32.mrb[23].mxu1 }
 0x111   :  { %v1341_v44 = vpack.c.bf16 %v818_v34, %v818_v34  ;;  %v1373_v45 = vpack.c.bf16 %v850_v35, %v850_v35  ;;  %v819_v46 = vmax.f32 %v755_v37, 0.0  ;;  %v851_v47 = vmax.f32 %v787_v39, 0.0 }
 0x112   :  { %1141 = vst.msk [vmem:[%s2104_s4 + $0x48] sm:$0xf] %vm1122_vm1, %v1343_v40  ;;  %1173 = vst.msk [vmem:[%s2104_s4 + $0xc8] sm:$0xf] %vm1122_vm1, %v1375_v41  ;;  %v1344_v50 = vpack.c.bf16 %v821_v42, %v821_v42  ;;  %v1376_v51 = vpack.c.bf16 %v853_v43, %v853_v43  ;;  %v689_v52 = vmul.f32 %v1455_v48, %v1709_v36 }
 0x113   :  { %v721_v53 = vmul.f32 %v1487_v49, %v1709_v36  ;;  %1139 = vst.msk [vmem:[%s2104_s4 + $0x40] sm:$0xf] %vm1122_vm1, %v1341_v44  ;;  %1171 = vst.msk [vmem:[%s2104_s4 + $0xc0] sm:$0xf] %vm1122_vm1, %v1373_v45  ;;  %v1342_v56 = vpack.c.bf16 %v819_v46, %v819_v46  ;;  %v1374_v57 = vpack.c.bf16 %v851_v47, %v851_v47 }
 0x114   :  { %v687_v58 = vmul.f32 %v1709_v36, %v485_v54  ;;  %v719_v59 = vmul.f32 %v1709_v36, %v613_v55  ;;  %1142 = vst.msk [vmem:[%s2104_s4 + $0x4c] sm:$0xf] %vm1122_vm1, %v1344_v50  ;;  %1174 = vst.msk [vmem:[%s2104_s4 + $0xcc] sm:$0xf] %vm1122_vm1, %v1376_v51  ;;  %v760_v62 = vadd.f32 %v1714_v38, %v689_v52 }
 0x115   :  { %v792_v63 = vadd.f32 %v1714_v38, %v721_v53  ;;  %v690_v0 = vmul.f32 %v1456_v60, %v1709_v36  ;;  %v722_v1 = vmul.f32 %v1488_v61, %v1709_v36  ;;  %1140 = vst.msk [vmem:[%s2104_s4 + $0x44] sm:$0xf] %vm1122_vm1, %v1342_v56  ;;  %1172 = vst.msk [vmem:[%s2104_s4 + $0xc4] sm:$0xf] %vm1122_vm1, %v1374_v57  ;;  %v1459_v24 = vpop.f32.mrb[24].mxu0  ;;  %v1491_v25 = vpop.f32.mrb[24].mxu1 }
 0x116   :  { %v758_v4 = vadd.f32 %v1714_v38, %v687_v58  ;;  %v790_v5 = vadd.f32 %v1714_v38, %v719_v59  ;;  %v688_v6 = vmul.f32 %v1709_v36, %v488_v2  ;;  %v720_v7 = vmul.f32 %v1709_v36, %v616_v3  ;;  %v501_v30 = vpop.f32.mrb[25].mxu0  ;;  %v629_v31 = vpop.f32.mrb[25].mxu1 }
 0x117   :  { %v824_v8 = vmax.f32 %v760_v62, 0.0  ;;  %v856_v9 = vmax.f32 %v792_v63, 0.0  ;;  %v761_v10 = vadd.f32 %v1714_v38, %v690_v0  ;;  %v793_v11 = vadd.f32 %v1714_v38, %v722_v1  ;;  %v1460_v37 = vpop.f32.mrb[26].mxu0  ;;  %v1492_v39 = vpop.f32.mrb[26].mxu1 }
 0x118   :  { %v822_v12 = vmax.f32 %v758_v4, 0.0  ;;  %v854_v13 = vmax.f32 %v790_v5, 0.0  ;;  %v759_v14 = vadd.f32 %v1714_v38, %v688_v6  ;;  %v791_v15 = vadd.f32 %v1714_v38, %v720_v7  ;;  %v504_v44 = vpop.f32.mrb[27].mxu0  ;;  %v632_v45 = vpop.f32.mrb[27].mxu1 }
 0x119   :  { %v1347_v16 = vpack.c.bf16 %v824_v8, %v824_v8  ;;  %v1379_v17 = vpack.c.bf16 %v856_v9, %v856_v9  ;;  %v825_v18 = vmax.f32 %v761_v10, 0.0  ;;  %v857_v19 = vmax.f32 %v793_v11, 0.0 }
 0x11a   :  { %v1345_v20 = vpack.c.bf16 %v822_v12, %v822_v12  ;;  %v1377_v21 = vpack.c.bf16 %v854_v13, %v854_v13  ;;  %v823_v22 = vmax.f32 %v759_v14, 0.0  ;;  %v855_v23 = vmax.f32 %v791_v15, 0.0 }
 0x11b   :  { %1145 = vst.msk [vmem:[%s2104_s4 + $0x58] sm:$0xf] %vm1122_vm1, %v1347_v16  ;;  %1177 = vst.msk [vmem:[%s2104_s4 + $0xd8] sm:$0xf] %vm1122_vm1, %v1379_v17  ;;  %v1348_v26 = vpack.c.bf16 %v825_v18, %v825_v18  ;;  %v1380_v27 = vpack.c.bf16 %v857_v19, %v857_v19  ;;  %v693_v28 = vmul.f32 %v1459_v24, %v1709_v36 }
 0x11c   :  { %v725_v29 = vmul.f32 %v1491_v25, %v1709_v36  ;;  %1143 = vst.msk [vmem:[%s2104_s4 + $0x50] sm:$0xf] %vm1122_vm1, %v1345_v20  ;;  %1175 = vst.msk [vmem:[%s2104_s4 + $0xd0] sm:$0xf] %vm1122_vm1, %v1377_v21  ;;  %v1346_v32 = vpack.c.bf16 %v823_v22, %v823_v22  ;;  %v1378_v33 = vpack.c.bf16 %v855_v23, %v855_v23 }
 0x11d   :  { %v691_v34 = vmul.f32 %v1709_v36, %v501_v30  ;;  %v723_v35 = vmul.f32 %v1709_v36, %v629_v31  ;;  %1146 = vst.msk [vmem:[%s2104_s4 + $0x5c] sm:$0xf] %vm1122_vm1, %v1348_v26  ;;  %1178 = vst.msk [vmem:[%s2104_s4 + $0xdc] sm:$0xf] %vm1122_vm1, %v1380_v27  ;;  %v764_v40 = vadd.f32 %v1714_v38, %v693_v28  ;;  %v1463_v2 = vpop.f32.mrb[28].mxu0  ;;  %v1495_v3 = vpop.f32.mrb[28].mxu1 }
 0x11e   :  { %v796_v41 = vadd.f32 %v1714_v38, %v725_v29  ;;  %v694_v42 = vmul.f32 %v1460_v37, %v1709_v36  ;;  %v726_v43 = vmul.f32 %v1492_v39, %v1709_v36  ;;  %1144 = vst.msk [vmem:[%s2104_s4 + $0x54] sm:$0xf] %vm1122_vm1, %v1346_v32  ;;  %1176 = vst.msk [vmem:[%s2104_s4 + $0xd4] sm:$0xf] %vm1122_vm1, %v1378_v33  ;;  %v517_v8 = vpop.f32.mrb[29].mxu0  ;;  %v645_v9 = vpop.f32.mrb[29].mxu1 }
 0x11f   :  { %v762_v46 = vadd.f32 %v1714_v38, %v691_v34  ;;  %v794_v47 = vadd.f32 %v1714_v38, %v723_v35  ;;  %v692_v48 = vmul.f32 %v1709_v36, %v504_v44  ;;  %v724_v49 = vmul.f32 %v1709_v36, %v632_v45  ;;  %v1464_v14 = vpop.f32.mrb[30].mxu0  ;;  %v1496_v15 = vpop.f32.mrb[30].mxu1 }
 0x120   :  { %v828_v50 = vmax.f32 %v764_v40, 0.0  ;;  %v860_v51 = vmax.f32 %v796_v41, 0.0  ;;  %v765_v52 = vadd.f32 %v1714_v38, %v694_v42  ;;  %v797_v53 = vadd.f32 %v1714_v38, %v726_v43  ;;  %v520_v20 = vpop.f32.mrb[31].mxu0  ;;  %v648_v21 = vpop.f32.mrb[31].mxu1 }
 0x121   :  { %v826_v54 = vmax.f32 %v762_v46, 0.0  ;;  %v858_v55 = vmax.f32 %v794_v47, 0.0  ;;  %v763_v56 = vadd.f32 %v1714_v38, %v692_v48  ;;  %v795_v57 = vadd.f32 %v1714_v38, %v724_v49 }
 0x122   :  { %v1351_v58 = vpack.c.bf16 %v828_v50, %v828_v50  ;;  %v1383_v59 = vpack.c.bf16 %v860_v51, %v860_v51  ;;  %v829_v60 = vmax.f32 %v765_v52, 0.0  ;;  %v861_v61 = vmax.f32 %v797_v53, 0.0 }
 0x123   :  { %v1349_v62 = vpack.c.bf16 %v826_v54, %v826_v54  ;;  %v1381_v63 = vpack.c.bf16 %v858_v55, %v858_v55  ;;  %v827_v0 = vmax.f32 %v763_v56, 0.0  ;;  %v859_v1 = vmax.f32 %v795_v57, 0.0 }
 0x124   :  { %1149 = vst.msk [vmem:[%s2104_s4 + $0x68] sm:$0xf] %vm1122_vm1, %v1351_v58  ;;  %1181 = vst.msk [vmem:[%s2104_s4 + $0xe8] sm:$0xf] %vm1122_vm1, %v1383_v59  ;;  %v1352_v4 = vpack.c.bf16 %v829_v60, %v829_v60  ;;  %v1384_v5 = vpack.c.bf16 %v861_v61, %v861_v61  ;;  %v697_v6 = vmul.f32 %v1463_v2, %v1709_v36 }
 0x125   :  { %v729_v7 = vmul.f32 %v1495_v3, %v1709_v36  ;;  %1147 = vst.msk [vmem:[%s2104_s4 + $0x60] sm:$0xf] %vm1122_vm1, %v1349_v62  ;;  %1179 = vst.msk [vmem:[%s2104_s4 + $0xe0] sm:$0xf] %vm1122_vm1, %v1381_v63  ;;  %v1350_v10 = vpack.c.bf16 %v827_v0, %v827_v0  ;;  %v1382_v11 = vpack.c.bf16 %v859_v1, %v859_v1 }
 0x126   :  { %v695_v12 = vmul.f32 %v1709_v36, %v517_v8  ;;  %v727_v13 = vmul.f32 %v1709_v36, %v645_v9  ;;  %1150 = vst.msk [vmem:[%s2104_s4 + $0x6c] sm:$0xf] %vm1122_vm1, %v1352_v4  ;;  %1182 = vst.msk [vmem:[%s2104_s4 + $0xec] sm:$0xf] %vm1122_vm1, %v1384_v5  ;;  %v768_v16 = vadd.f32 %v1714_v38, %v697_v6 }
 0x127   :  { %v800_v17 = vadd.f32 %v1714_v38, %v729_v7  ;;  %v698_v18 = vmul.f32 %v1464_v14, %v1709_v36  ;;  %v730_v19 = vmul.f32 %v1496_v15, %v1709_v36  ;;  %1148 = vst.msk [vmem:[%s2104_s4 + $0x64] sm:$0xf] %vm1122_vm1, %v1350_v10  ;;  %1180 = vst.msk [vmem:[%s2104_s4 + $0xe4] sm:$0xf] %vm1122_vm1, %v1382_v11 }
 0x128   :  { %v766_v22 = vadd.f32 %v1714_v38, %v695_v12  ;;  %v798_v23 = vadd.f32 %v1714_v38, %v727_v13  ;;  %v696_v24 = vmul.f32 %v1709_v36, %v520_v20  ;;  %v728_v25 = vmul.f32 %v1709_v36, %v648_v21 }
 0x129   :  { %v832_v26 = vmax.f32 %v768_v16, 0.0  ;;  %v864_v27 = vmax.f32 %v800_v17, 0.0  ;;  %v769_v28 = vadd.f32 %v1714_v38, %v698_v18  ;;  %v801_v29 = vadd.f32 %v1714_v38, %v730_v19 }
 0x12a   :  { %v830_v30 = vmax.f32 %v766_v22, 0.0  ;;  %v862_v31 = vmax.f32 %v798_v23, 0.0  ;;  %v767_v32 = vadd.f32 %v1714_v38, %v696_v24  ;;  %v799_v33 = vadd.f32 %v1714_v38, %v728_v25 }
 0x12b   :  { %v1355_v34 = vpack.c.bf16 %v832_v26, %v832_v26  ;;  %v1387_v35 = vpack.c.bf16 %v864_v27, %v864_v27  ;;  %v833_v37 = vmax.f32 %v769_v28, 0.0  ;;  %v865_v39 = vmax.f32 %v801_v29, 0.0 }
 0x12c   :  { %v1353_v40 = vpack.c.bf16 %v830_v30, %v830_v30  ;;  %v1385_v41 = vpack.c.bf16 %v862_v31, %v862_v31  ;;  %v831_v42 = vmax.f32 %v767_v32, 0.0  ;;  %v863_v36 = vmax.f32 %v799_v33, 0.0 }
 0x12d   :  { %1153 = vst.msk [vmem:[%s2104_s4 + $0x78] sm:$0xf] %vm1122_vm1, %v1355_v34  ;;  %1185 = vst.msk [vmem:[%s2104_s4 + $0xf8] sm:$0xf] %vm1122_vm1, %v1387_v35  ;;  %v1356_v43 = vpack.c.bf16 %v833_v37, %v833_v37  ;;  %v1388_v38 = vpack.c.bf16 %v865_v39, %v865_v39 }
 0x12e   :  { %1151 = vst.msk [vmem:[%s2104_s4 + $0x70] sm:$0xf] %vm1122_vm1, %v1353_v40  ;;  %1183 = vst.msk [vmem:[%s2104_s4 + $0xf0] sm:$0xf] %vm1122_vm1, %v1385_v41  ;;  %v1354_v44 = vpack.c.bf16 %v831_v42, %v831_v42  ;;  %v1386_v45 = vpack.c.bf16 %v863_v36, %v863_v36 }
 0x12f   :  { %1154 = vst.msk [vmem:[%s2104_s4 + $0x7c] sm:$0xf] %vm1122_vm1, %v1356_v43  ;;  %1186 = vst.msk [vmem:[%s2104_s4 + $0xfc] sm:$0xf] %vm1122_vm1, %v1388_v38 }
 0x130   :  { %1152 = vst.msk [vmem:[%s2104_s4 + $0x74] sm:$0xf] %vm1122_vm1, %v1354_v44  ;;  %1184 = vst.msk [vmem:[%s2104_s4 + $0xf4] sm:$0xf] %vm1122_vm1, %v1386_v45 }

// kernel: bottleneck_forward.5
= control target key start
LH: loop header
LB: loop body
LE: loop exit
PB: predicated region body
PF: predicated region fallthrough
CT: control target
= control target key end

     0   :  { %vm254_vm0 = vcmask 130048   ;;  %s1853_s0 = inlined_call_operand.vmem [shape: bf16[512,16], index: 0, kind: input, shape index: {}]   ;;  %s1854_s1 = inlined_call_operand.vmem [shape: bf16[16,64], index: 1, kind: input, shape index: {}]   ;;  %s1855_s2 = inlined_call_operand.vmem [shape: f32[1,64], index: 2, kind: input, shape index: {}]   ;;  %s1856_s3 = inlined_call_operand.vmem [shape: f32[1,64], index: 3, kind: input, shape index: {}]   ;;  %s1857_s4 = inlined_call_operand.vmem [shape: f32[512,64], index: 4, kind: input, shape index: {}]   ;;  %s1858_s5 = inlined_call_operand.hbm [shape: f32[512,64], index: 5, kind: output, shape index: {}]  }
   0x1   :  { %v1226_v0 = vld [vmem:[%s1854_s1] sm:$0xff]   ;;  %v1229_v3 = vld [vmem:[%s1853_s0 + $0x8] sm:$0xff]   ;;  %v1231_v5 = vld [vmem:[%s1853_s0 + $0x10] sm:$0xff]  }
   0x2   :  { %v1227_v1 = vld [vmem:[%s1853_s0] sm:$0xff]   ;;  %1155 = vmatprep.subr.bf16.mxu0 %v1226_v0  ;;  %1221 = vmatprep.subr.bf16.mxu1 %v1226_v0  ;;  %v1230_v4 = vld [vmem:[%s1853_s0 + $0x88] sm:$0xff]   ;;  %v1232_v6 = vld [vmem:[%s1853_s0 + $0x90] sm:$0xff]  }
   0x3   :  { %v1228_v2 = vld [vmem:[%s1853_s0 + $0x80] sm:$0xff]   ;;  %1156 = vmatpush3.bf16.msra.mxu0 %v1226_v0  ;;  %1222 = vmatpush3.bf16.msra.mxu1 %v1226_v0  ;;  %v1233_v7 = vld [vmem:[%s1853_s0 + $0x18] sm:$0xff]   ;;  %v1237_v11 = vld [vmem:[%s1853_s0 + $0x28] sm:$0xff]  }
   0x4   :  { %1157 = vmatprep.mubr.msk.bf16.mxu0 %vm254_vm0, %v1227_v1  ;;  %1189 = vmatprep.mubr.msk.bf16.mxu1 %vm254_vm0, %v1228_v2  ;;  %v1234_v8 = vld [vmem:[%s1853_s0 + $0x98] sm:$0xff]   ;;  %v1235_v9 = vld [vmem:[%s1853_s0 + $0x20] sm:$0xff]   ;;  %v1238_v12 = vld [vmem:[%s1853_s0 + $0xa8] sm:$0xff]  }
   0x5   :  { %v1236_v10 = vld [vmem:[%s1853_s0 + $0xa0] sm:$0xff]   ;;  %v1239_v13 = vld [vmem:[%s1853_s0 + $0x30] sm:$0xff]   ;;  %v1241_v15 = vld [vmem:[%s1853_s0 + $0x38] sm:$0xff]  }
   0x6   :  { %1158 = vmatmul.mubr.msk.bf16.vlgmr.msra.gmra.mrb[0].mxu0 %vm254_vm0, %v1229_v3  ;;  %1190 = vmatmul.mubr.msk.bf16.vlgmr.msra.gmra.mrb[0].mxu1 %vm254_vm0, %v1230_v4  ;;  %v1240_v14 = vld [vmem:[%s1853_s0 + $0xb0] sm:$0xff]   ;;  %v1242_v16 = vld [vmem:[%s1853_s0 + $0xb8] sm:$0xff]   ;;  %v1243_v17 = vld [vmem:[%s1853_s0 + $0x40] sm:$0xff]  }
   0x7   :  { %1161 = vmatprep.mubr.msk.bf16.mxu0 %vm254_vm0, %v1231_v5  ;;  %1193 = vmatprep.mubr.msk.bf16.mxu1 %vm254_vm0, %v1232_v6  ;;  %v1244_v18 = vld [vmem:[%s1853_s0 + $0xc0] sm:$0xff]  }
   0xe   :  { %1162 = vmatmul.mubr.msk.bf16.gmra.mrb[4].mxu0 %vm254_vm0, %v1233_v7  ;;  %1194 = vmatmul.mubr.msk.bf16.gmra.mrb[4].mxu1 %vm254_vm0, %v1234_v8 }
   0xf   :  { %1165 = vmatprep.mubr.msk.bf16.mxu0 %vm254_vm0, %v1235_v9  ;;  %1197 = vmatprep.mubr.msk.bf16.mxu1 %vm254_vm0, %v1236_v10 }
  0x16   :  { %1166 = vmatmul.mubr.msk.bf16.gmra.mrb[8].mxu0 %vm254_vm0, %v1237_v11  ;;  %1198 = vmatmul.mubr.msk.bf16.gmra.mrb[8].mxu1 %vm254_vm0, %v1238_v12 }
  0x17   :  { %1169 = vmatprep.mubr.msk.bf16.mxu0 %vm254_vm0, %v1239_v13  ;;  %1201 = vmatprep.mubr.msk.bf16.mxu1 %vm254_vm0, %v1240_v14 }
  0x1e   :  { %1170 = vmatmul.mubr.msk.bf16.gmra.mrb[12].mxu0 %vm254_vm0, %v1241_v15  ;;  %1202 = vmatmul.mubr.msk.bf16.gmra.mrb[12].mxu1 %vm254_vm0, %v1242_v16 }
  0x1f   :  { %1173 = vmatprep.mubr.msk.bf16.mxu0 %vm254_vm0, %v1243_v17  ;;  %1205 = vmatprep.mubr.msk.bf16.mxu1 %vm254_vm0, %v1244_v18 }
  0x20   :  { %10 = vsyncpa [#allocation3], 0  ;;  %v1245_v19 = vld [vmem:[%s1853_s0 + $0x48] sm:$0xff]   ;;  %v1247_v21 = vld [vmem:[%s1853_s0 + $0x50] sm:$0xff]   ;;  %vm974_vm1 = vcmask 523264   ;;  %s1283_s19 = smov [#allocation2]  }
  0x21   :  { %v1246_v20 = vld [vmem:[%s1853_s0 + $0xc8] sm:$0xff]   ;;  %v1248_v22 = vld [vmem:[%s1853_s0 + $0xd0] sm:$0xff]   ;;  %v1249_v23 = vld [vmem:[%s1853_s0 + $0x58] sm:$0xff]   ;;  %s1044_s20 = sshll.u32 %s1283_s19, 4  ;;  %s1045_s20 = int_to_ptr.vmem [resolvable:$true] %s1044_s20 }
  0x22   :  { %v1250_v24 = vld [vmem:[%s1853_s0 + $0xd8] sm:$0xff]   ;;  %v1251_v25 = vld [vmem:[%s1853_s0 + $0x60] sm:$0xff]   ;;  %v1253_v27 = vld [vmem:[%s1853_s0 + $0x68] sm:$0xff]   ;;  %p1264_p1 = scmp.lt.s32.totalorder %s1045_s20, %s1045_s20 }
  0x23   :  { %v1252_v26 = vld [vmem:[%s1853_s0 + $0xe0] sm:$0xff]   ;;  %v1254_v28 = vld [vmem:[%s1853_s0 + $0xe8] sm:$0xff]   ;;  %v1255_v29 = vld [vmem:[%s1853_s0 + $0x70] sm:$0xff]  }
  0x24   :  { %v1256_v30 = vld [vmem:[%s1853_s0 + $0xf0] sm:$0xff]   ;;  %v1257_v31 = vld [vmem:[%s1853_s0 + $0x78] sm:$0xff]   ;;  %v1450_v33 = vld [vmem:[%s1855_s2] ss:$0 sm:$0xff] }
  0x25   :  { %v1258_v32 = vld [vmem:[%s1853_s0 + $0xf8] sm:$0xff]   ;;  %v1455_v35 = vld [vmem:[%s1856_s3] ss:$0 sm:$0xff]  ;;  %v784_v41 = vld [vmem:[%s1857_s4 + $0x10] sm:$0xff] }
  0x26   :  { %1174 = vmatmul.mubr.msk.bf16.gmra.mrb[16].mxu0 %vm254_vm0, %v1245_v19  ;;  %1206 = vmatmul.mubr.msk.bf16.gmra.mrb[16].mxu1 %vm254_vm0, %v1246_v20  ;;  %v816_v42 = vld [vmem:[%s1857_s4 + $0x110] sm:$0xff]  ;;  %v782_v49 = vld [vmem:[%s1857_s4] sm:$0xff]  ;;  %v785_v57 = vld [vmem:[%s1857_s4 + $0x18] sm:$0xff] }
  0x27   :  { %1177 = vmatprep.mubr.msk.bf16.mxu0 %vm254_vm0, %v1247_v21  ;;  %1209 = vmatprep.mubr.msk.bf16.mxu1 %vm254_vm0, %v1248_v22  ;;  %v814_v50 = vld [vmem:[%s1857_s4 + $0x100] sm:$0xff]  ;;  %v817_v58 = vld [vmem:[%s1857_s4 + $0x118] sm:$0xff]  ;;  %v783_v1 = vld [vmem:[%s1857_s4 + $0x8] sm:$0xff] }
  0x28   :  { %v815_v2 = vld [vmem:[%s1857_s4 + $0x108] sm:$0xff] }
  0x2e   :  { %1178 = vmatmul.mubr.msk.bf16.gmra.mrb[20].mxu0 %vm254_vm0, %v1249_v23  ;;  %1210 = vmatmul.mubr.msk.bf16.gmra.mrb[20].mxu1 %vm254_vm0, %v1250_v24 }
  0x2f   :  { %1181 = vmatprep.mubr.msk.bf16.mxu0 %vm254_vm0, %v1251_v25  ;;  %1213 = vmatprep.mubr.msk.bf16.mxu1 %vm254_vm0, %v1252_v26  ;;  %v788_v25 = vld [vmem:[%s1857_s4 + $0x30] sm:$0xff] }
  0x30   :  { %v820_v26 = vld [vmem:[%s1857_s4 + $0x130] sm:$0xff] }
  0x36   :  { %1182 = vmatmul.mubr.msk.bf16.gmra.mrb[24].mxu0 %vm254_vm0, %v1253_v27  ;;  %1214 = vmatmul.mubr.msk.bf16.gmra.mrb[24].mxu1 %vm254_vm0, %v1254_v28 }
  0x37   :  { %1185 = vmatprep.mubr.msk.bf16.mxu0 %vm254_vm0, %v1255_v29  ;;  %1217 = vmatprep.mubr.msk.bf16.mxu1 %vm254_vm0, %v1256_v30 }
  0x3e   :  { %1186 = vmatmul.mubr.msk.bf16.gmra.mrb[28].mxu0 %vm254_vm0, %v1257_v31  ;;  %1218 = vmatmul.mubr.msk.bf16.gmra.mrb[28].mxu1 %vm254_vm0, %v1258_v32 }
  0xd9   :  { %v1159_v34 = vpop.f32.mrb[0].mxu0  ;;  %v1191_v36 = vpop.f32.mrb[0].mxu1 }
  0xda   :  { %v649_v37 = vmul.f32 %v1159_v34, %v1450_v33  ;;  %v681_v38 = vmul.f32 %v1191_v36, %v1450_v33  ;;  %v385_v39 = vpop.f32.mrb[1].mxu0  ;;  %v513_v40 = vpop.f32.mrb[1].mxu1  ;;  %v786_v34 = vld [vmem:[%s1857_s4 + $0x20] sm:$0xff] }
  0xdb   :  { %v647_v43 = vmul.f32 %v1450_v33, %v385_v39  ;;  %v679_v44 = vmul.f32 %v1450_v33, %v513_v40  ;;  %v1160_v45 = vpop.f32.mrb[2].mxu0  ;;  %v1192_v46 = vpop.f32.mrb[2].mxu1  ;;  %v818_v36 = vld [vmem:[%s1857_s4 + $0x120] sm:$0xff] }
  0xdc   :  { %v720_v47 = vadd.f32 %v1455_v35, %v649_v37  ;;  %v752_v48 = vadd.f32 %v1455_v35, %v681_v38  ;;  %v650_v51 = vmul.f32 %v1160_v45, %v1450_v33  ;;  %v682_v52 = vmul.f32 %v1192_v46, %v1450_v33  ;;  %v388_v53 = vpop.f32.mrb[3].mxu0  ;;  %v516_v54 = vpop.f32.mrb[3].mxu1 }
  0xdd   :  { %v718_v55 = vadd.f32 %v1455_v35, %v647_v43  ;;  %v750_v56 = vadd.f32 %v1455_v35, %v679_v44  ;;  %v648_v59 = vmul.f32 %v1450_v33, %v388_v53  ;;  %v680_v60 = vmul.f32 %v1450_v33, %v516_v54  ;;  %v789_v43 = vld [vmem:[%s1857_s4 + $0x38] sm:$0xff] }
  0xde   :  { %v848_v61 = vadd.f32 %v784_v41, %v720_v47  ;;  %v880_v62 = vadd.f32 %v816_v42, %v752_v48  ;;  %v721_v63 = vadd.f32 %v1455_v35, %v650_v51  ;;  %v753_v0 = vadd.f32 %v1455_v35, %v682_v52  ;;  %v821_v44 = vld [vmem:[%s1857_s4 + $0x138] sm:$0xff]  ;;  %v787_v51 = vld [vmem:[%s1857_s4 + $0x28] sm:$0xff] }
  0xdf   :  { %v846_v3 = vadd.f32 %v782_v49, %v718_v55  ;;  %v878_v4 = vadd.f32 %v814_v50, %v750_v56  ;;  %v719_v5 = vadd.f32 %v1455_v35, %v648_v59  ;;  %v751_v6 = vadd.f32 %v1455_v35, %v680_v60  ;;  %v819_v52 = vld [vmem:[%s1857_s4 + $0x128] sm:$0xff] }
  0xe0   :  { %v912_v7 = vmax.f32 %v848_v61, 0.0  ;;  %v944_v8 = vmax.f32 %v880_v62, 0.0  ;;  %v849_v9 = vadd.f32 %v785_v57, %v721_v63  ;;  %v881_v10 = vadd.f32 %v817_v58, %v753_v0 }
  0xe1   :  { %v910_v11 = vmax.f32 %v846_v3, 0.0  ;;  %v942_v12 = vmax.f32 %v878_v4, 0.0  ;;  %v847_v13 = vadd.f32 %v783_v1, %v719_v5  ;;  %v879_v14 = vadd.f32 %v815_v2, %v751_v6  ;;  %v1163_v15 = vpop.f32.mrb[4].mxu0  ;;  %v1195_v16 = vpop.f32.mrb[4].mxu1 }
  0xe2   :  { %977 = vst.msk [vmem:[#allocation2 + $0x10] sm:$0xff] %vm974_vm1, %v912_v7  ;;  %1009 = vst.msk [vmem:[#allocation2 + $0x110] sm:$0xff] %vm974_vm1, %v944_v8  ;;  %v913_v17 = vmax.f32 %v849_v9, 0.0  ;;  %v945_v18 = vmax.f32 %v881_v10, 0.0  ;;  %v653_v19 = vmul.f32 %v1163_v15, %v1450_v33  ;;  %v685_v20 = vmul.f32 %v1195_v16, %v1450_v33  ;;  %v401_v21 = vpop.f32.mrb[5].mxu0  ;;  %v529_v22 = vpop.f32.mrb[5].mxu1 }
  0xe3   :  { %975 = vst.msk [vmem:[#allocation2] sm:$0xff] %vm974_vm1, %v910_v11  ;;  %1007 = vst.msk [vmem:[#allocation2 + $0x100] sm:$0xff] %vm974_vm1, %v942_v12  ;;  %v911_v23 = vmax.f32 %v847_v13, 0.0  ;;  %v943_v24 = vmax.f32 %v879_v14, 0.0  ;;  %v651_v27 = vmul.f32 %v1450_v33, %v401_v21  ;;  %v683_v28 = vmul.f32 %v1450_v33, %v529_v22  ;;  %v1164_v29 = vpop.f32.mrb[6].mxu0  ;;  %v1196_v30 = vpop.f32.mrb[6].mxu1 }
  0xe4   :  { %978 = vst.msk [vmem:[#allocation2 + $0x18] sm:$0xff] %vm974_vm1, %v913_v17  ;;  %1010 = vst.msk [vmem:[#allocation2 + $0x118] sm:$0xff] %vm974_vm1, %v945_v18  ;;  %v724_v31 = vadd.f32 %v1455_v35, %v653_v19  ;;  %v756_v32 = vadd.f32 %v1455_v35, %v685_v20  ;;  %v654_v37 = vmul.f32 %v1164_v29, %v1450_v33  ;;  %v404_v39 = vpop.f32.mrb[7].mxu0  ;;  %v532_v40 = vpop.f32.mrb[7].mxu1  ;;  %v792_v11 = vld [vmem:[%s1857_s4 + $0x50] sm:$0xff]  ;;  %v790_v19 = vld [vmem:[%s1857_s4 + $0x40] sm:$0xff] }
  0xe5   :  { %v686_v38 = vmul.f32 %v1196_v30, %v1450_v33  ;;  %976 = vst.msk [vmem:[#allocation2 + $0x8] sm:$0xff] %vm974_vm1, %v911_v23  ;;  %1008 = vst.msk [vmem:[#allocation2 + $0x108] sm:$0xff] %vm974_vm1, %v943_v24  ;;  %v722_v41 = vadd.f32 %v1455_v35, %v651_v27  ;;  %v754_v42 = vadd.f32 %v1455_v35, %v683_v28  ;;  %v824_v12 = vld [vmem:[%s1857_s4 + $0x150] sm:$0xff]  ;;  %v822_v20 = vld [vmem:[%s1857_s4 + $0x140] sm:$0xff] }
  0xe6   :  { %v652_v45 = vmul.f32 %v1450_v33, %v404_v39  ;;  %v684_v46 = vmul.f32 %v1450_v33, %v532_v40  ;;  %v852_v47 = vadd.f32 %v788_v25, %v724_v31  ;;  %v884_v48 = vadd.f32 %v820_v26, %v756_v32  ;;  %v793_v27 = vld [vmem:[%s1857_s4 + $0x58] sm:$0xff] }
  0xe7   :  { %v725_v49 = vadd.f32 %v1455_v35, %v654_v37  ;;  %v757_v50 = vadd.f32 %v1455_v35, %v686_v38  ;;  %v850_v53 = vadd.f32 %v786_v34, %v722_v41  ;;  %v882_v54 = vadd.f32 %v818_v36, %v754_v42  ;;  %v825_v28 = vld [vmem:[%s1857_s4 + $0x158] sm:$0xff]  ;;  %v791_v37 = vld [vmem:[%s1857_s4 + $0x48] sm:$0xff] }
  0xe8   :  { %v723_v55 = vadd.f32 %v1455_v35, %v652_v45  ;;  %v755_v56 = vadd.f32 %v1455_v35, %v684_v46  ;;  %v916_v57 = vmax.f32 %v852_v47, 0.0  ;;  %v948_v58 = vmax.f32 %v884_v48, 0.0  ;;  %v823_v38 = vld [vmem:[%s1857_s4 + $0x148] sm:$0xff] }
  0xe9   :  { %v853_v59 = vadd.f32 %v789_v43, %v725_v49  ;;  %v885_v60 = vadd.f32 %v821_v44, %v757_v50  ;;  %v914_v61 = vmax.f32 %v850_v53, 0.0  ;;  %v946_v62 = vmax.f32 %v882_v54, 0.0  ;;  %v1167_v1 = vpop.f32.mrb[8].mxu0  ;;  %v1199_v2 = vpop.f32.mrb[8].mxu1 }
  0xea   :  { %v851_v63 = vadd.f32 %v787_v51, %v723_v55  ;;  %v883_v0 = vadd.f32 %v819_v52, %v755_v56  ;;  %981 = vst.msk [vmem:[#allocation2 + $0x30] sm:$0xff] %vm974_vm1, %v916_v57  ;;  %1013 = vst.msk [vmem:[#allocation2 + $0x130] sm:$0xff] %vm974_vm1, %v948_v58  ;;  %v657_v5 = vmul.f32 %v1167_v1, %v1450_v33  ;;  %v417_v7 = vpop.f32.mrb[9].mxu0  ;;  %v545_v8 = vpop.f32.mrb[9].mxu1 }
  0xeb   :  { %v917_v3 = vmax.f32 %v853_v59, 0.0  ;;  %v949_v4 = vmax.f32 %v885_v60, 0.0  ;;  %v689_v6 = vmul.f32 %v1199_v2, %v1450_v33  ;;  %979 = vst.msk [vmem:[#allocation2 + $0x20] sm:$0xff] %vm974_vm1, %v914_v61  ;;  %1011 = vst.msk [vmem:[#allocation2 + $0x120] sm:$0xff] %vm974_vm1, %v946_v62  ;;  %v655_v13 = vmul.f32 %v1450_v33, %v417_v7  ;;  %v1168_v15 = vpop.f32.mrb[10].mxu0  ;;  %v1200_v16 = vpop.f32.mrb[10].mxu1 }
  0xec   :  { %v915_v9 = vmax.f32 %v851_v63, 0.0  ;;  %v947_v10 = vmax.f32 %v883_v0, 0.0  ;;  %v687_v14 = vmul.f32 %v1450_v33, %v545_v8  ;;  %v728_v17 = vadd.f32 %v1455_v35, %v657_v5  ;;  %v420_v23 = vpop.f32.mrb[11].mxu0  ;;  %v548_v24 = vpop.f32.mrb[11].mxu1  ;;  %v796_v61 = vld [vmem:[%s1857_s4 + $0x70] sm:$0xff]  ;;  %v794_v5 = vld [vmem:[%s1857_s4 + $0x60] sm:$0xff] }
  0xed   :  { %982 = vst.msk [vmem:[#allocation2 + $0x38] sm:$0xff] %vm974_vm1, %v917_v3  ;;  %1014 = vst.msk [vmem:[#allocation2 + $0x138] sm:$0xff] %vm974_vm1, %v949_v4  ;;  %v760_v18 = vadd.f32 %v1455_v35, %v689_v6  ;;  %v658_v21 = vmul.f32 %v1168_v15, %v1450_v33  ;;  %v690_v22 = vmul.f32 %v1200_v16, %v1450_v33  ;;  %v828_v62 = vld [vmem:[%s1857_s4 + $0x170] sm:$0xff]  ;;  %v826_v6 = vld [vmem:[%s1857_s4 + $0x160] sm:$0xff] }
  0xee   :  { %980 = vst.msk [vmem:[#allocation2 + $0x28] sm:$0xff] %vm974_vm1, %v915_v9  ;;  %1012 = vst.msk [vmem:[#allocation2 + $0x128] sm:$0xff] %vm974_vm1, %v947_v10  ;;  %v726_v25 = vadd.f32 %v1455_v35, %v655_v13  ;;  %v758_v26 = vadd.f32 %v1455_v35, %v687_v14  ;;  %v656_v29 = vmul.f32 %v1450_v33, %v420_v23  ;;  %v797_v13 = vld [vmem:[%s1857_s4 + $0x78] sm:$0xff] }
  0xef   :  { %v688_v30 = vmul.f32 %v1450_v33, %v548_v24  ;;  %v856_v31 = vadd.f32 %v792_v11, %v728_v17  ;;  %v888_v32 = vadd.f32 %v824_v12, %v760_v18  ;;  %v729_v34 = vadd.f32 %v1455_v35, %v658_v21  ;;  %v829_v14 = vld [vmem:[%s1857_s4 + $0x178] sm:$0xff]  ;;  %v795_v21 = vld [vmem:[%s1857_s4 + $0x68] sm:$0xff] }
  0xf0   :  { %v761_v36 = vadd.f32 %v1455_v35, %v690_v22  ;;  %v854_v39 = vadd.f32 %v790_v19, %v726_v25  ;;  %v886_v40 = vadd.f32 %v822_v20, %v758_v26  ;;  %v727_v41 = vadd.f32 %v1455_v35, %v656_v29  ;;  %v827_v22 = vld [vmem:[%s1857_s4 + $0x168] sm:$0xff] }
  0xf1   :  { %v759_v42 = vadd.f32 %v1455_v35, %v688_v30  ;;  %v920_v43 = vmax.f32 %v856_v31, 0.0  ;;  %v952_v44 = vmax.f32 %v888_v32, 0.0  ;;  %v857_v45 = vadd.f32 %v793_v27, %v729_v34  ;;  %v1171_v51 = vpop.f32.mrb[12].mxu0  ;;  %v1203_v52 = vpop.f32.mrb[12].mxu1 }
  0xf2   :  { %v889_v46 = vadd.f32 %v825_v28, %v761_v36  ;;  %v918_v47 = vmax.f32 %v854_v39, 0.0  ;;  %v950_v48 = vmax.f32 %v886_v40, 0.0  ;;  %v855_v49 = vadd.f32 %v791_v37, %v727_v41  ;;  %v433_v57 = vpop.f32.mrb[13].mxu0  ;;  %v561_v58 = vpop.f32.mrb[13].mxu1 }
  0xf3   :  { %v887_v50 = vadd.f32 %v823_v38, %v759_v42  ;;  %985 = vst.msk [vmem:[#allocation2 + $0x50] sm:$0xff] %vm974_vm1, %v920_v43  ;;  %1017 = vst.msk [vmem:[#allocation2 + $0x150] sm:$0xff] %vm974_vm1, %v952_v44  ;;  %v921_v53 = vmax.f32 %v857_v45, 0.0  ;;  %v661_v55 = vmul.f32 %v1171_v51, %v1450_v33  ;;  %v693_v56 = vmul.f32 %v1203_v52, %v1450_v33  ;;  %v1172_v1 = vpop.f32.mrb[14].mxu0  ;;  %v1204_v2 = vpop.f32.mrb[14].mxu1 }
  0xf4   :  { %v953_v54 = vmax.f32 %v889_v46, 0.0  ;;  %983 = vst.msk [vmem:[#allocation2 + $0x40] sm:$0xff] %vm974_vm1, %v918_v47  ;;  %1015 = vst.msk [vmem:[#allocation2 + $0x140] sm:$0xff] %vm974_vm1, %v950_v48  ;;  %v919_v59 = vmax.f32 %v855_v49, 0.0  ;;  %v659_v63 = vmul.f32 %v1450_v33, %v433_v57  ;;  %v691_v0 = vmul.f32 %v1450_v33, %v561_v58  ;;  %v436_v9 = vpop.f32.mrb[15].mxu0  ;;  %v564_v10 = vpop.f32.mrb[15].mxu1 }
  0xf5   :  { %v951_v60 = vmax.f32 %v887_v50, 0.0  ;;  %986 = vst.msk [vmem:[#allocation2 + $0x58] sm:$0xff] %vm974_vm1, %v921_v53  ;;  %v732_v3 = vadd.f32 %v1455_v35, %v661_v55  ;;  %v764_v4 = vadd.f32 %v1455_v35, %v693_v56  ;;  %v662_v7 = vmul.f32 %v1172_v1, %v1450_v33  ;;  %v800_v47 = vld [vmem:[%s1857_s4 + $0x90] sm:$0xff]  ;;  %v798_v55 = vld [vmem:[%s1857_s4 + $0x80] sm:$0xff] }
  0xf6   :  { %1018 = vst.msk [vmem:[#allocation2 + $0x158] sm:$0xff] %vm974_vm1, %v953_v54  ;;  %v694_v8 = vmul.f32 %v1204_v2, %v1450_v33  ;;  %984 = vst.msk [vmem:[#allocation2 + $0x48] sm:$0xff] %vm974_vm1, %v919_v59  ;;  %v730_v11 = vadd.f32 %v1455_v35, %v659_v63  ;;  %v762_v12 = vadd.f32 %v1455_v35, %v691_v0  ;;  %v832_v48 = vld [vmem:[%s1857_s4 + $0x190] sm:$0xff]  ;;  %v830_v56 = vld [vmem:[%s1857_s4 + $0x180] sm:$0xff] }
  0xf7   :  { %1016 = vst.msk [vmem:[#allocation2 + $0x148] sm:$0xff] %vm974_vm1, %v951_v60  ;;  %v660_v15 = vmul.f32 %v1450_v33, %v436_v9  ;;  %v692_v16 = vmul.f32 %v1450_v33, %v564_v10  ;;  %v860_v17 = vadd.f32 %v796_v61, %v732_v3  ;;  %v892_v18 = vadd.f32 %v828_v62, %v764_v4  ;;  %v801_v63 = vld [vmem:[%s1857_s4 + $0x98] sm:$0xff] }
  0xf8   :  { %v733_v19 = vadd.f32 %v1455_v35, %v662_v7  ;;  %v765_v20 = vadd.f32 %v1455_v35, %v694_v8  ;;  %v858_v23 = vadd.f32 %v794_v5, %v730_v11  ;;  %v890_v24 = vadd.f32 %v826_v6, %v762_v12  ;;  %v833_v0 = vld [vmem:[%s1857_s4 + $0x198] sm:$0xff]  ;;  %v799_v7 = vld [vmem:[%s1857_s4 + $0x88] sm:$0xff] }
  0xf9   :  { %v731_v25 = vadd.f32 %v1455_v35, %v660_v15  ;;  %v763_v26 = vadd.f32 %v1455_v35, %v692_v16  ;;  %v924_v27 = vmax.f32 %v860_v17, 0.0  ;;  %v956_v28 = vmax.f32 %v892_v18, 0.0  ;;  %v1175_v37 = vpop.f32.mrb[16].mxu0  ;;  %v1207_v38 = vpop.f32.mrb[16].mxu1  ;;  %v831_v8 = vld [vmem:[%s1857_s4 + $0x188] sm:$0xff] }
  0xfa   :  { %v861_v29 = vadd.f32 %v797_v13, %v733_v19  ;;  %v893_v30 = vadd.f32 %v829_v14, %v765_v20  ;;  %v922_v31 = vmax.f32 %v858_v23, 0.0  ;;  %v954_v32 = vmax.f32 %v890_v24, 0.0  ;;  %v449_v43 = vpop.f32.mrb[17].mxu0  ;;  %v577_v44 = vpop.f32.mrb[17].mxu1 }
  0xfb   :  { %v859_v34 = vadd.f32 %v795_v21, %v731_v25  ;;  %v891_v36 = vadd.f32 %v827_v22, %v763_v26  ;;  %989 = vst.msk [vmem:[#allocation2 + $0x70] sm:$0xff] %vm974_vm1, %v924_v27  ;;  %1021 = vst.msk [vmem:[#allocation2 + $0x170] sm:$0xff] %vm974_vm1, %v956_v28  ;;  %v665_v41 = vmul.f32 %v1175_v37, %v1450_v33  ;;  %v1176_v51 = vpop.f32.mrb[18].mxu0  ;;  %v1208_v52 = vpop.f32.mrb[18].mxu1 }
  0xfc   :  { %v925_v39 = vmax.f32 %v861_v29, 0.0  ;;  %v957_v40 = vmax.f32 %v893_v30, 0.0  ;;  %v697_v42 = vmul.f32 %v1207_v38, %v1450_v33  ;;  %987 = vst.msk [vmem:[#allocation2 + $0x60] sm:$0xff] %vm974_vm1, %v922_v31  ;;  %1019 = vst.msk [vmem:[#allocation2 + $0x160] sm:$0xff] %vm974_vm1, %v954_v32  ;;  %v663_v49 = vmul.f32 %v1450_v33, %v449_v43  ;;  %v452_v59 = vpop.f32.mrb[19].mxu0  ;;  %v580_v60 = vpop.f32.mrb[19].mxu1 }
  0xfd   :  { %v923_v45 = vmax.f32 %v859_v34, 0.0  ;;  %v955_v46 = vmax.f32 %v891_v36, 0.0  ;;  %v695_v50 = vmul.f32 %v1450_v33, %v577_v44  ;;  %v736_v53 = vadd.f32 %v1455_v35, %v665_v41  ;;  %v804_v31 = vld [vmem:[%s1857_s4 + $0xb0] sm:$0xff]  ;;  %v802_v41 = vld [vmem:[%s1857_s4 + $0xa0] sm:$0xff] }
  0xfe   :  { %990 = vst.msk [vmem:[#allocation2 + $0x78] sm:$0xff] %vm974_vm1, %v925_v39  ;;  %1022 = vst.msk [vmem:[#allocation2 + $0x178] sm:$0xff] %vm974_vm1, %v957_v40  ;;  %v768_v54 = vadd.f32 %v1455_v35, %v697_v42  ;;  %v666_v57 = vmul.f32 %v1176_v51, %v1450_v33  ;;  %v698_v58 = vmul.f32 %v1208_v52, %v1450_v33  ;;  %v836_v32 = vld [vmem:[%s1857_s4 + $0x1b0] sm:$0xff]  ;;  %v834_v42 = vld [vmem:[%s1857_s4 + $0x1a0] sm:$0xff] }
  0xff   :  { %988 = vst.msk [vmem:[#allocation2 + $0x68] sm:$0xff] %vm974_vm1, %v923_v45  ;;  %1020 = vst.msk [vmem:[#allocation2 + $0x168] sm:$0xff] %vm974_vm1, %v955_v46  ;;  %v734_v61 = vadd.f32 %v1455_v35, %v663_v49  ;;  %v766_v62 = vadd.f32 %v1455_v35, %v695_v50  ;;  %v664_v1 = vmul.f32 %v1450_v33, %v452_v59  ;;  %v805_v49 = vld [vmem:[%s1857_s4 + $0xb8] sm:$0xff] }
 0x100   :  { %v696_v2 = vmul.f32 %v1450_v33, %v580_v60  ;;  %v864_v3 = vadd.f32 %v800_v47, %v736_v53  ;;  %v896_v4 = vadd.f32 %v832_v48, %v768_v54  ;;  %v737_v5 = vadd.f32 %v1455_v35, %v666_v57  ;;  %v837_v50 = vld [vmem:[%s1857_s4 + $0x1b8] sm:$0xff]  ;;  %v803_v57 = vld [vmem:[%s1857_s4 + $0xa8] sm:$0xff] }
 0x101   :  { %v769_v6 = vadd.f32 %v1455_v35, %v698_v58  ;;  %v862_v9 = vadd.f32 %v798_v55, %v734_v61  ;;  %v894_v10 = vadd.f32 %v830_v56, %v766_v62  ;;  %v735_v11 = vadd.f32 %v1455_v35, %v664_v1  ;;  %v1179_v21 = vpop.f32.mrb[20].mxu0  ;;  %v1211_v22 = vpop.f32.mrb[20].mxu1  ;;  %v835_v58 = vld [vmem:[%s1857_s4 + $0x1a8] sm:$0xff] }
 0x102   :  { %v767_v12 = vadd.f32 %v1455_v35, %v696_v2  ;;  %v928_v13 = vmax.f32 %v864_v3, 0.0  ;;  %v960_v14 = vmax.f32 %v896_v4, 0.0  ;;  %v865_v15 = vadd.f32 %v801_v63, %v737_v5  ;;  %v465_v27 = vpop.f32.mrb[21].mxu0  ;;  %v593_v28 = vpop.f32.mrb[21].mxu1 }
 0x103   :  { %v897_v16 = vadd.f32 %v833_v0, %v769_v6  ;;  %v926_v17 = vmax.f32 %v862_v9, 0.0  ;;  %v958_v18 = vmax.f32 %v894_v10, 0.0  ;;  %v863_v19 = vadd.f32 %v799_v7, %v735_v11  ;;  %v1180_v37 = vpop.f32.mrb[22].mxu0  ;;  %v1212_v38 = vpop.f32.mrb[22].mxu1 }
 0x104   :  { %v895_v20 = vadd.f32 %v831_v8, %v767_v12  ;;  %993 = vst.msk [vmem:[#allocation2 + $0x90] sm:$0xff] %vm974_vm1, %v928_v13  ;;  %1025 = vst.msk [vmem:[#allocation2 + $0x190] sm:$0xff] %vm974_vm1, %v960_v14  ;;  %v929_v23 = vmax.f32 %v865_v15, 0.0  ;;  %v669_v25 = vmul.f32 %v1179_v21, %v1450_v33  ;;  %v701_v26 = vmul.f32 %v1211_v22, %v1450_v33  ;;  %v468_v45 = vpop.f32.mrb[23].mxu0  ;;  %v596_v46 = vpop.f32.mrb[23].mxu1 }
 0x105   :  { %v961_v24 = vmax.f32 %v897_v16, 0.0  ;;  %991 = vst.msk [vmem:[#allocation2 + $0x80] sm:$0xff] %vm974_vm1, %v926_v17  ;;  %1023 = vst.msk [vmem:[#allocation2 + $0x180] sm:$0xff] %vm974_vm1, %v958_v18  ;;  %v927_v29 = vmax.f32 %v863_v19, 0.0  ;;  %v667_v34 = vmul.f32 %v1450_v33, %v465_v27  ;;  %v699_v36 = vmul.f32 %v1450_v33, %v593_v28  ;;  %v808_v17 = vld [vmem:[%s1857_s4 + $0xd0] sm:$0xff] }
 0x106   :  { %v959_v30 = vmax.f32 %v895_v20, 0.0  ;;  %994 = vst.msk [vmem:[#allocation2 + $0x98] sm:$0xff] %vm974_vm1, %v929_v23  ;;  %v740_v39 = vadd.f32 %v1455_v35, %v669_v25  ;;  %v772_v40 = vadd.f32 %v1455_v35, %v701_v26  ;;  %v670_v43 = vmul.f32 %v1180_v37, %v1450_v33  ;;  %v840_v18 = vld [vmem:[%s1857_s4 + $0x1d0] sm:$0xff]  ;;  %v806_v25 = vld [vmem:[%s1857_s4 + $0xc0] sm:$0xff] }
 0x107   :  { %1026 = vst.msk [vmem:[#allocation2 + $0x198] sm:$0xff] %vm974_vm1, %v961_v24  ;;  %v702_v44 = vmul.f32 %v1212_v38, %v1450_v33  ;;  %992 = vst.msk [vmem:[#allocation2 + $0x88] sm:$0xff] %vm974_vm1, %v927_v29  ;;  %v738_v47 = vadd.f32 %v1455_v35, %v667_v34  ;;  %v770_v48 = vadd.f32 %v1455_v35, %v699_v36  ;;  %v838_v26 = vld [vmem:[%s1857_s4 + $0x1c0] sm:$0xff]  ;;  %v809_v34 = vld [vmem:[%s1857_s4 + $0xd8] sm:$0xff] }
 0x108   :  { %1024 = vst.msk [vmem:[#allocation2 + $0x188] sm:$0xff] %vm974_vm1, %v959_v30  ;;  %v668_v51 = vmul.f32 %v1450_v33, %v468_v45  ;;  %v700_v52 = vmul.f32 %v1450_v33, %v596_v46  ;;  %v868_v53 = vadd.f32 %v804_v31, %v740_v39  ;;  %v900_v54 = vadd.f32 %v836_v32, %v772_v40  ;;  %v841_v36 = vld [vmem:[%s1857_s4 + $0x1d8] sm:$0xff] }
 0x109   :  { %v741_v55 = vadd.f32 %v1455_v35, %v670_v43  ;;  %v773_v56 = vadd.f32 %v1455_v35, %v702_v44  ;;  %v866_v59 = vadd.f32 %v802_v41, %v738_v47  ;;  %v898_v60 = vadd.f32 %v834_v42, %v770_v48  ;;  %v1183_v7 = vpop.f32.mrb[24].mxu0  ;;  %v1215_v8 = vpop.f32.mrb[24].mxu1  ;;  %v807_v43 = vld [vmem:[%s1857_s4 + $0xc8] sm:$0xff] }
 0x10a   :  { %v739_v61 = vadd.f32 %v1455_v35, %v668_v51  ;;  %v771_v62 = vadd.f32 %v1455_v35, %v700_v52  ;;  %v932_v63 = vmax.f32 %v868_v53, 0.0  ;;  %v964_v0 = vmax.f32 %v900_v54, 0.0  ;;  %v481_v13 = vpop.f32.mrb[25].mxu0  ;;  %v609_v14 = vpop.f32.mrb[25].mxu1  ;;  %v839_v44 = vld [vmem:[%s1857_s4 + $0x1c8] sm:$0xff] }
 0x10b   :  { %v869_v1 = vadd.f32 %v805_v49, %v741_v55  ;;  %v901_v2 = vadd.f32 %v837_v50, %v773_v56  ;;  %v930_v3 = vmax.f32 %v866_v59, 0.0  ;;  %v962_v4 = vmax.f32 %v898_v60, 0.0  ;;  %v1184_v21 = vpop.f32.mrb[26].mxu0  ;;  %v1216_v22 = vpop.f32.mrb[26].mxu1 }
 0x10c   :  { %v867_v5 = vadd.f32 %v803_v57, %v739_v61  ;;  %v899_v6 = vadd.f32 %v835_v58, %v771_v62  ;;  %997 = vst.msk [vmem:[#allocation2 + $0xb0] sm:$0xff] %vm974_vm1, %v932_v63  ;;  %1029 = vst.msk [vmem:[#allocation2 + $0x1b0] sm:$0xff] %vm974_vm1, %v964_v0  ;;  %v673_v11 = vmul.f32 %v1183_v7, %v1450_v33  ;;  %v484_v29 = vpop.f32.mrb[27].mxu0  ;;  %v612_v30 = vpop.f32.mrb[27].mxu1 }
 0x10d   :  { %v933_v9 = vmax.f32 %v869_v1, 0.0  ;;  %v965_v10 = vmax.f32 %v901_v2, 0.0  ;;  %v705_v12 = vmul.f32 %v1215_v8, %v1450_v33  ;;  %995 = vst.msk [vmem:[#allocation2 + $0xa0] sm:$0xff] %vm974_vm1, %v930_v3  ;;  %1027 = vst.msk [vmem:[#allocation2 + $0x1a0] sm:$0xff] %vm974_vm1, %v962_v4  ;;  %v671_v19 = vmul.f32 %v1450_v33, %v481_v13  ;;  %v812_v3 = vld [vmem:[%s1857_s4 + $0xf0] sm:$0xff] }
 0x10e   :  { %v931_v15 = vmax.f32 %v867_v5, 0.0  ;;  %v963_v16 = vmax.f32 %v899_v6, 0.0  ;;  %v703_v20 = vmul.f32 %v1450_v33, %v609_v14  ;;  %v744_v23 = vadd.f32 %v1455_v35, %v673_v11  ;;  %v844_v4 = vld [vmem:[%s1857_s4 + $0x1f0] sm:$0xff]  ;;  %v810_v11 = vld [vmem:[%s1857_s4 + $0xe0] sm:$0xff] }
 0x10f   :  { %998 = vst.msk [vmem:[#allocation2 + $0xb8] sm:$0xff] %vm974_vm1, %v933_v9  ;;  %1030 = vst.msk [vmem:[#allocation2 + $0x1b8] sm:$0xff] %vm974_vm1, %v965_v10  ;;  %v776_v24 = vadd.f32 %v1455_v35, %v705_v12  ;;  %v674_v27 = vmul.f32 %v1184_v21, %v1450_v33  ;;  %v706_v28 = vmul.f32 %v1216_v22, %v1450_v33  ;;  %v842_v12 = vld [vmem:[%s1857_s4 + $0x1e0] sm:$0xff] }
 0x110   :  { %996 = vst.msk [vmem:[#allocation2 + $0xa8] sm:$0xff] %vm974_vm1, %v931_v15  ;;  %1028 = vst.msk [vmem:[#allocation2 + $0x1a8] sm:$0xff] %vm974_vm1, %v963_v16  ;;  %v742_v31 = vadd.f32 %v1455_v35, %v671_v19  ;;  %v774_v32 = vadd.f32 %v1455_v35, %v703_v20  ;;  %v672_v37 = vmul.f32 %v1450_v33, %v484_v29  ;;  %v813_v19 = vld [vmem:[%s1857_s4 + $0xf8] sm:$0xff] }
 0x111   :  { %v704_v38 = vmul.f32 %v1450_v33, %v612_v30  ;;  %v872_v39 = vadd.f32 %v808_v17, %v744_v23  ;;  %v904_v40 = vadd.f32 %v840_v18, %v776_v24  ;;  %v745_v41 = vadd.f32 %v1455_v35, %v674_v27  ;;  %v1187_v57 = vpop.f32.mrb[28].mxu0  ;;  %v1219_v58 = vpop.f32.mrb[28].mxu1  ;;  %v845_v20 = vld [vmem:[%s1857_s4 + $0x1f8] sm:$0xff]  ;;  %v811_v27 = vld [vmem:[%s1857_s4 + $0xe8] sm:$0xff] }
 0x112   :  { %v777_v42 = vadd.f32 %v1455_v35, %v706_v28  ;;  %v870_v45 = vadd.f32 %v806_v25, %v742_v31  ;;  %v902_v46 = vadd.f32 %v838_v26, %v774_v32  ;;  %v743_v47 = vadd.f32 %v1455_v35, %v672_v37  ;;  %v497_v63 = vpop.f32.mrb[29].mxu0  ;;  %v625_v0 = vpop.f32.mrb[29].mxu1  ;;  %v843_v28 = vld [vmem:[%s1857_s4 + $0x1e8] sm:$0xff]  ;;  %s1259_s4 = scalar_lea.vmem %s1045_s20, 8192 }
 0x113   :  { %v775_v48 = vadd.f32 %v1455_v35, %v704_v38  ;;  %v936_v49 = vmax.f32 %v872_v39, 0.0  ;;  %v968_v50 = vmax.f32 %v904_v40, 0.0  ;;  %v873_v51 = vadd.f32 %v809_v34, %v745_v41  ;;  %v1188_v7 = vpop.f32.mrb[30].mxu0  ;;  %v1220_v8 = vpop.f32.mrb[30].mxu1  ;;  %p1260_p0 = scmp.ne.s32.totalorder %s1045_s20, %s1259_s4  ;;  %p1265_p2 = scmp.lt.s32.totalorder %s1259_s4, %s1259_s4 }
 0x114   :  { %v905_v52 = vadd.f32 %v841_v36, %v777_v42  ;;  %v934_v53 = vmax.f32 %v870_v45, 0.0  ;;  %v966_v54 = vmax.f32 %v902_v46, 0.0  ;;  %v871_v55 = vadd.f32 %v807_v43, %v743_v47  ;;  %v500_v15 = vpop.f32.mrb[31].mxu0  ;;  %v628_v16 = vpop.f32.mrb[31].mxu1 }
 0x115   :  { %v903_v56 = vadd.f32 %v839_v44, %v775_v48  ;;  %1001 = vst.msk [vmem:[#allocation2 + $0xd0] sm:$0xff] %vm974_vm1, %v936_v49  ;;  %1033 = vst.msk [vmem:[#allocation2 + $0x1d0] sm:$0xff] %vm974_vm1, %v968_v50  ;;  %v937_v59 = vmax.f32 %v873_v51, 0.0  ;;  %v677_v61 = vmul.f32 %v1187_v57, %v1450_v33  ;;  %v709_v62 = vmul.f32 %v1219_v58, %v1450_v33  ;;  %p1266_p3 = por %p1265_p2, %p1264_p1 }
 0x116   :  { %v969_v60 = vmax.f32 %v905_v52, 0.0  ;;  %999 = vst.msk [vmem:[#allocation2 + $0xc0] sm:$0xff] %vm974_vm1, %v934_v53  ;;  %1031 = vst.msk [vmem:[#allocation2 + $0x1c0] sm:$0xff] %vm974_vm1, %v966_v54  ;;  %v935_v1 = vmax.f32 %v871_v55, 0.0  ;;  %v675_v5 = vmul.f32 %v1450_v33, %v497_v63  ;;  %v707_v6 = vmul.f32 %v1450_v33, %v625_v0 }
 0x117   :  { %v967_v2 = vmax.f32 %v903_v56, 0.0  ;;  %1002 = vst.msk [vmem:[#allocation2 + $0xd8] sm:$0xff] %vm974_vm1, %v937_v59  ;;  %v748_v9 = vadd.f32 %v1455_v35, %v677_v61  ;;  %v780_v10 = vadd.f32 %v1455_v35, %v709_v62  ;;  %v678_v13 = vmul.f32 %v1188_v7, %v1450_v33  ;;  %p1267_p4 = pnand %p1266_p3, %p1260_p0 }
 0x118   :  { %1034 = vst.msk [vmem:[#allocation2 + $0x1d8] sm:$0xff] %vm974_vm1, %v969_v60  ;;  %v710_v14 = vmul.f32 %v1220_v8, %v1450_v33  ;;  %1000 = vst.msk [vmem:[#allocation2 + $0xc8] sm:$0xff] %vm974_vm1, %v935_v1  ;;  %v746_v17 = vadd.f32 %v1455_v35, %v675_v5  ;;  %v778_v18 = vadd.f32 %v1455_v35, %v707_v6 }
 0x119   :  { %1032 = vst.msk [vmem:[#allocation2 + $0x1c8] sm:$0xff] %vm974_vm1, %v967_v2  ;;  %v676_v21 = vmul.f32 %v1450_v33, %v500_v15  ;;  %v708_v22 = vmul.f32 %v1450_v33, %v628_v16  ;;  %v876_v23 = vadd.f32 %v812_v3, %v748_v9  ;;  %v908_v24 = vadd.f32 %v844_v4, %v780_v10 }
 0x11a   :  { %v749_v25 = vadd.f32 %v1455_v35, %v678_v13  ;;  %v781_v26 = vadd.f32 %v1455_v35, %v710_v14  ;;  %v874_v29 = vadd.f32 %v810_v11, %v746_v17  ;;  %v906_v30 = vadd.f32 %v842_v12, %v778_v18 }
 0x11b   :  { %v747_v31 = vadd.f32 %v1455_v35, %v676_v21  ;;  %v779_v33 = vadd.f32 %v1455_v35, %v708_v22  ;;  %v940_v32 = vmax.f32 %v876_v23, 0.0  ;;  %v972_v34 = vmax.f32 %v908_v24, 0.0 }
 0x11c   :  { %v877_v36 = vadd.f32 %v813_v19, %v749_v25  ;;  %v909_v37 = vadd.f32 %v845_v20, %v781_v26  ;;  %v938_v38 = vmax.f32 %v874_v29, 0.0  ;;  %v970_v39 = vmax.f32 %v906_v30, 0.0 }
 0x11d   :  { %v875_v40 = vadd.f32 %v811_v27, %v747_v31  ;;  %v907_v41 = vadd.f32 %v843_v28, %v779_v33  ;;  %1005 = vst.msk [vmem:[#allocation2 + $0xf0] sm:$0xff] %vm974_vm1, %v940_v32  ;;  %1037 = vst.msk [vmem:[#allocation2 + $0x1f0] sm:$0xff] %vm974_vm1, %v972_v34 }
 0x11e   :  { %v941_v42 = vmax.f32 %v877_v36, 0.0  ;;  %v973_v43 = vmax.f32 %v909_v37, 0.0  ;;  %1003 = vst.msk [vmem:[#allocation2 + $0xe0] sm:$0xff] %vm974_vm1, %v938_v38  ;;  %1035 = vst.msk [vmem:[#allocation2 + $0x1e0] sm:$0xff] %vm974_vm1, %v970_v39 }
 0x11f   :  { %v939_v35 = vmax.f32 %v875_v40, 0.0  ;;  %v971_v44 = vmax.f32 %v907_v41, 0.0 }
 0x120   :  { %1006 = vst.msk [vmem:[#allocation2 + $0xf8] sm:$0xff] %vm974_vm1, %v941_v42  ;;  %1038 = vst.msk [vmem:[#allocation2 + $0x1f8] sm:$0xff] %vm974_vm1, %v973_v43 }
 0x121   :  { %1004 = vst.msk [vmem:[#allocation2 + $0xe8] sm:$0xff] %vm974_vm1, %v939_v35  ;;  %1036 = vst.msk [vmem:[#allocation2 + $0x1e8] sm:$0xff] %vm974_vm1, %v971_v44 }
 0x122   :  { %1270 = shalt.err (!%p1267_p4)
}
 0x123   :  { %s1271_s23 = scalar_lea.hbm %s1858_s5, 8192 }
 0x124   :  { %p1272_p5 = scmp.ne.s32.totalorder %s1858_s5, %s1271_s23  ;;  %p1275_p6 = scmp.lt.u32.totalorder %s1271_s23, %s1858_s5 }
 0x126   :  { %p1277_p7 = pnand %p1275_p6, %p1272_p5 }
 0x128   :  { %1280 = shalt.err (!%p1277_p7)
}
 0x129   :  { %s1284_s27 = smov 128   ;;  %s1285_s28 = smov 8  }
 0x12a   :  { %1050 = dma.vmem_to_hbm [thread:$0]  %s1045_s20, 8192, %s1858_s5, [#allocation3], %s1284_s27, %s1284_s27, %s1285_s28  }
 0x12b   :  { %1281 = dma.done.wait [#allocation3], 8192  }
 0x12c   :  { %1282 = vsyncadd [#allocation3], 4294959104 }
 0x12d   :  { %1054 = vsyncpa [#allocation3], 1 }

// kernel: bottleneck_forward.4
= control target key start
LH: loop header
LB: loop body
LE: loop exit
PB: predicated region body
PF: predicated region fallthrough
CT: control target
= control target key end

     0   :  { %s5501_s15 = smov 0   ;;  %s5503_s16 = smov 0   ;;  %s6737_s0 = inlined_call_operand.vmem [shape: bf16[2,1,456,16], index: 0, kind: input, shape index: {}]   ;;  %s6738_s1 = inlined_call_operand.vmem [shape: bf16[9,16,16], index: 1, kind: input, shape index: {}]   ;;  %s6739_s2 = inlined_call_operand.vmem [shape: f32[1,16], index: 2, kind: input, shape index: {}]   ;;  %s6740_s3 = inlined_call_operand.vmem [shape: f32[1,16], index: 3, kind: input, shape index: {}]   ;;  %s6741_s4 = inlined_call_operand.vmem [shape: bf16[2,1,256,16], index: 4, kind: output, shape index: {}]  }
   0x1   :  { %s5505_s17 = smov 0  }
   0x2 LB: > { %s26_s18 = sadd.s32 1, %s5470_s16  ;;  %p3950_p0 = scmp.ge.s32.totalorder %s5474_s17, 1  ;;  %s5474_s17 = sphi %s5505_s17, %s14_s17   ;;  %s5470_s16 = sphi %s5503_s16, %s6838_s16   ;;  %s5466_s15 = sphi %s5501_s15, %s6837_s15  }
   0x3   : > { %p28_p1 = scmp.ge.s32.totalorder %s26_s18, 2  ;;  %p182_p2 = scmp.lt.s32.totalorder %s5474_s17, 3 }
   0x5   : > { %s6840_s18 = smov (%p28_p1, %s26_s18), 0  ;;  %p183_p3 = pnand %p3950_p0, %p182_p2 }
   0x7   : > { %186 = sbr.rel (%p183_p3) target bundleno = 682 (0x2aa), region = 36 }
   0xe   : > { %v5388_v0 = vld [vmem:[%s6738_s1 + $0x8] sm:$0xff]   ;;  %p216_p4 = scmp.lt.s32.totalorder %s5466_s15, 1  ;;  %v5525_v1 = vld [vmem:[%s6738_s1 + $0x20] sm:$0xff]   ;;  %vm418_vm0 = vsmask.f32 7424  ;;  %vm621_vm1 = vcmask 130048  }
   0xf   : > { %6775 = vst [vmem:[#allocation2_spill] sm:$0xff] %v5525_v1  ;;  %4543 = vmatprep.subr.bf16.mxu1 %v5388_v0  ;;  %v5532_v2 = vld [vmem:[%s6738_s1] sm:$0xff]   ;;  %4743 = vmatprep.subr.bf16.mxu0 %v5525_v1  ;;  %v5541_v3 = vld [vmem:[%s6738_s1 + $0x28] sm:$0xff]   ;;  %v5597_v50 = vld [vmem:[%s6738_s1 + $0x10] sm:$0xff]   ;;  %vm1169_vm2 = vcmask 1046528   ;;  %vm3821_vm3 = vcmask 125952  }
  0x10   : > { %s6842_s15 = smov (!%p216_p4, %s5466_s15), 1  ;;  %4544 = vmatpush3.bf16.msra.mxu1 %v5388_v0  ;;  %4744 = vmatpush3.bf16.msra.mxu0 %v5525_v1  ;;  %v5607_v55 = vld [vmem:[%s6738_s1 + $0x30] sm:$0xff]  }
  0x11   : > { %s5363_s25 = smul.u32 228, %s6842_s15  ;;  %4593 = vmatprep.subr.bf16.mxu1 %v5532_v2  ;;  %4793 = vmatprep.subr.bf16.mxu0 %v5541_v3 }
  0x13   : > { %s5546_s30 = scalar_lea.vmem %s6737_s0, %s5363_s25  ;;  %s4285_s25 = sshll.u32 %s6842_s15, 7 }
  0x14   : > { %v237_v4 = vld [vmem:[%s5546_s30 + $0x8] sm:$0xf]  ;;  %v238_v5 = vld [vmem:[%s5546_s30 + $0xc] sm:$0xf]  ;;  %v5552_v6 = vld [vmem:[%s5546_s30] sm:$0xff]   ;;  %s6595_s28 = scalar_lea.vmem %s6741_s4, %s4285_s25 }
  0x15   : > { %v239_v7 = vld [vmem:[%s5546_s30 + $0x10] sm:$0xf]  ;;  %v5555_v8 = vcombine.low %v237_v4, %v238_v5  ;;  %v240_v9 = vld [vmem:[%s5546_s30 + $0x14] sm:$0xf]  ;;  %v241_v10 = vld [vmem:[%s5546_s30 + $0x18] sm:$0xf] }
  0x16   : > { %v242_v11 = vld [vmem:[%s5546_s30 + $0x1c] sm:$0xf]  ;;  %v5560_v12 = vcombine.low %v238_v5, %v239_v7  ;;  %v420_v13 = vshrl.u32 %v5552_v6, 16  ;;  %v422_v14 = vshll.u32 %v5552_v6, 16  ;;  %v5564_v15 = vcombine.low %v239_v7, %v240_v9  ;;  %v243_v17 = vld [vmem:[%s5546_s30 + $0x20] sm:$0xf] }
  0x17   : > { %v5566_v16 = vcombine.low %v241_v10, %v242_v11  ;;  %v427_v18 = vshll.u32 %v5555_v8, 16  ;;  %v431_v19 = vshrl.u32 %v5555_v8, 16  ;;  %v5571_v20 = vcombine.low %v240_v9, %v241_v10  ;;  %v244_v26 = vld [vmem:[%s5546_s30 + $0x24] sm:$0xf]  ;;  %v245_v35 = vld [vmem:[%s5546_s30 + $0x28] sm:$0xf] }
  0x18   : > { %6776 = vst [vmem:[#allocation3_spill] sm:$0xff] %v5560_v12  ;;  %v1894_v21 = vshrl.u32 %v5560_v12, 16  ;;  %v424_v22 = vrot.slane %v422_v14, 1  ;;  %v1896_v23 = vshll.u32 %v5560_v12, 16  ;;  %v435_v24 = vshll.u32 %v5564_v15, 16 }
  0x19   : > { %6777 = vst [vmem:[#allocation4_spill] sm:$0xff] %v5571_v20  ;;  %v5576_v25 = vcombine.low %v242_v11, %v243_v17  ;;  %v429_v27 = vrot.slane %v427_v18, 1  ;;  %v1900_v28 = vshll.u32 %v5571_v20, 16  ;;  %v1904_v29 = vshrl.u32 %v5571_v20, 16  ;;  %v246_v48 = vld [vmem:[%s5546_s30 + $0x2c] sm:$0xf] }
  0x1a   : > { %v439_v30 = vshrl.u32 %v5564_v15, 16  ;;  %v425_v31 = vor.u32 %v424_v22, %v420_v13  ;;  %v1898_v32 = vrot.slane %v1896_v23, 1  ;;  %v437_v33 = vrot.slane %v435_v24, 1  ;;  %v247_v49 = vld [vmem:[%s5546_s30 + $0x30] sm:$0xf] }
  0x1b   : > { %6778 = vst [vmem:[#allocation5_spill] sm:$0xff] %v5576_v25  ;;  %v1907_v34 = vshll.u32 %v5576_v25, 16  ;;  %v433_v36 = vor.u32 %v431_v19, %v429_v27  ;;  %v1902_v37 = vrot.slane %v1900_v28, 1  ;;  %v443_v38 = vshll.u32 %v5566_v16, 16  ;;  %v248_v60 = vld [vmem:[%s5546_s30 + $0x34] sm:$0xf] }
  0x1c   : > { %v5585_v39 = vcombine.low %v243_v17, %v244_v26  ;;  %v430_v40 = vsel %vm418_vm0, %v425_v31, %v429_v27  ;;  %v1899_v41 = vor.u32 %v1898_v32, %v1894_v21  ;;  %v441_v43 = vor.u32 %v439_v30, %v437_v33  ;;  %v249_v61 = vld [vmem:[%s5546_s30 + $0x38] sm:$0xf]  ;;  %v250_v17 = vld [vmem:[%s5546_s30 + $0x3c] sm:$0xf]  ;;  %v252_v32 = vld [vmem:[%s5546_s30 + $0x44] sm:$0xf] }
  0x1d   : > { %v1909_v42 = vrot.slane %v1907_v34, 1  ;;  %4545 = vmatprep.mubr.msk.bf16.mxu1 %vm621_vm1, %v430_v40  ;;  %v1906_v44 = vor.u32 %v1904_v29, %v1902_v37  ;;  %v438_v45 = vsel %vm418_vm0, %v433_v36, %v437_v33  ;;  %v445_v46 = vrot.slane %v443_v38, 1  ;;  %v253_v33 = vld [vmem:[%s5546_s30 + $0x48] sm:$0xf] }
  0x1e   : > { %v5590_v47 = vcombine.low %v244_v26, %v245_v35  ;;  %v1903_v51 = vsel %vm418_vm0, %v1899_v41, %v1902_v37  ;;  %4546 = vmatmul.mubr.msk.bf16.vlgmr.msra.gmra.mrb[0].mxu1 %vm621_vm1, %v438_v45  ;;  %v1911_v52 = vshrl.u32 %v5576_v25, 16  ;;  %v447_v53 = vshrl.u32 %v5566_v16, 16 }
  0x1f   : > { %v451_v54 = vshll.u32 %v5585_v39, 16  ;;  %4745 = vmatprep.mubr.msk.bf16.mxu0 %vm621_vm1, %v1903_v51  ;;  %4594 = vmatpush3.bf16.msra.mxu1 %v5532_v2  ;;  %v1910_v56 = vsel %vm418_vm0, %v1906_v44, %v1909_v42  ;;  %v446_v57 = vsel %vm418_vm0, %v441_v43, %v445_v46  ;;  %v5614_v59 = vcombine.low %v245_v35, %v246_v48 }
  0x20   : > { %6779 = vst [vmem:[#allocation6_spill] sm:$0xff] %v5590_v47  ;;  %v1914_v58 = vshll.u32 %v5590_v47, 16  ;;  %4746 = vmatmul.mubr.msk.bf16.vlgmr.msra.gmra.mrb[0].mxu0 %vm621_vm1, %v1910_v56  ;;  %4549 = vmatprep.mubr.msk.bf16.mxu1 %vm621_vm1, %v446_v57  ;;  %v1913_v62 = vor.u32 %v1911_v52, %v1909_v42  ;;  %v449_v63 = vor.u32 %v447_v53, %v445_v46  ;;  %v1918_v5 = vshrl.u32 %v5590_v47, 16 }
  0x21   : > { %v453_v0 = vrot.slane %v451_v54, 1  ;;  %v5620_v2 = vcombine.low %v246_v48, %v247_v49  ;;  %4794 = vmatpush3.bf16.msra.mxu0 %v5541_v3  ;;  %v455_v7 = vshrl.u32 %v5585_v39, 16  ;;  %v459_v9 = vshll.u32 %v5614_v59, 16  ;;  %4643 = vmatprep.subr.bf16.mxu1 %v5597_v50  ;;  %v251_v3 = vld [vmem:[%s5546_s30 + $0x40] sm:$0xf] }
  0x22   : > { %v1916_v4 = vrot.slane %v1914_v58, 1  ;;  %v5631_v13 = vcombine.low %v247_v49, %v248_v60  ;;  %v5633_v14 = vcombine.low %v248_v60, %v249_v61  ;;  %4843 = vmatprep.subr.bf16.mxu0 %v5607_v55  ;;  %v463_v27 = vshrl.u32 %v5614_v59, 16  ;;  %v254_v48 = vld [vmem:[%s5546_s30 + $0x4c] sm:$0xf]  ;;  %v255_v49 = vld [vmem:[%s5546_s30 + $0x50] sm:$0xf] }
  0x23   : > { %6780 = vst [vmem:[#allocation7_spill] sm:$0xff] %v5620_v2  ;;  %v5628_v10 = vsel %vm418_vm0, %v449_v63, %v453_v0  ;;  %v1921_v11 = vshll.u32 %v5620_v2, 16  ;;  %v457_v21 = vor.u32 %v455_v7, %v453_v0  ;;  %v461_v22 = vrot.slane %v459_v9, 1  ;;  %v256_v0 = vld [vmem:[%s5546_s30 + $0x54] sm:$0xf] }
  0x24   : > { %6781 = vst [vmem:[#allocation8_spill] sm:$0xff] %v5628_v10  ;;  %6782 = vst [vmem:[#allocation9_spill] sm:$0xff] %v5633_v14  ;;  %v1917_v18 = vsel %vm418_vm0, %v1913_v62, %v1916_v4  ;;  %v1920_v19 = vor.u32 %v1918_v5, %v1916_v4  ;;  %v1925_v24 = vshrl.u32 %v5620_v2, 16  ;;  %v1928_v26 = vshll.u32 %v5633_v14, 16  ;;  %v257_v4 = vld [vmem:[%s5546_s30 + $0x58] sm:$0xf] }
  0x25   : > { %4749 = vmatprep.mubr.msk.bf16.mxu0 %vm621_vm1, %v1917_v18  ;;  %v1923_v23 = vrot.slane %v1921_v11, 1  ;;  %v5644_v28 = vsel %vm418_vm0, %v457_v21, %v461_v22  ;;  %v467_v29 = vshll.u32 %v5631_v13, 16  ;;  %v5647_v30 = vcombine.low %v249_v61, %v250_v17 }
  0x26   : > { %6783 = vst [vmem:[#allocation10_spill] sm:$0xff] %v5644_v28  ;;  %v5649_v31 = vcombine.low %v250_v17, %v251_v3  ;;  %4550 = vmatmul.mubr.msk.bf16.gmra.mrb[4].mxu1 %vm621_vm1, %v5628_v10  ;;  %v1930_v36 = vrot.slane %v1928_v26, 1  ;;  %v465_v37 = vor.u32 %v463_v27, %v461_v22  ;;  %v1932_v40 = vshrl.u32 %v5633_v14, 16  ;;  %v258_v26 = vld [vmem:[%s5546_s30 + $0x5c] sm:$0xf] }
  0x27   : > { %v1924_v34 = vsel %vm418_vm0, %v1920_v19, %v1923_v23  ;;  %v1927_v35 = vor.u32 %v1925_v24, %v1923_v23  ;;  %4553 = vmatprep.mubr.msk.bf16.mxu1 %vm621_vm1, %v5644_v28  ;;  %v469_v38 = vrot.slane %v467_v29, 1  ;;  %v471_v42 = vshrl.u32 %v5631_v13, 16  ;;  %v259_v27 = vld [vmem:[%s5546_s30 + $0x60] sm:$0xf]  ;;  %v5934_v28 = vld [vmem:[%s5546_s30 + $0xbc] sm:$0xf] }
  0x28   : > { %6784 = vst [vmem:[#allocation11_spill] sm:$0xff] %v5649_v31  ;;  %v1935_v41 = vshll.u32 %v5649_v31, 16  ;;  %4750 = vmatmul.mubr.msk.bf16.gmra.mrb[4].mxu0 %vm621_vm1, %v1924_v34  ;;  %v475_v44 = vshll.u32 %v5647_v30, 16  ;;  %v5664_v45 = vcombine.low %v251_v3, %v252_v32  ;;  %v5666_v46 = vcombine.low %v252_v32, %v253_v33 }
  0x29   : > { %v1931_v43 = vsel %vm418_vm0, %v1927_v35, %v1930_v36  ;;  %v1934_v51 = vor.u32 %v1932_v40, %v1930_v36  ;;  %v473_v53 = vor.u32 %v471_v42, %v469_v38  ;;  %v5672_v54 = vsel %vm418_vm0, %v465_v37, %v469_v38  ;;  %v260_v37 = vld [vmem:[%s5546_s30 + $0x64] sm:$0xf] }
  0x2a   : > { %6785 = vst [vmem:[#allocation12_spill] sm:$0xff] %v5666_v46  ;;  %4753 = vmatprep.mubr.msk.bf16.mxu0 %vm621_vm1, %v1931_v43  ;;  %v1937_v52 = vrot.slane %v1935_v41, 1  ;;  %6786 = vst [vmem:[#allocation13_spill] sm:$0xff] %v5672_v54  ;;  %v477_v56 = vrot.slane %v475_v44, 1  ;;  %v1939_v57 = vshrl.u32 %v5649_v31, 16  ;;  %v1942_v58 = vshll.u32 %v5666_v46, 16 }
  0x2b   : > { %v479_v60 = vshrl.u32 %v5647_v30, 16  ;;  %v483_v61 = vshll.u32 %v5664_v45, 16  ;;  %v5678_v62 = vcombine.low %v253_v33, %v254_v48  ;;  %v5680_v63 = vcombine.low %v254_v48, %v255_v49  ;;  %v261_v43 = vld [vmem:[%s5546_s30 + $0x68] sm:$0xf] }
  0x2c   : > { %v1938_v5 = vsel %vm418_vm0, %v1934_v51, %v1937_v52  ;;  %v5686_v7 = vsel %vm418_vm0, %v473_v53, %v477_v56  ;;  %v1941_v9 = vor.u32 %v1939_v57, %v1937_v52  ;;  %v1944_v11 = vrot.slane %v1942_v58, 1 }
  0x2d   : > { %6787 = vst [vmem:[#allocation14_spill] sm:$0xff] %v5680_v63  ;;  %6788 = vst [vmem:[#allocation15_spill] sm:$0xff] %v5686_v7  ;;  %v485_v17 = vrot.slane %v483_v61, 1  ;;  %v1946_v3 = vshrl.u32 %v5666_v46, 16  ;;  %v1949_v18 = vshll.u32 %v5680_v63, 16  ;;  %v487_v19 = vshrl.u32 %v5664_v45, 16 }
  0x2e   : > { %4554 = vmatmul.mubr.msk.bf16.gmra.mrb[8].mxu1 %vm621_vm1, %v5672_v54  ;;  %v1945_v21 = vsel %vm418_vm0, %v1941_v9, %v1944_v11  ;;  %v491_v22 = vshll.u32 %v5678_v62, 16  ;;  %v5695_v23 = vcombine.low %v255_v49, %v256_v0  ;;  %v5697_v24 = vcombine.low %v256_v0, %v257_v4 }
  0x2f   : > { %4557 = vmatprep.mubr.msk.bf16.mxu1 %vm621_vm1, %v5686_v7  ;;  %v481_v29 = vor.u32 %v479_v60, %v477_v56  ;;  %v1951_v32 = vrot.slane %v1949_v18, 1  ;;  %v489_v33 = vor.u32 %v487_v19, %v485_v17  ;;  %v1953_v35 = vshrl.u32 %v5680_v63, 16 }
  0x30   : > { %6789 = vst [vmem:[#allocation16_spill] sm:$0xff] %v5697_v24  ;;  %4754 = vmatmul.mubr.msk.bf16.gmra.mrb[8].mxu0 %vm621_vm1, %v1938_v5  ;;  %v493_v34 = vrot.slane %v491_v22, 1  ;;  %v1956_v36 = vshll.u32 %v5697_v24, 16  ;;  %v1948_v38 = vor.u32 %v1946_v3, %v1944_v11  ;;  %v499_v40 = vshll.u32 %v5695_v23, 16  ;;  %v263_v3 = vld [vmem:[%s5546_s30 + $0x70] sm:$0xf] }
  0x31   : > { %4757 = vmatprep.mubr.msk.bf16.mxu0 %vm621_vm1, %v1945_v21  ;;  %v5709_v41 = vcombine.low %v257_v4, %v258_v26  ;;  %v5711_v42 = vcombine.low %v258_v26, %v259_v27  ;;  %v1955_v44 = vor.u32 %v1953_v35, %v1951_v32  ;;  %v5715_v49 = vsel %vm418_vm0, %v481_v29, %v485_v17  ;;  %v262_v17 = vld [vmem:[%s5546_s30 + $0x6c] sm:$0xf] }
  0x32   : > { %v1958_v48 = vrot.slane %v1956_v36, 1  ;;  %6790 = vst [vmem:[#allocation17_spill] sm:$0xff] %v5715_v49  ;;  %v495_v51 = vshrl.u32 %v5678_v62, 16  ;;  %v5720_v53 = vsel %vm418_vm0, %v489_v33, %v493_v34  ;;  %v503_v56 = vshrl.u32 %v5695_v23, 16 }
  0x33   : > { %v1963_v52 = vshll.u32 %v5711_v42, 16  ;;  %6791 = vst [vmem:[#allocation18_spill] sm:$0xff] %v5720_v53  ;;  %v507_v57 = vshll.u32 %v5709_v41, 16  ;;  %v5724_v58 = vcombine.low %v260_v37, %v261_v43  ;;  %v1952_v60 = vsel %vm418_vm0, %v1948_v38, %v1951_v32 }
  0x34   : > { %v501_v61 = vrot.slane %v499_v40, 1  ;;  %v1960_v0 = vshrl.u32 %v5697_v24, 16  ;;  %v1959_v4 = vsel %vm418_vm0, %v1955_v44, %v1958_v48  ;;  %v5731_v5 = vcombine.low %v259_v27, %v260_v37  ;;  %v5751_v37 = vld [vmem:[%s5546_s30 + $0x74] sm:$0xf] }
  0x35   : > { %v1967_v9 = vshrl.u32 %v5711_v42, 16  ;;  %v1970_v11 = vshll.u32 %v5724_v58, 16  ;;  %v497_v18 = vor.u32 %v495_v51, %v493_v34  ;;  %v1965_v19 = vrot.slane %v1963_v52, 1  ;;  %v5762_v52 = vld [vmem:[%s5546_s30 + $0x78] sm:$0xf] }
  0x36   : > { %4558 = vmatmul.mubr.msk.bf16.gmra.mrb[12].mxu1 %vm621_vm1, %v5715_v49  ;;  %v505_v21 = vor.u32 %v503_v56, %v501_v61  ;;  %v509_v22 = vrot.slane %v507_v57, 1  ;;  %v5740_v26 = vcombine.low %v261_v43, %v262_v17  ;;  %v1962_v27 = vor.u32 %v1960_v0, %v1958_v48  ;;  %v5765_v56 = vld [vmem:[%s5546_s30 + $0x7c] sm:$0xf] }
  0x37   : > { %4561 = vmatprep.mubr.msk.bf16.mxu1 %vm621_vm1, %v5720_v53  ;;  %v5743_v29 = vcombine.low %v262_v17, %v263_v3  ;;  %v1969_v32 = vor.u32 %v1967_v9, %v1965_v19  ;;  %v1972_v33 = vrot.slane %v1970_v11, 1  ;;  %v515_v35 = vshll.u32 %v5731_v5, 16  ;;  %v5894_v53 = vld [vmem:[%s5546_s30 + $0xac] sm:$0xf] }
  0x38   : > { %4758 = vmatmul.mubr.msk.bf16.gmra.mrb[12].mxu0 %vm621_vm1, %v1952_v60  ;;  %v5747_v34 = vsel %vm418_vm0, %v497_v18, %v501_v61  ;;  %v511_v36 = vshrl.u32 %v5709_v41, 16  ;;  %v5754_v38 = vsel %vm418_vm0, %v505_v21, %v509_v22  ;;  %v519_v40 = vshrl.u32 %v5731_v5, 16 }
  0x39   : > { %4761 = vmatprep.mubr.msk.bf16.mxu0 %vm621_vm1, %v1959_v4  ;;  %6792 = vst [vmem:[#allocation19_spill] sm:$0xff] %v5747_v34  ;;  %6793 = vst [vmem:[#allocation20_spill] sm:$0xff] %v5754_v38  ;;  %v523_v43 = vshll.u32 %v5740_v26, 16  ;;  %v1966_v44 = vsel %vm418_vm0, %v1962_v27, %v1965_v19  ;;  %v1974_v48 = vshrl.u32 %v5724_v58, 16  ;;  %v1977_v51 = vshll.u32 %v5743_v29, 16 }
  0x3a   : > { %v1973_v57 = vsel %vm418_vm0, %v1969_v32, %v1972_v33  ;;  %v517_v60 = vrot.slane %v515_v35, 1  ;;  %v5771_v61 = vcombine.low %v263_v3, %v5751_v37  ;;  %v513_v0 = vor.u32 %v511_v36, %v509_v22  ;;  %v5791_v32 = vld [vmem:[%s5546_s30 + $0x80] sm:$0xf]  ;;  %v5794_v35 = vld [vmem:[%s5546_s30 + $0x84] sm:$0xf] }
  0x3b   : > { %v525_v9 = vrot.slane %v523_v43, 1  ;;  %v5778_v11 = vcombine.low %v5762_v52, %v5765_v56  ;;  %v1976_v17 = vor.u32 %v1974_v48, %v1972_v33  ;;  %v5781_v3 = vrot.slane %v1977_v51, 1  ;;  %v5807_v48 = vld [vmem:[%s5546_s30 + $0x8c] sm:$0xf] }
  0x3c   : > { %v521_v4 = vor.u32 %v519_v40, %v517_v60  ;;  %v2388_v18 = vrot.slane %v5560_v12, 1  ;;  %v2389_v19 = vrot.slane %v5571_v20, 1  ;;  %v531_v21 = vshll.u32 %v5771_v61, 16  ;;  %v5844_v12 = vld [vmem:[%s5546_s30 + $0x98] sm:$0xf] }
  0x3d   : > { %6794 = vst [vmem:[#allocation21_spill] sm:$0xff] %v5781_v3  ;;  %v5787_v22 = vsel %vm418_vm0, %v513_v0, %v517_v60  ;;  %v527_v27 = vshrl.u32 %v5740_v26, 16  ;;  %v535_v36 = vshrl.u32 %v5771_v61, 16  ;;  %v539_v40 = vshll.u32 %v5778_v11, 16 }
  0x3e   : > { %4562 = vmatmul.mubr.msk.bf16.gmra.mrb[16].mxu1 %vm621_vm1, %v5747_v34  ;;  %6795 = vst [vmem:[#allocation22_spill] sm:$0xff] %v5787_v22  ;;  %v5797_v33 = vsel %vm418_vm0, %v521_v4, %v525_v9  ;;  %v1980_v43 = vsel %vm418_vm0, %v1976_v17, %v5781_v3  ;;  %v2390_v51 = vsel %vm1169_vm2, %v2388_v18, %v2389_v19  ;;  %v2391_v18 = vrot.slane %v5576_v25, 1 }
  0x3f   : > { %4565 = vmatprep.mubr.msk.bf16.mxu1 %vm621_vm1, %v5754_v38  ;;  %6796 = vst [vmem:[#allocation23_spill] sm:$0xff] %v5797_v33  ;;  %v5814_v60 = vcombine.low %v5791_v32, %v5794_v35  ;;  %v529_v0 = vor.u32 %v527_v27, %v525_v9  ;;  %v541_v17 = vrot.slane %v539_v40, 1  ;;  %v543_v27 = vshrl.u32 %v5778_v11, 16  ;;  %v5835_v40 = vld [vmem:[%s5546_s30 + $0x94] sm:$0xf] }
  0x40   : > { %4762 = vmatmul.mubr.msk.bf16.gmra.mrb[16].mxu0 %vm621_vm1, %v1966_v44  ;;  %v5804_v44 = vld [vmem:[%s5546_s30 + $0x88] sm:$0xf]  ;;  %v2395_v38 = vrot.slane %v5620_v2, 1  ;;  %v2397_v34 = vrot.slane %v5633_v14, 1 }
  0x41   : > { %4765 = vmatprep.mubr.msk.bf16.mxu0 %vm621_vm1, %v1973_v57  ;;  %v533_v57 = vrot.slane %v531_v21, 1  ;;  %v5821_v3 = vcombine.low %v5804_v44, %v5807_v48  ;;  %v2393_v21 = vrot.slane %v5590_v47, 1  ;;  %v547_v20 = vshll.u32 %v5814_v60, 16 }
  0x42   : > { %v2392_v47 = vsel %vm1169_vm2, %v2389_v19, %v2391_v18  ;;  %v545_v19 = vor.u32 %v543_v27, %v541_v17  ;;  %v5879_v27 = vld [vmem:[%s5546_s30 + $0xa0] sm:$0xf] }
  0x43   : > { %v537_v4 = vor.u32 %v535_v36, %v533_v57  ;;  %v5828_v9 = vsel %vm418_vm0, %v529_v0, %v533_v57  ;;  %v5832_v36 = vld [vmem:[%s5546_s30 + $0x90] sm:$0xf]  ;;  %v555_v25 = vshll.u32 %v5821_v3, 16  ;;  %v2394_v57 = vsel %vm1169_vm2, %v2391_v18, %v2393_v21 }
  0x44   : > { %6797 = vst [vmem:[#allocation24_spill] sm:$0xff] %v5828_v9  ;;  %v549_v0 = vrot.slane %v547_v20, 1  ;;  %v2396_v2 = vsel %vm1169_vm2, %v2393_v21, %v2395_v38 }
  0x45   : > { %v557_v18 = vrot.slane %v555_v25, 1 }
  0x46   : > { %4566 = vmatmul.mubr.msk.bf16.gmra.mrb[20].mxu1 %vm621_vm1, %v5787_v22  ;;  %v5859_v22 = vld [vmem:[%s6738_s1 + $0x38] sm:$0xff]   ;;  %v5875_v25 = vsel %vm418_vm0, %v545_v19, %v549_v0 }
  0x47   : > { %4569 = vmatprep.mubr.msk.bf16.mxu1 %vm621_vm1, %v5797_v33  ;;  %v5847_v33 = vld [vmem:[%s5546_s30 + $0x9c] sm:$0xf]  ;;  %6800 = vst [vmem:[#allocation27_spill] sm:$0xff] %v5875_v25 }
  0x48   : > { %4766 = vmatmul.mubr.msk.bf16.gmra.mrb[20].mxu0 %vm621_vm1, %v1980_v43  ;;  %v5838_v43 = vsel %vm418_vm0, %v537_v4, %v541_v17  ;;  %v5854_v4 = vcombine.low %v5832_v36, %v5835_v40  ;;  %v5866_v20 = vcombine.low %v5844_v12, %v5847_v33 }
  0x49   : > { %4795 = vmatprep.mubr.msk.bf16.mxu0 %vm621_vm1, %v2390_v51  ;;  %6798 = vst [vmem:[#allocation25_spill] sm:$0xff] %v5838_v43  ;;  %v551_v51 = vshrl.u32 %v5814_v60, 16 }
  0x4a   : > { %6799 = vst [vmem:[#allocation26_spill] sm:$0xff] %v5866_v20  ;;  %v563_v17 = vshll.u32 %v5854_v4, 16  ;;  %v571_v14 = vshll.u32 %v5866_v20, 16 }
  0x4c   : > { %v565_v19 = vrot.slane %v563_v17, 1  ;;  %v573_v7 = vrot.slane %v571_v14, 1  ;;  %v2401_v17 = vrot.slane %v5666_v46, 1  ;;  %v5922_v14 = vld [vmem:[%s5546_s30 + $0xb4] sm:$0xf] }
  0x4e   : > { %4570 = vmatmul.mubr.msk.bf16.gmra.mrb[24].mxu1 %vm621_vm1, %v5828_v9  ;;  %v553_v9 = vor.u32 %v551_v51, %v549_v0  ;;  %v5882_v51 = vld [vmem:[%s5546_s30 + $0xa4] sm:$0xf]  ;;  %v2398_v0 = vsel %vm1169_vm2, %v2395_v38, %v2397_v34  ;;  %v2399_v38 = vrot.slane %v5649_v31, 1 }
  0x4f   : > { %4573 = vmatprep.mubr.msk.bf16.mxu1 %vm621_vm1, %v5838_v43  ;;  %v5891_v43 = vld [vmem:[%s5546_s30 + $0xa8] sm:$0xf] }
  0x50   : > { %4796 = vmatmul.mubr.msk.bf16.vlgmr.msra.gmra.mrb[0].mxu0 %vm621_vm1, %v2392_v47  ;;  %v559_v47 = vshrl.u32 %v5821_v3, 16  ;;  %v2400_v46 = vsel %vm1169_vm2, %v2397_v34, %v2399_v38 }
  0x51   : > { %4844 = vmatpush3.bf16.msra.mxu0 %v5607_v55  ;;  %4799 = vmatprep.mubr.msk.bf16.mxu0 %vm621_vm1, %v2394_v57  ;;  %v5885_v55 = vsel %vm418_vm0, %v553_v9, %v557_v18  ;;  %v567_v57 = vshrl.u32 %v5854_v4, 16  ;;  %v5901_v9 = vcombine.low %v5879_v27, %v5882_v51 }
  0x52   : > { %4893 = vmatprep.subr.bf16.mxu0 %v5859_v22  ;;  %6801 = vst [vmem:[#allocation28_spill] sm:$0xff] %v5885_v55  ;;  %v561_v21 = vor.u32 %v559_v47, %v557_v18  ;;  %v5919_v47 = vld [vmem:[%s5546_s30 + $0xb0] sm:$0xf] }
  0x53   : > { %6802 = vst [vmem:[#allocation29_spill] sm:$0xff] %v5901_v9  ;;  %v569_v49 = vor.u32 %v567_v57, %v565_v19  ;;  %v579_v54 = vshll.u32 %v5901_v9, 16 }
  0x54   : > { %v5915_v18 = vsel %vm418_vm0, %v561_v21, %v565_v19  ;;  %v2402_v19 = vsel %vm1169_vm2, %v2399_v38, %v2401_v17  ;;  %v2405_v38 = vrot.slane %v5697_v24, 1 }
  0x55   : > { %6803 = vst [vmem:[#allocation30_spill] sm:$0xff] %v5915_v18  ;;  %v5925_v57 = vsel %vm418_vm0, %v569_v49, %v573_v7  ;;  %v581_v21 = vrot.slane %v579_v54, 1  ;;  %v5941_v49 = vcombine.low %v5919_v47, %v5922_v14  ;;  %v2403_v54 = vrot.slane %v5680_v63, 1 }
  0x56   : > { %4574 = vmatmul.mubr.msk.bf16.gmra.mrb[28].mxu1 %vm621_vm1, %v5875_v25  ;;  %v5908_v25 = vcombine.low %v5891_v43, %v5894_v53  ;;  %6804 = vst [vmem:[#allocation31_spill] sm:$0xff] %v5925_v57 }
  0x57   : > { %4577 = vmatprep.mubr.msk.bf16.mxu1 %vm621_vm1, %v5885_v55  ;;  %v5931_v55 = vld [vmem:[%s5546_s30 + $0xb8] sm:$0xf]  ;;  %v2406_v24 = vsel %vm1169_vm2, %v2403_v54, %v2405_v38 }
  0x58   : > { %4800 = vmatmul.mubr.msk.bf16.gmra.mrb[4].mxu0 %vm621_vm1, %v2396_v2  ;;  %v575_v2 = vshrl.u32 %v5866_v20, 16  ;;  %v587_v31 = vshll.u32 %v5908_v25, 16 }
  0x59   : > { %4803 = vmatprep.mubr.msk.bf16.mxu0 %vm621_vm1, %v2398_v0  ;;  %v583_v0 = vshrl.u32 %v5901_v9, 16  ;;  %v5948_v9 = vcombine.low %v5931_v55, %v5934_v28 }
  0x5a   : > { %v577_v10 = vor.u32 %v575_v2, %v573_v7  ;;  %v589_v1 = vrot.slane %v587_v31, 1  ;;  %v591_v7 = vshrl.u32 %v5908_v25, 16  ;;  %v599_v31 = vshrl.u32 %v5941_v49, 16 }
  0x5b   : > { %v585_v34 = vor.u32 %v583_v0, %v581_v21  ;;  %v603_v2 = vshll.u32 %v5948_v9, 16  ;;  %v5964_v0 = vld [vmem:[%s5546_s30 + $0xc0] sm:$0xf] }
  0x5c   : > { %v5955_v20 = vsel %vm418_vm0, %v577_v10, %v581_v21  ;;  %v593_v21 = vor.u32 %v591_v7, %v589_v1 }
  0x5d   : > { %6805 = vst [vmem:[#allocation32_spill] sm:$0xff] %v5955_v20 }
  0x5e   : > { %4578 = vmatmul.mubr.msk.bf16.gmra.mrb[32].mxu1 %vm621_vm1, %v5915_v18  ;;  %v595_v18 = vshll.u32 %v5941_v49, 16 }
  0x5f   : > { %4581 = vmatprep.mubr.msk.bf16.mxu1 %vm621_vm1, %v5925_v57  ;;  %v605_v57 = vrot.slane %v603_v2, 1 }
  0x60   : > { %4804 = vmatmul.mubr.msk.bf16.gmra.mrb[8].mxu0 %vm621_vm1, %v2400_v46  ;;  %v5959_v46 = vsel %vm418_vm0, %v585_v34, %v589_v1  ;;  %v597_v10 = vrot.slane %v595_v18, 1  ;;  %v5974_v34 = vcombine.low %v5964_v0, %v5964_v0 }
  0x61   : > { %4807 = vmatprep.mubr.msk.bf16.mxu0 %vm621_vm1, %v2402_v19  ;;  %v2404_v19 = vsel %vm1169_vm2, %v2401_v17, %v2403_v54  ;;  %v2407_v17 = vrot.slane %v5711_v42, 1  ;;  %v607_v54 = vshrl.u32 %v5948_v9, 16 }
  0x62   : > { %v601_v63 = vor.u32 %v599_v31, %v597_v10  ;;  %v5981_v18 = vsel %vm418_vm0, %v593_v21, %v597_v10  ;;  %v611_v1 = vshll.u32 %v5974_v34, 16  ;;  %v5994_v31 = vcombine.low %v5751_v37, %v5762_v52 }
  0x63   : > { %v5998_v2 = vor.u32 %v607_v54, %v605_v57  ;;  %v6009_v52 = vcombine.low %v5765_v56, %v5791_v32  ;;  %v284_v54 = vld [vmem:[%s5546_s30 + $0xc4] sm:$0xf] }
  0x64   : > { %v5986_v7 = vsel %vm418_vm0, %v601_v63, %v605_v57  ;;  %v613_v10 = vrot.slane %v611_v1, 1  ;;  %v2411_v63 = vrot.slane %v5743_v29, 1 }
  0x65   : > { %v2415_v56 = vrot.slane %v6009_v52, 1 }
  0x66   : > { %4582 = vmatmul.mubr.msk.bf16.gmra.mrb[36].mxu1 %vm621_vm1, %v5955_v20  ;;  %v2409_v20 = vrot.slane %v5724_v58, 1  ;;  %v614_v21 = vsel %vm418_vm0, %v5998_v2, %v613_v10 }
  0x67   : > { %4585 = vmatprep.mubr.msk.bf16.mxu1 %vm621_vm1, %v5959_v46 }
  0x68   : > { %4808 = vmatmul.mubr.msk.bf16.gmra.mrb[12].mxu0 %vm621_vm1, %v2404_v19  ;;  %v2408_v19 = vsel %vm1169_vm2, %v2405_v38, %v2407_v17  ;;  %v2413_v38 = vrot.slane %v5994_v31, 1  ;;  %v2412_v37 = vsel %vm1169_vm2, %v2409_v20, %v2411_v63 }
  0x69   : > { %4811 = vmatprep.mubr.msk.bf16.mxu0 %vm621_vm1, %v2406_v24  ;;  %v2410_v24 = vsel %vm1169_vm2, %v2407_v17, %v2409_v20  ;;  %v6015_v17 = vcombine.low %v5794_v35, %v5804_v44  ;;  %v6026_v20 = vld [vmem:[%s6738_s1 + $0x18] sm:$0xff]   ;;  %v6031_v44 = vcombine.low %v5807_v48, %v5832_v36  ;;  %v285_v48 = vld [vmem:[%s5546_s30 + $0xc8] sm:$0xf]  ;;  %v286_v36 = vld [vmem:[%s5546_s30 + $0xcc] sm:$0xf] }
  0x6a   : > { %v2414_v57 = vsel %vm1169_vm2, %v2411_v63, %v2413_v38  ;;  %v2416_v35 = vsel %vm1169_vm2, %v2413_v38, %v2415_v56  ;;  %v6051_v10 = vcombine.low %v285_v48, %v286_v36 }
  0x6b   : > { %v2417_v32 = vrot.slane %v6015_v17, 1 }
  0x6d   : > { %v2418_v1 = vsel %vm1169_vm2, %v2415_v56, %v2417_v32 }
  0x6e   : > { %4586 = vmatmul.mubr.msk.bf16.gmra.mrb[40].mxu1 %vm621_vm1, %v5981_v18 }
  0x6f   : > { %4589 = vmatprep.mubr.msk.bf16.mxu1 %vm621_vm1, %v5986_v7 }
  0x70   : > { %4812 = vmatmul.mubr.msk.bf16.gmra.mrb[16].mxu0 %vm621_vm1, %v2408_v19  ;;  %v6039_v19 = vcombine.low %v5835_v40, %v5844_v12  ;;  %v2419_v12 = vrot.slane %v6031_v44, 1 }
  0x71   : > { %4815 = vmatprep.mubr.msk.bf16.mxu0 %vm621_vm1, %v2410_v24  ;;  %v6042_v24 = vcombine.low %v5964_v0, %v284_v54 }
  0x72   : > { %v2421_v40 = vrot.slane %v6039_v19, 1  ;;  %v2420_v63 = vsel %vm1169_vm2, %v2417_v32, %v2419_v12 }
  0x74   : > { %v2422_v38 = vsel %vm1169_vm2, %v2419_v12, %v2421_v40 }
  0x76   : > { %4590 = vmatmul.mubr.msk.bf16.gmra.mrb[44].mxu1 %vm621_vm1, %v614_v21  ;;  %v6066_v21 = vcombine.low %v5882_v51, %v5891_v43  ;;  %v6084_v51 = vcombine.low %v5922_v14, %v5931_v55  ;;  %v6100_v14 = vcombine.low %v284_v54, %v285_v48 }
  0x77   : > { %4595 = vmatprep.mubr.msk.bf16.mxu1 %vm621_vm1, %v5552_v6 }
  0x78   : > { %4816 = vmatmul.mubr.msk.bf16.gmra.mrb[20].mxu0 %vm621_vm1, %v2412_v37 }
  0x79   : > { %4819 = vmatprep.mubr.msk.bf16.mxu0 %vm621_vm1, %v2414_v57  ;;  %v6077_v57 = vcombine.low %v5894_v53, %v5919_v47  ;;  %v2429_v53 = vrot.slane %v6084_v51, 1  ;;  %v6094_v47 = vcombine.low %v5934_v28, %v5964_v0  ;;  %v2433_v28 = vrot.slane %v6100_v14, 1 }
  0x7b   : > { %v2427_v56 = vrot.slane %v6077_v57, 1 }
  0x7d   : > { %v2430_v55 = vsel %vm1169_vm2, %v2427_v56, %v2429_v53 }
  0x7e   : > { %4596 = vmatmul.mubr.msk.bf16.vlgmr.msra.gmra.mrb[0].mxu1 %vm621_vm1, %v5555_v8 }
  0x7f   : > { %4644 = vmatpush3.bf16.msra.mxu1 %v5597_v50  ;;  %4599 = vmatprep.mubr.msk.bf16.mxu1 %vm621_vm1, %v5564_v15  ;;  %v6059_v50 = vcombine.low %v5847_v33, %v5879_v27  ;;  %v2425_v33 = vrot.slane %v6066_v21, 1 }
  0x80   : > { %4820 = vmatmul.mubr.msk.bf16.gmra.mrb[24].mxu0 %vm621_vm1, %v2416_v35  ;;  %4693 = vmatprep.subr.bf16.mxu1 %v6026_v20  ;;  %v2431_v35 = vrot.slane %v6094_v47, 1 }
  0x81   : > { %4823 = vmatprep.mubr.msk.bf16.mxu0 %vm621_vm1, %v2418_v1  ;;  %v2423_v37 = vrot.slane %v6059_v50, 1  ;;  %v2428_v32 = vsel %vm1169_vm2, %v2425_v33, %v2427_v56  ;;  %v6109_v1 = vcombine.low %v286_v36, %v286_v36  ;;  %v6132_v36 = vld [vmem:[%s6738_s1 + $0x40] sm:$0xff]  }
  0x82   : > { %v2432_v0 = vsel %vm1169_vm2, %v2429_v53, %v2431_v35  ;;  %v2434_v54 = vsel %vm1169_vm2, %v2431_v35, %v2433_v28 }
  0x83   : > { %v2424_v27 = vsel %vm1169_vm2, %v2421_v40, %v2423_v37  ;;  %v2426_v43 = vsel %vm1169_vm2, %v2423_v37, %v2425_v33  ;;  %v2435_v48 = vrot.slane %v6109_v1, 1  ;;  %v6807_v40 = vld [vmem:[#allocation29_spill] sm:$0xff]  ;;  %v1173_v33 = vrot.slane %v5564_v15, 1 }
  0x84   : > { %v1177_v15 = vrot.slane %v5585_v39, 1 }
  0x85   : > { %v2436_v12 = vsel %vm1169_vm2, %v2433_v28, %v2435_v48  ;;  %v6266_v48 = vld [vmem:[%s5546_s30 + $0xd0] sm:$0xff]  }
  0x86   : > { %4600 = vmatmul.mubr.msk.bf16.gmra.mrb[4].mxu1 %vm621_vm1, %v5566_v16 }
  0x87   : > { %4603 = vmatprep.mubr.msk.bf16.mxu1 %vm621_vm1, %v5585_v39 }
  0x88   : > { %4824 = vmatmul.mubr.msk.bf16.gmra.mrb[28].mxu0 %vm621_vm1, %v2420_v63  ;;  %v1170_v63 = vrot.slane %v5552_v6, 1 }
  0x89   : > { %4827 = vmatprep.mubr.msk.bf16.mxu0 %vm621_vm1, %v2422_v38  ;;  %v1171_v38 = vrot.slane %v5555_v8, 1 }
  0x8b   : > { %v1172_v37 = vsel %vm1169_vm2, %v1170_v63, %v1171_v38  ;;  %v1174_v6 = vsel %vm1169_vm2, %v1171_v38, %v1173_v33  ;;  %v6809_v63 = vld [vmem:[#allocation8_spill] sm:$0xff] }
  0x8e   : > { %4604 = vmatmul.mubr.msk.bf16.gmra.mrb[8].mxu1 %vm621_vm1, %v5614_v59 }
  0x8f   : > { %4607 = vmatprep.mubr.msk.bf16.mxu1 %vm621_vm1, %v5631_v13 }
  0x90   : > { %4828 = vmatmul.mubr.msk.bf16.gmra.mrb[32].mxu0 %vm621_vm1, %v2424_v27  ;;  %v1175_v27 = vrot.slane %v5566_v16, 1 }
  0x91   : > { %4831 = vmatprep.mubr.msk.bf16.mxu0 %vm621_vm1, %v2426_v43  ;;  %v6808_v43 = vld [vmem:[#allocation2_spill] sm:$0xff] }
  0x92   : > { %v1176_v8 = vsel %vm1169_vm2, %v1173_v33, %v1175_v27  ;;  %v6199_v56 = vsel %vm1169_vm2, %v1175_v27, %v1177_v15  ;;  %v6810_v33 = vld [vmem:[#allocation10_spill] sm:$0xff]  ;;  %v6811_v27 = vld [vmem:[#allocation13_spill] sm:$0xff] }
  0x96   : > { %4608 = vmatmul.mubr.msk.bf16.gmra.mrb[12].mxu1 %vm621_vm1, %v5647_v30 }
  0x97   : > { %4611 = vmatprep.mubr.msk.bf16.mxu1 %vm621_vm1, %v5664_v45 }
  0x98   : > { %4832 = vmatmul.mubr.msk.bf16.gmra.mrb[36].mxu0 %vm621_vm1, %v2428_v32 }
  0x99   : > { %4835 = vmatprep.mubr.msk.bf16.mxu0 %vm621_vm1, %v2430_v55 }
  0x9e   : > { %4612 = vmatmul.mubr.msk.bf16.gmra.mrb[16].mxu1 %vm621_vm1, %v5678_v62 }
  0x9f   : > { %4615 = vmatprep.mubr.msk.bf16.mxu1 %vm621_vm1, %v5695_v23 }
  0xa0   : > { %4836 = vmatmul.mubr.msk.bf16.gmra.mrb[40].mxu0 %vm621_vm1, %v2432_v0 }
  0xa1   : > { %4839 = vmatprep.mubr.msk.bf16.mxu0 %vm621_vm1, %v2434_v54 }
  0xa6   : > { %4616 = vmatmul.mubr.msk.bf16.gmra.mrb[20].mxu1 %vm621_vm1, %v5709_v41 }
  0xa7   : > { %4619 = vmatprep.mubr.msk.bf16.mxu1 %vm621_vm1, %v5731_v5 }
  0xa8   : > { %4840 = vmatmul.mubr.msk.bf16.gmra.mrb[44].mxu0 %vm621_vm1, %v2436_v12 }
  0xa9   : > { %4845 = vmatprep.mubr.msk.bf16.mxu0 %vm621_vm1, %v5566_v16  ;;  %v1179_v16 = vrot.slane %v5614_v59, 1 }
  0xab   : > { %v6202_v53 = vsel %vm1169_vm2, %v1177_v15, %v1179_v16  ;;  %v6813_v15 = vld [vmem:[#allocation17_spill] sm:$0xff] }
  0xae   : > { %4620 = vmatmul.mubr.msk.bf16.gmra.mrb[24].mxu1 %vm621_vm1, %v5740_v26 }
  0xaf   : > { %4623 = vmatprep.mubr.msk.bf16.mxu1 %vm621_vm1, %v5771_v61 }
  0xb0   : > { %4846 = vmatmul.mubr.msk.bf16.vlgmr.msra.gmra.mrb[0].mxu0 %vm621_vm1, %v5585_v39  ;;  %v1181_v39 = vrot.slane %v5631_v13, 1 }
  0xb1   : > { %4894 = vmatpush3.bf16.msra.mxu0 %v5859_v22  ;;  %4849 = vmatprep.mubr.msk.bf16.mxu0 %vm621_vm1, %v5614_v59  ;;  %v6806_v22 = vld [vmem:[#allocation26_spill] sm:$0xff]  ;;  %v1183_v59 = vrot.slane %v5647_v30, 1 }
  0xb2   : > { %4943 = vmatprep.subr.bf16.mxu0 %v6132_v36 }
  0xb3   : > { %v6218_v32 = vsel %vm1169_vm2, %v1181_v39, %v1183_v59 }
  0xb6   : > { %4624 = vmatmul.mubr.msk.bf16.gmra.mrb[28].mxu1 %vm621_vm1, %v5778_v11 }
  0xb7   : > { %4627 = vmatprep.mubr.msk.bf16.mxu1 %vm621_vm1, %v5814_v60 }
  0xb8   : > { %4850 = vmatmul.mubr.msk.bf16.gmra.mrb[4].mxu0 %vm621_vm1, %v5631_v13  ;;  %v1185_v13 = vrot.slane %v5664_v45, 1 }
  0xb9   : > { %4853 = vmatprep.mubr.msk.bf16.mxu0 %vm621_vm1, %v5647_v30  ;;  %v1187_v30 = vrot.slane %v5678_v62, 1 }
  0xba   : > { %v6231_v55 = vsel %vm1169_vm2, %v1183_v59, %v1185_v13  ;;  %v6815_v59 = vld [vmem:[#allocation19_spill] sm:$0xff] }
  0xbb   : > { %v6234_v35 = vsel %vm1169_vm2, %v1185_v13, %v1187_v30 }
  0xbe   : > { %4628 = vmatmul.mubr.msk.bf16.gmra.mrb[32].mxu1 %vm621_vm1, %v5821_v3 }
  0xbf   : > { %4631 = vmatprep.mubr.msk.bf16.mxu1 %vm621_vm1, %v5854_v4 }
  0xc0   : > { %4854 = vmatmul.mubr.msk.bf16.gmra.mrb[8].mxu0 %vm621_vm1, %v5664_v45  ;;  %v1189_v45 = vrot.slane %v5695_v23, 1 }
  0xc1   : > { %4857 = vmatprep.mubr.msk.bf16.mxu0 %vm621_vm1, %v5678_v62  ;;  %v1191_v62 = vrot.slane %v5709_v41, 1 }
  0xc2   : > { %v6247_v28 = vsel %vm1169_vm2, %v1187_v30, %v1189_v45 }
  0xc3   : > { %v6250_v0 = vsel %vm1169_vm2, %v1189_v45, %v1191_v62  ;;  %v6816_v45 = vld [vmem:[#allocation20_spill] sm:$0xff] }
  0xc6   : > { %4632 = vmatmul.mubr.msk.bf16.gmra.mrb[36].mxu1 %vm621_vm1, %v6806_v22 }
  0xc7   : > { %4635 = vmatprep.mubr.msk.bf16.mxu1 %vm621_vm1, %v6807_v40 }
  0xc8   : > { %4858 = vmatmul.mubr.msk.bf16.gmra.mrb[12].mxu0 %vm621_vm1, %v5695_v23  ;;  %v1193_v23 = vrot.slane %v5731_v5, 1 }
  0xc9   : > { %4861 = vmatprep.mubr.msk.bf16.mxu0 %vm621_vm1, %v5709_v41  ;;  %v1195_v41 = vrot.slane %v5740_v26, 1 }
  0xca   : > { %v6263_v54 = vsel %vm1169_vm2, %v1191_v62, %v1193_v23  ;;  %v6817_v62 = vld [vmem:[#allocation22_spill] sm:$0xff] }
  0xcb   : > { %v6269_v12 = vsel %vm1169_vm2, %v1193_v23, %v1195_v41 }
  0xce   : > { %4636 = vmatmul.mubr.msk.bf16.gmra.mrb[40].mxu1 %vm621_vm1, %v5908_v25 }
  0xcf   : > { %4639 = vmatprep.mubr.msk.bf16.mxu1 %vm621_vm1, %v5941_v49 }
  0xd0   : > { %4862 = vmatmul.mubr.msk.bf16.gmra.mrb[16].mxu0 %vm621_vm1, %v5731_v5  ;;  %v1197_v5 = vrot.slane %v5771_v61, 1 }
  0xd1   : > { %4865 = vmatprep.mubr.msk.bf16.mxu0 %vm621_vm1, %v5740_v26  ;;  %v1199_v26 = vrot.slane %v5778_v11, 1 }
  0xd2   : > { %v6282_v38 = vsel %vm1169_vm2, %v1195_v41, %v1197_v5 }
  0xd6   : > { %4640 = vmatmul.mubr.msk.bf16.gmra.mrb[44].mxu1 %vm621_vm1, %v5948_v9 }
  0xd7   : > { %4645 = vmatprep.mubr.msk.bf16.mxu1 %vm621_vm1, %v1172_v37  ;;  %v6285_v37 = vsel %vm1169_vm2, %v1197_v5, %v1199_v26  ;;  %v6819_v5 = vld [vmem:[#allocation24_spill] sm:$0xff] }
  0xd8   : > { %4866 = vmatmul.mubr.msk.bf16.gmra.mrb[20].mxu0 %vm621_vm1, %v5771_v61  ;;  %v1201_v61 = vrot.slane %v5814_v60, 1 }
  0xd9   : > { %4869 = vmatprep.mubr.msk.bf16.mxu0 %vm621_vm1, %v5778_v11  ;;  %v1203_v11 = vrot.slane %v5821_v3, 1 }
  0xde   : > { %4646 = vmatmul.mubr.msk.bf16.vlgmr.msra.gmra.mrb[0].mxu1 %vm621_vm1, %v1174_v6  ;;  %v6299_v6 = vsel %vm1169_vm2, %v1199_v26, %v1201_v61 }
  0xdf   : > { %4694 = vmatpush3.bf16.msra.mxu1 %v6026_v20  ;;  %4649 = vmatprep.mubr.msk.bf16.mxu1 %vm621_vm1, %v1176_v8  ;;  %v6215_v20 = vsel %vm1169_vm2, %v1179_v16, %v1181_v39  ;;  %v6302_v8 = vsel %vm1169_vm2, %v1201_v61, %v1203_v11  ;;  %v6814_v39 = vld [vmem:[#allocation18_spill] sm:$0xff]  ;;  %v6821_v61 = vld [vmem:[#allocation25_spill] sm:$0xff] }
  0xe0   : > { %4870 = vmatmul.mubr.msk.bf16.gmra.mrb[24].mxu0 %vm621_vm1, %v5814_v60  ;;  %4993 = vmatprep.subr.bf16.mxu1 %v6808_v43  ;;  %v1205_v60 = vrot.slane %v5854_v4, 1 }
  0xe1   : > { %4873 = vmatprep.mubr.msk.bf16.mxu0 %vm621_vm1, %v5821_v3  ;;  %v6812_v3 = vld [vmem:[#allocation15_spill] sm:$0xff] }
  0xe2   : > { %v6315_v16 = vsel %vm1169_vm2, %v1203_v11, %v1205_v60  ;;  %v5451_v11 = vld [vmem:[%s6738_s1 + $0x20] sm:$0xff]  }
  0xe6   : > { %4650 = vmatmul.mubr.msk.bf16.gmra.mrb[4].mxu1 %vm621_vm1, %v6199_v56 }
  0xe7   : > { %4653 = vmatprep.mubr.msk.bf16.mxu1 %vm621_vm1, %v6202_v53 }
  0xe8   : > { %4874 = vmatmul.mubr.msk.bf16.gmra.mrb[28].mxu0 %vm621_vm1, %v5854_v4  ;;  %v1209_v4 = vrot.slane %v6807_v40, 1 }
  0xe9   : > { %4877 = vmatprep.mubr.msk.bf16.mxu0 %vm621_vm1, %v6806_v22 }
  0xee   : > { %4654 = vmatmul.mubr.msk.bf16.gmra.mrb[8].mxu1 %vm621_vm1, %v6215_v20 }
  0xef   : > { %4657 = vmatprep.mubr.msk.bf16.mxu1 %vm621_vm1, %v6218_v32 }
  0xf0   : > { %4878 = vmatmul.mubr.msk.bf16.gmra.mrb[32].mxu0 %vm621_vm1, %v6807_v40  ;;  %v1213_v40 = vrot.slane %v5941_v49, 1 }
  0xf1   : > { %4881 = vmatprep.mubr.msk.bf16.mxu0 %vm621_vm1, %v5908_v25 }
  0xf6   : > { %4658 = vmatmul.mubr.msk.bf16.gmra.mrb[12].mxu1 %vm621_vm1, %v6231_v55 }
  0xf7   : > { %4661 = vmatprep.mubr.msk.bf16.mxu1 %vm621_vm1, %v6234_v35 }
  0xf8   : > { %4882 = vmatmul.mubr.msk.bf16.gmra.mrb[36].mxu0 %vm621_vm1, %v5941_v49  ;;  %v1217_v49 = vrot.slane %v5974_v34, 1  ;;  %v6823_v34 = vld [vmem:[#allocation4_spill] sm:$0xff] }
  0xf9   : > { %4885 = vmatprep.mubr.msk.bf16.mxu0 %vm621_vm1, %v5948_v9 }
  0xfe   : > { %4662 = vmatmul.mubr.msk.bf16.gmra.mrb[16].mxu1 %vm621_vm1, %v6247_v28 }
  0xff   : > { %4665 = vmatprep.mubr.msk.bf16.mxu1 %vm621_vm1, %v6250_v0 }
 0x100   : > { %4886 = vmatmul.mubr.msk.bf16.gmra.mrb[40].mxu0 %vm621_vm1, %v6042_v24 }
 0x101   : > { %4889 = vmatprep.mubr.msk.bf16.mxu0 %vm621_vm1, %v6051_v10 }
 0x106   : > { %4666 = vmatmul.mubr.msk.bf16.gmra.mrb[20].mxu1 %vm621_vm1, %v6263_v54 }
 0x107   : > { %4669 = vmatprep.mubr.msk.bf16.mxu1 %vm621_vm1, %v6269_v12 }
 0x108   : > { %4890 = vmatmul.mubr.msk.bf16.gmra.mrb[44].mxu0 %vm621_vm1, %v6266_v48 }
 0x109   : > { %4895 = vmatprep.mubr.msk.bf16.mxu0 %vm621_vm1, %v6809_v63  ;;  %v6820_v63 = vld [vmem:[#allocation3_spill] sm:$0xff] }
 0x10e   : > { %4670 = vmatmul.mubr.msk.bf16.gmra.mrb[24].mxu1 %vm621_vm1, %v6282_v38 }
 0x10f   : > { %4673 = vmatprep.mubr.msk.bf16.mxu1 %vm621_vm1, %v6285_v37 }
 0x110   : > { %4896 = vmatmul.mubr.msk.bf16.vlgmr.msra.gmra.mrb[0].mxu0 %vm621_vm1, %v6810_v33  ;;  %v6822_v33 = vld [vmem:[#allocation27_spill] sm:$0xff] }
 0x111   : > { %4944 = vmatpush3.bf16.msra.mxu0 %v6132_v36  ;;  %4899 = vmatprep.mubr.msk.bf16.mxu0 %vm621_vm1, %v6811_v27  ;;  %v1207_v36 = vrot.slane %v6806_v22, 1  ;;  %v1211_v22 = vrot.slane %v5908_v25, 1  ;;  %v6344_v25 = vrot.slane %v5948_v9, 1  ;;  %v6818_v9 = vld [vmem:[#allocation23_spill] sm:$0xff]  ;;  %v6824_v27 = vld [vmem:[#allocation5_spill] sm:$0xff] }
 0x113   : > { %v6318_v43 = vsel %vm1169_vm2, %v1205_v60, %v1207_v36  ;;  %v6331_v13 = vsel %vm1169_vm2, %v1207_v36, %v1209_v4  ;;  %v6334_v30 = vsel %vm1169_vm2, %v1209_v4, %v1211_v22  ;;  %v6349_v23 = vsel %vm1169_vm2, %v1211_v22, %v1213_v40  ;;  %v6825_v60 = vld [vmem:[#allocation28_spill] sm:$0xff]  ;;  %v6827_v36 = vld [vmem:[#allocation6_spill] sm:$0xff]  ;;  %v6829_v4 = vld [vmem:[#allocation31_spill] sm:$0xff] }
 0x114   : > { %v6353_v41 = vsel %vm1169_vm2, %v1213_v40, %v6344_v25  ;;  %v1218_v26 = vsel %vm1169_vm2, %v6344_v25, %v1217_v49  ;;  %v6831_v22 = vld [vmem:[#allocation9_spill] sm:$0xff]  ;;  %v6832_v40 = vld [vmem:[#allocation11_spill] sm:$0xff]  ;;  %v3032_v49 = vshrl.u32 %v6042_v24, 16 }
 0x116   : > { %4674 = vmatmul.mubr.msk.bf16.gmra.mrb[28].mxu1 %vm621_vm1, %v6299_v6 }
 0x117   : > { %4677 = vmatprep.mubr.msk.bf16.mxu1 %vm621_vm1, %v6302_v8 }
 0x118   : > { %4900 = vmatmul.mubr.msk.bf16.gmra.mrb[4].mxu0 %vm621_vm1, %v6812_v3  ;;  %v6826_v3 = vld [vmem:[#allocation30_spill] sm:$0xff] }
 0x119   : > { %4903 = vmatprep.mubr.msk.bf16.mxu0 %vm621_vm1, %v6813_v15  ;;  %v6828_v15 = vld [vmem:[#allocation7_spill] sm:$0xff] }
 0x11e   : > { %4678 = vmatmul.mubr.msk.bf16.gmra.mrb[32].mxu1 %vm621_vm1, %v6315_v16 }
 0x11f   : > { %4681 = vmatprep.mubr.msk.bf16.mxu1 %vm621_vm1, %v6318_v43 }
 0x120   : > { %4904 = vmatmul.mubr.msk.bf16.gmra.mrb[8].mxu0 %vm621_vm1, %v6814_v39  ;;  %v6830_v39 = vld [vmem:[#allocation32_spill] sm:$0xff] }
 0x121   : > { %4907 = vmatprep.mubr.msk.bf16.mxu0 %vm621_vm1, %v6815_v59  ;;  %v3028_v59 = vshll.u32 %v6042_v24, 16 }
 0x126   : > { %4682 = vmatmul.mubr.msk.bf16.gmra.mrb[36].mxu1 %vm621_vm1, %v6331_v13 }
 0x127   : > { %4685 = vmatprep.mubr.msk.bf16.mxu1 %vm621_vm1, %v6334_v30 }
 0x128   : > { %4908 = vmatmul.mubr.msk.bf16.gmra.mrb[12].mxu0 %vm621_vm1, %v6816_v45  ;;  %v3030_v45 = vrot.slane %v3028_v59, 1  ;;  %v2009_v59 = vshrl.u32 %v6031_v44, 16 }
 0x129   : > { %4911 = vmatprep.mubr.msk.bf16.mxu0 %vm621_vm1, %v6817_v62  ;;  %v3035_v62 = vshll.u32 %v6051_v10, 16 }
 0x12e   : > { %4686 = vmatmul.mubr.msk.bf16.gmra.mrb[40].mxu1 %vm621_vm1, %v6349_v23 }
 0x12f   : > { %4689 = vmatprep.mubr.msk.bf16.mxu1 %vm621_vm1, %v6353_v41 }
 0x130   : > { %4912 = vmatmul.mubr.msk.bf16.gmra.mrb[16].mxu0 %vm621_vm1, %v6818_v9  ;;  %v6833_v9 = vld [vmem:[#allocation12_spill] sm:$0xff] }
 0x131   : > { %4915 = vmatprep.mubr.msk.bf16.mxu0 %vm621_vm1, %v6819_v5  ;;  %v3031_v5 = vsel %vm418_vm0, %v5998_v2, %v3030_v45 }
 0x136   : > { %4690 = vmatmul.mubr.msk.bf16.gmra.mrb[44].mxu1 %vm621_vm1, %v1218_v26  ;;  %v3039_v26 = vshrl.u32 %v6051_v10, 16 }
 0x137   : > { %4695 = vmatprep.mubr.msk.bf16.mxu1 %vm621_vm1, %v6820_v63  ;;  %v3042_v63 = vshll.u32 %v6266_v48, 16 }
 0x138   : > { %4916 = vmatmul.mubr.msk.bf16.gmra.mrb[20].mxu0 %vm621_vm1, %v6821_v61  ;;  %v6834_v61 = vld [vmem:[#allocation14_spill] sm:$0xff] }
 0x139   : > { %4919 = vmatprep.mubr.msk.bf16.mxu0 %vm621_vm1, %v6822_v33  ;;  %v6415_v33 = vld [vmem:[%s5546_s30 + $0xd8] ss:$0 sps:$4 sm:$0xff]  }
 0x13e   : > { %4696 = vmatmul.mubr.msk.bf16.vlgmr.msra.gmra.mrb[0].mxu1 %vm621_vm1, %v6823_v34 }
 0x13f   : > { %4994 = vmatpush3.bf16.msra.mxu1 %v5451_v11  ;;  %4699 = vmatprep.mubr.msk.bf16.mxu1 %vm621_vm1, %v6824_v27  ;;  %v3044_v11 = vrot.slane %v3042_v63, 1  ;;  %v3046_v27 = vshrl.u32 %v6266_v48, 16 }
 0x140   : > { %4920 = vmatmul.mubr.msk.bf16.gmra.mrb[24].mxu0 %vm621_vm1, %v6825_v60  ;;  %v3050_v60 = vshll.u32 %v6415_v33, 16 }
 0x141   : > { %4923 = vmatprep.mubr.msk.bf16.mxu0 %vm621_vm1, %v6826_v3  ;;  %v6835_v3 = vld [vmem:[#allocation16_spill] sm:$0xff] }
 0x146   : > { %4700 = vmatmul.mubr.msk.bf16.gmra.mrb[4].mxu1 %vm621_vm1, %v6827_v36 }
 0x147   : > { %4703 = vmatprep.mubr.msk.bf16.mxu1 %vm621_vm1, %v6828_v15  ;;  %v3052_v15 = vrot.slane %v3050_v60, 1 }
 0x148   : > { %4924 = vmatmul.mubr.msk.bf16.gmra.mrb[28].mxu0 %vm621_vm1, %v6829_v4 }
 0x149   : > { %4927 = vmatprep.mubr.msk.bf16.mxu0 %vm621_vm1, %v6830_v39  ;;  %v2002_v39 = vshrl.u32 %v6015_v17, 16 }
 0x14e   : > { %4704 = vmatmul.mubr.msk.bf16.gmra.mrb[8].mxu1 %vm621_vm1, %v6831_v22 }
 0x14f   : > { %4707 = vmatprep.mubr.msk.bf16.mxu1 %vm621_vm1, %v6832_v40  ;;  %v2012_v40 = vshll.u32 %v6039_v19, 16 }
 0x150   : > { %4928 = vmatmul.mubr.msk.bf16.gmra.mrb[32].mxu0 %vm621_vm1, %v5959_v46  ;;  %v3037_v46 = vrot.slane %v3035_v62, 1 }
 0x151   : > { %4931 = vmatprep.mubr.msk.bf16.mxu0 %vm621_vm1, %v5981_v18  ;;  %v3034_v18 = vor.u32 %v3032_v49, %v3030_v45  ;;  %v2014_v62 = vrot.slane %v2012_v40, 1  ;;  %v2016_v49 = vshrl.u32 %v6039_v19, 16 }
 0x152   : > { %v3041_v34 = vor.u32 %v3039_v26, %v3037_v46  ;;  %v2026_v26 = vshll.u32 %v6066_v21, 16 }
 0x153   : > { %v3038_v2 = vsel %vm418_vm0, %v3034_v18, %v3037_v46  ;;  %v2018_v63 = vor.u32 %v2016_v49, %v2014_v62  ;;  %v2030_v46 = vshrl.u32 %v6066_v21, 16 }
 0x154   : > { %v3045_v36 = vsel %vm418_vm0, %v3041_v34, %v3044_v11  ;;  %v2037_v34 = vshrl.u32 %v6077_v57, 16 }
 0x156   : > { %4708 = vmatmul.mubr.msk.bf16.gmra.mrb[12].mxu1 %vm621_vm1, %v6833_v9 }
 0x157   : > { %4711 = vmatprep.mubr.msk.bf16.mxu1 %vm621_vm1, %v6834_v61  ;;  %v2028_v61 = vrot.slane %v2026_v26, 1 }
 0x158   : > { %4932 = vmatmul.mubr.msk.bf16.gmra.mrb[36].mxu0 %vm621_vm1, %v5986_v7  ;;  %v3048_v7 = vor.u32 %v3046_v27, %v3044_v11  ;;  %v2040_v11 = vshll.u32 %v6084_v51, 16 }
 0x159   : > { %4935 = vmatprep.mubr.msk.bf16.mxu0 %vm621_vm1, %v3031_v5  ;;  %v2023_v5 = vshrl.u32 %v6059_v50, 16 }
 0x15a   : > { %v3053_v4 = vsel %vm418_vm0, %v3048_v7, %v3052_v15  ;;  %v2042_v27 = vrot.slane %v2040_v11, 1  ;;  %v2051_v7 = vshrl.u32 %v6094_v47, 16  ;;  %v2054_v15 = vshll.u32 %v6100_v14, 16 }
 0x15e   : > { %4712 = vmatmul.mubr.msk.bf16.gmra.mrb[16].mxu1 %vm621_vm1, %v6835_v3  ;;  %v2044_v3 = vshrl.u32 %v6084_v51, 16 }
 0x15f   : > { %4715 = vmatprep.mubr.msk.bf16.mxu1 %vm621_vm1, %v5711_v42  ;;  %v1981_v42 = vshrl.u32 %v5743_v29, 16 }
 0x160   : > { %4936 = vmatmul.mubr.msk.bf16.gmra.mrb[40].mxu0 %vm621_vm1, %v3038_v2  ;;  %v2032_v2 = vor.u32 %v2030_v46, %v2028_v61 }
 0x161   : > { %4939 = vmatprep.mubr.msk.bf16.mxu0 %vm621_vm1, %v3045_v36 }
 0x166   : > { %4716 = vmatmul.mubr.msk.bf16.gmra.mrb[20].mxu1 %vm621_vm1, %v5724_v58  ;;  %v1984_v58 = vshll.u32 %v5994_v31, 16 }
 0x167   : > { %4719 = vmatprep.mubr.msk.bf16.mxu1 %vm621_vm1, %v5743_v29  ;;  %v1988_v29 = vshrl.u32 %v5994_v31, 16 }
 0x168   : > { %4940 = vmatmul.mubr.msk.bf16.gmra.mrb[44].mxu0 %vm621_vm1, %v3053_v4 }
 0x169   : > { %4945 = vmatprep.mubr.msk.bf16.mxu0 %vm621_vm1, %v6199_v56  ;;  %v6836_v56 = vld [vmem:[#allocation21_spill] sm:$0xff] }
 0x16e   : > { %4720 = vmatmul.mubr.msk.bf16.gmra.mrb[24].mxu1 %vm621_vm1, %v5994_v31  ;;  %v2005_v31 = vshll.u32 %v6031_v44, 16 }
 0x16f   : > { %4723 = vmatprep.mubr.msk.bf16.mxu1 %vm621_vm1, %v6009_v52 }
 0x170   : > { %4946 = vmatmul.mubr.msk.bf16.vlgmr.msra.gmra.mrb[0].mxu0 %vm621_vm1, %v6202_v53  ;;  %v1983_v53 = vor.u32 %v1981_v42, %v6836_v56  ;;  %v3320_v42 = vrot.slane %v6266_v48, 1  ;;  %v2058_v56 = vshrl.u32 %v6100_v14, 16 }
 0x171   : > { %4949 = vmatprep.mubr.msk.bf16.mxu0 %vm621_vm1, %v6215_v20  ;;  %v1986_v20 = vrot.slane %v1984_v58, 1 }
 0x176   : > { %4724 = vmatmul.mubr.msk.bf16.gmra.mrb[28].mxu1 %vm621_vm1, %v6015_v17 }
 0x177   : > { %4727 = vmatprep.mubr.msk.bf16.mxu1 %vm621_vm1, %v6031_v44 }
 0x178   : > { %4950 = vmatmul.mubr.msk.bf16.gmra.mrb[4].mxu0 %vm621_vm1, %v6218_v32  ;;  %v1991_v32 = vshll.u32 %v6009_v52, 16 }
 0x179   : > { %4953 = vmatprep.mubr.msk.bf16.mxu0 %vm621_vm1, %v6231_v55  ;;  %v1987_v55 = vsel %vm418_vm0, %v1983_v53, %v1986_v20 }
 0x17e   : > { %4728 = vmatmul.mubr.msk.bf16.gmra.mrb[32].mxu1 %vm621_vm1, %v6039_v19  ;;  %v2033_v19 = vshll.u32 %v6077_v57, 16 }
 0x17f   : > { %4731 = vmatprep.mubr.msk.bf16.mxu1 %vm621_vm1, %v6059_v50 }
 0x180   : > { %4954 = vmatmul.mubr.msk.bf16.gmra.mrb[8].mxu0 %vm621_vm1, %v6234_v35  ;;  %v1995_v35 = vshrl.u32 %v6009_v52, 16 }
 0x181   : > { %4957 = vmatprep.mubr.msk.bf16.mxu0 %vm621_vm1, %v6247_v28  ;;  %v1998_v28 = vshll.u32 %v6015_v17, 16  ;;  %v2019_v17 = vshll.u32 %v6059_v50, 16 }
 0x186   : > { %4732 = vmatmul.mubr.msk.bf16.gmra.mrb[36].mxu1 %vm621_vm1, %v6066_v21  ;;  %v3316_v21 = vrot.slane %v6042_v24, 1  ;;  %v2046_v24 = vor.u32 %v2044_v3, %v2042_v27 }
 0x187   : > { %4735 = vmatprep.mubr.msk.bf16.mxu1 %vm621_vm1, %v6077_v57  ;;  %v2047_v57 = vshll.u32 %v6094_v47, 16 }
 0x188   : > { %4958 = vmatmul.mubr.msk.bf16.gmra.mrb[12].mxu0 %vm621_vm1, %v6250_v0  ;;  %v1993_v0 = vrot.slane %v1991_v32, 1 }
 0x189   : > { %4961 = vmatprep.mubr.msk.bf16.mxu0 %vm621_vm1, %v6263_v54  ;;  %v1990_v54 = vor.u32 %v1988_v29, %v1986_v20 }
 0x18b   : > { %v1994_v52 = vsel %vm418_vm0, %v1990_v54, %v1993_v0 }
 0x18e   : > { %4736 = vmatmul.mubr.msk.bf16.gmra.mrb[40].mxu1 %vm621_vm1, %v6084_v51  ;;  %v2056_v51 = vrot.slane %v2054_v15, 1 }
 0x18f   : > { %4739 = vmatprep.mubr.msk.bf16.mxu1 %vm621_vm1, %v6094_v47  ;;  %v3318_v47 = vrot.slane %v6051_v10, 1 }
 0x190   : > { %4962 = vmatmul.mubr.msk.bf16.gmra.mrb[16].mxu0 %vm621_vm1, %v6269_v12  ;;  %v1997_v12 = vor.u32 %v1995_v35, %v1993_v0  ;;  %v2060_v32 = vor.u32 %v2058_v56, %v2056_v51 }
 0x191   : > { %4965 = vmatprep.mubr.msk.bf16.mxu0 %vm621_vm1, %v6282_v38  ;;  %v2000_v38 = vrot.slane %v1998_v28, 1  ;;  %v3319_v20 = vsel %vm1169_vm2, %v3316_v21, %v3318_v47 }
 0x193   : > { %v2001_v22 = vsel %vm418_vm0, %v1997_v12, %v2000_v38  ;;  %v2004_v45 = vor.u32 %v2002_v39, %v2000_v38 }
 0x196   : > { %4740 = vmatmul.mubr.msk.bf16.gmra.mrb[44].mxu1 %vm621_vm1, %v6100_v14  ;;  %v3322_v14 = vrot.slane %v6415_v33, 1 }
 0x197   : > { %4769 = vmatprep.mubr.msk.bf16.mxu1 %vm621_vm1, %v1987_v55 }
 0x198   : > { %4966 = vmatmul.mubr.msk.bf16.gmra.mrb[20].mxu0 %vm621_vm1, %v6285_v37  ;;  %v2007_v37 = vrot.slane %v2005_v31, 1  ;;  %v3323_v48 = vsel %vm1169_vm2, %v3320_v42, %v3322_v14 }
 0x199   : > { %4969 = vmatprep.mubr.msk.bf16.mxu0 %vm621_vm1, %v6299_v6 }
 0x19a   : > { %v2011_v6 = vor.u32 %v2009_v59, %v2007_v37  ;;  %v2008_v44 = vsel %vm418_vm0, %v2004_v45, %v2007_v37 }
 0x19c   : > { %v2015_v9 = vsel %vm418_vm0, %v2011_v6, %v2014_v62 }
 0x19e   : > { %4770 = vmatmul.mubr.msk.bf16.vlgmr.msra.gmra.mrb[24].mxu1 %vm621_vm1, %v1994_v52 }
 0x19f   : > { %4773 = vmatprep.mubr.msk.bf16.mxu1 %vm621_vm1, %v2001_v22 }
 0x1a0   : > { %4970 = vmatmul.mubr.msk.bf16.gmra.mrb[24].mxu0 %vm621_vm1, %v6302_v8  ;;  %v2021_v8 = vrot.slane %v2019_v17, 1 }
 0x1a1   : > { %4973 = vmatprep.mubr.msk.bf16.mxu0 %vm621_vm1, %v6315_v16 }
 0x1a2   : > { %v2025_v16 = vor.u32 %v2023_v5, %v2021_v8  ;;  %v2022_v50 = vsel %vm418_vm0, %v2018_v63, %v2021_v8  ;;  %v6578_v63 = vld [vmem:[%s6739_s2] ss:$0 sm:$0xff] }
 0x1a4   : > { %v2029_v18 = vsel %vm418_vm0, %v2025_v16, %v2028_v61 }
 0x1a6   : > { %4774 = vmatmul.mubr.msk.bf16.gmra.mrb[28].mxu1 %vm621_vm1, %v2008_v44 }
 0x1a7   : > { %4777 = vmatprep.mubr.msk.bf16.mxu1 %vm621_vm1, %v2015_v9 }
 0x1a8   : > { %4974 = vmatmul.mubr.msk.bf16.gmra.mrb[28].mxu0 %vm621_vm1, %v6318_v43  ;;  %v2035_v43 = vrot.slane %v2033_v19, 1  ;;  %v6583_v19 = vld [vmem:[%s6740_s3] ss:$0 sm:$0xff] }
 0x1a9   : > { %4977 = vmatprep.mubr.msk.bf16.mxu0 %vm621_vm1, %v6331_v13 }
 0x1aa   : > { %v2039_v13 = vor.u32 %v2037_v34, %v2035_v43  ;;  %v2036_v60 = vsel %vm418_vm0, %v2032_v2, %v2035_v43 }
 0x1ac   : > { %v2043_v36 = vsel %vm418_vm0, %v2039_v13, %v2042_v27 }
 0x1ae   : > { %4778 = vmatmul.mubr.msk.bf16.gmra.mrb[32].mxu1 %vm621_vm1, %v2022_v50 }
 0x1af   : > { %4781 = vmatprep.mubr.msk.bf16.mxu1 %vm621_vm1, %v2029_v18 }
 0x1b0   : > { %4978 = vmatmul.mubr.msk.bf16.gmra.mrb[32].mxu0 %vm621_vm1, %v6334_v30  ;;  %v3317_v30 = vsel %vm1169_vm2, %v6344_v25, %v3316_v21  ;;  %v2062_v25 = vshll.u32 %v6109_v1, 16 }
 0x1b1   : > { %4981 = vmatprep.mubr.msk.bf16.mxu0 %vm621_vm1, %v6349_v23  ;;  %v2049_v23 = vrot.slane %v2047_v57, 1 }
 0x1b2   : > { %v2064_v10 = vrot.slane %v2062_v25, 1 }
 0x1b3   : > { %v2053_v4 = vor.u32 %v2051_v7, %v2049_v23  ;;  %v2050_v58 = vsel %vm418_vm0, %v2046_v24, %v2049_v23 }
 0x1b4   : > { %v2065_v1 = vsel %vm418_vm0, %v2060_v32, %v2064_v10 }
 0x1b5   : > { %v2057_v53 = vsel %vm418_vm0, %v2053_v4, %v2056_v51 }
 0x1b6   : > { %4782 = vmatmul.mubr.msk.bf16.gmra.mrb[36].mxu1 %vm621_vm1, %v2036_v60 }
 0x1b7   : > { %4785 = vmatprep.mubr.msk.bf16.mxu1 %vm621_vm1, %v2043_v36 }
 0x1b8   : > { %4982 = vmatmul.mubr.msk.bf16.gmra.mrb[36].mxu0 %vm621_vm1, %v6353_v41  ;;  %v3321_v41 = vsel %vm1169_vm2, %v3318_v47, %v3320_v42 }
 0x1b9   : > { %4985 = vmatprep.mubr.msk.bf16.mxu0 %vm621_vm1, %v3317_v30 }
 0x1be   : > { %4786 = vmatmul.mubr.msk.bf16.gmra.mrb[40].mxu1 %vm621_vm1, %v2050_v58 }
 0x1bf   : > { %4789 = vmatprep.mubr.msk.bf16.mxu1 %vm621_vm1, %v2057_v53 }
 0x1c0   : > { %4986 = vmatmul.mubr.msk.bf16.gmra.mrb[40].mxu0 %vm621_vm1, %v3319_v20 }
 0x1c1   : > { %4989 = vmatprep.mubr.msk.bf16.mxu0 %vm621_vm1, %v3321_v41 }
 0x1c6   : > { %4790 = vmatmul.mubr.msk.bf16.gmra.mrb[44].mxu1 %vm621_vm1, %v2065_v1 }
 0x1c8   : > { %4990 = vmatmul.mubr.msk.bf16.gmra.mrb[44].mxu0 %vm621_vm1, %v3323_v48 }
 0x211   : > { %v4697_v29 = vpop.f32.mrb[0].mxu1 }
 0x212   : > { %v1681_v55 = vpop.f32.mrb[1].mxu1 }
 0x213   : > { %v4698_v35 = vpop.f32.mrb[2].mxu1 }
 0x214   : > { %v1684_v28 = vpop.f32.mrb[3].mxu1 }
 0x219   : > { %v4701_v0 = vpop.f32.mrb[4].mxu1 }
 0x21a   : > { %v1696_v54 = vpop.f32.mrb[5].mxu1 }
 0x21b   : > { %v4702_v12 = vpop.f32.mrb[6].mxu1 }
 0x21c   : > { %v1699_v38 = vpop.f32.mrb[7].mxu1 }
 0x221   : > { %v4705_v31 = vpop.f32.mrb[8].mxu1 }
 0x222   : > { %v1711_v52 = vpop.f32.mrb[9].mxu1 }
 0x223   : > { %v4706_v39 = vpop.f32.mrb[10].mxu1 }
 0x224   : > { %v6557_v33 = vpop.f32.mrb[11].mxu1 }
 0x229   : > { %v4709_v22 = vpop.f32.mrb[12].mxu1 }
 0x22a   : > { %v6559_v59 = vpop.f32.mrb[13].mxu1 }
 0x22b   : > { %v6561_v40 = vpop.f32.mrb[14].mxu1 }
 0x22c   : > { %v6563_v37 = vpop.f32.mrb[15].mxu1 }
 0x231   : > { %v6565_v45 = vpop.f32.mrb[16].mxu1 }
 0x232   : > { %v6567_v6 = vpop.f32.mrb[17].mxu1 }
 0x233   : > { %v6569_v62 = vpop.f32.mrb[18].mxu1 }
 0x234   : > { %v1743_v17 = vpop.f32.mrb[19].mxu1 }
 0x239   : > { %v6571_v44 = vpop.f32.mrb[20].mxu1 }
 0x23a   : > { %v1755_v49 = vpop.f32.mrb[21].mxu1 }
 0x23b   : > { %v4718_v9 = vpop.f32.mrb[22].mxu1 }
 0x23c   : > { %v6573_v5 = vpop.f32.mrb[23].mxu1 }
 0x243   : > { %v4947_v26 = vpop.f32.mrb[0].mxu0 }
 0x244   : > { %v3376_v8 = vpop.f32.mrb[1].mxu0 }
 0x245   : > { %v4995_v16 = vadd.f32 %v3376_v8, %v1681_v55  ;;  %v4948_v61 = vpop.f32.mrb[2].mxu0 }
 0x246   : > { %v4996_v50 = vadd.f32 %v4948_v61, %v4698_v35  ;;  %v3379_v46 = vpop.f32.mrb[3].mxu0 }
 0x247   : > { %v3590_v18 = vmul.f32 %v4995_v16, %v6578_v63  ;;  %v4997_v34 = vadd.f32 %v3379_v46, %v1684_v28 }
 0x248   : > { %v3592_v11 = vmul.f32 %v4996_v50, %v6578_v63 }
 0x249   : > { %v3629_v43 = vadd.f32 %v6583_v19, %v3590_v18  ;;  %v3591_v2 = vmul.f32 %v4997_v34, %v6578_v63 }
 0x24a   : > { %v3631_v13 = vadd.f32 %v6583_v19, %v3592_v11 }
 0x24b   : > { %v3661_v27 = vmax.f32 %v3629_v43, 0.0  ;;  %v3630_v21 = vadd.f32 %v6583_v19, %v3591_v2  ;;  %v4951_v57 = vpop.f32.mrb[4].mxu0 }
 0x24c   : > { %v3663_v60 = vmax.f32 %v3631_v13, 0.0  ;;  %v4998_v3 = vadd.f32 %v4951_v57, %v4701_v0  ;;  %v3391_v36 = vpop.f32.mrb[5].mxu0 }
 0x24d   : > { %v4286_v7 = vpack.c.bf16 %v3661_v27, %v3661_v27  ;;  %v3662_v15 = vmax.f32 %v3630_v21, 0.0  ;;  %v4999_v30 = vadd.f32 %v3391_v36, %v1696_v54  ;;  %v4952_v23 = vpop.f32.mrb[6].mxu0 }
 0x24e   : > { %v4288_v24 = vpack.c.bf16 %v3663_v60, %v3663_v60  ;;  %v3594_v4 = vmul.f32 %v4998_v3, %v6578_v63  ;;  %v5000_v51 = vadd.f32 %v4952_v23, %v4702_v12  ;;  %v3394_v47 = vpop.f32.mrb[7].mxu0 }
 0x24f   : > { %3822 = vst.msk [vmem:[%s6595_s28] sm:$0xf] %vm3821_vm3, %v4286_v7  ;;  %v4287_v42 = vpack.c.bf16 %v3662_v15, %v3662_v15  ;;  %v3593_v58 = vmul.f32 %v4999_v30, %v6578_v63 }
 0x250   : > { %3824 = vst.msk [vmem:[%s6595_s28 + $0x8] sm:$0xf] %vm3821_vm3, %v4288_v24  ;;  %v3633_v56 = vadd.f32 %v6583_v19, %v3594_v4  ;;  %v3595_v25 = vmul.f32 %v5000_v51, %v6578_v63 }
 0x251   : > { %3823 = vst.msk [vmem:[%s6595_s28 + $0x4] sm:$0xf] %vm3821_vm3, %v4287_v42  ;;  %v3632_v53 = vadd.f32 %v6583_v19, %v3593_v58 }
 0x252   : > { %v3665_v20 = vmax.f32 %v3633_v56, 0.0  ;;  %v3634_v41 = vadd.f32 %v6583_v19, %v3595_v25 }
 0x253   : > { %v3664_v32 = vmax.f32 %v3632_v53, 0.0  ;;  %v4955_v10 = vpop.f32.mrb[8].mxu0 }
 0x254   : > { %v4290_v14 = vpack.c.bf16 %v3665_v20, %v3665_v20  ;;  %v3666_v1 = vmax.f32 %v3634_v41, 0.0  ;;  %v5001_v48 = vadd.f32 %v4955_v10, %v4705_v31  ;;  %v3406_v29 = vpop.f32.mrb[9].mxu0 }
 0x255   : > { %v4289_v55 = vpack.c.bf16 %v3664_v32, %v3664_v32  ;;  %v4956_v35 = vpop.f32.mrb[10].mxu0 }
 0x256   : > { %3826 = vst.msk [vmem:[%s6595_s28 + $0x10] sm:$0xf] %vm3821_vm3, %v4290_v14  ;;  %v4291_v28 = vpack.c.bf16 %v3666_v1, %v3666_v1  ;;  %v3597_v0 = vmul.f32 %v5001_v48, %v6578_v63  ;;  %v3408_v54 = vpop.f32.mrb[11].mxu0 }
 0x257   : > { %3825 = vst.msk [vmem:[%s6595_s28 + $0xc] sm:$0xf] %vm3821_vm3, %v4289_v55  ;;  %v5002_v12 = vadd.f32 %v3408_v54, %v6557_v33 }
 0x258   : > { %3827 = vst.msk [vmem:[%s6595_s28 + $0x14] sm:$0xf] %vm3821_vm3, %v4291_v28  ;;  %v3636_v38 = vadd.f32 %v6583_v19, %v3597_v0 }
 0x259   : > { %v3596_v31 = vmul.f32 %v5002_v12, %v6578_v63 }
 0x25a   : > { %v3668_v52 = vmax.f32 %v3636_v38, 0.0 }
 0x25b   : > { %v3635_v39 = vadd.f32 %v6583_v19, %v3596_v31  ;;  %v4959_v22 = vpop.f32.mrb[12].mxu0 }
 0x25c   : > { %v4293_v17 = vpack.c.bf16 %v3668_v52, %v3668_v52  ;;  %v3420_v49 = vpop.f32.mrb[13].mxu0 }
 0x25d   : > { %v3667_v9 = vmax.f32 %v3635_v39, 0.0  ;;  %v5003_v26 = vadd.f32 %v3420_v49, %v6559_v59  ;;  %v4960_v8 = vpop.f32.mrb[14].mxu0 }
 0x25e   : > { %3829 = vst.msk [vmem:[%s6595_s28 + $0x1c] sm:$0xf] %vm3821_vm3, %v4293_v17  ;;  %v5004_v33 = vadd.f32 %v4960_v8, %v6561_v40  ;;  %v3423_v16 = vpop.f32.mrb[15].mxu0 }
 0x25f   : > { %v4292_v61 = vpack.c.bf16 %v3667_v9, %v3667_v9  ;;  %v3598_v50 = vmul.f32 %v5003_v26, %v6578_v63  ;;  %v5005_v46 = vadd.f32 %v3423_v16, %v6563_v37 }
 0x260   : > { %v3600_v18 = vmul.f32 %v5004_v33, %v6578_v63 }
 0x261   : > { %3828 = vst.msk [vmem:[%s6595_s28 + $0x18] sm:$0xf] %vm3821_vm3, %v4292_v61  ;;  %v3637_v34 = vadd.f32 %v6583_v19, %v3598_v50  ;;  %v3599_v11 = vmul.f32 %v5005_v46, %v6578_v63 }
 0x262   : > { %v3639_v59 = vadd.f32 %v6583_v19, %v3600_v18 }
 0x263   : > { %v3669_v43 = vmax.f32 %v3637_v34, 0.0  ;;  %v3638_v40 = vadd.f32 %v6583_v19, %v3599_v11  ;;  %v4963_v2 = vpop.f32.mrb[16].mxu0 }
 0x264   : > { %v3671_v13 = vmax.f32 %v3639_v59, 0.0  ;;  %v5006_v27 = vadd.f32 %v4963_v2, %v6565_v45  ;;  %v3435_v37 = vpop.f32.mrb[17].mxu0 }
 0x265   : > { %v4294_v21 = vpack.c.bf16 %v3669_v43, %v3669_v43  ;;  %v3670_v57 = vmax.f32 %v3638_v40, 0.0  ;;  %v5007_v60 = vadd.f32 %v3435_v37, %v6567_v6  ;;  %v4964_v3 = vpop.f32.mrb[18].mxu0 }
 0x266   : > { %v4296_v36 = vpack.c.bf16 %v3671_v13, %v3671_v13  ;;  %v3602_v7 = vmul.f32 %v5006_v27, %v6578_v63  ;;  %v5008_v15 = vadd.f32 %v4964_v3, %v6569_v62  ;;  %v3438_v30 = vpop.f32.mrb[19].mxu0 }
 0x267   : > { %3830 = vst.msk [vmem:[%s6595_s28 + $0x20] sm:$0xf] %vm3821_vm3, %v4294_v21  ;;  %v4295_v23 = vpack.c.bf16 %v3670_v57, %v3670_v57  ;;  %v3601_v24 = vmul.f32 %v5007_v60, %v6578_v63 }
 0x268   : > { %3832 = vst.msk [vmem:[%s6595_s28 + $0x28] sm:$0xf] %vm3821_vm3, %v4296_v36  ;;  %v3641_v45 = vadd.f32 %v6583_v19, %v3602_v7  ;;  %v3603_v4 = vmul.f32 %v5008_v15, %v6578_v63 }
 0x269   : > { %3831 = vst.msk [vmem:[%s6595_s28 + $0x24] sm:$0xf] %vm3821_vm3, %v4295_v23  ;;  %v3640_v6 = vadd.f32 %v6583_v19, %v3601_v24 }
 0x26a   : > { %v3673_v51 = vmax.f32 %v3641_v45, 0.0  ;;  %v3642_v62 = vadd.f32 %v6583_v19, %v3603_v4 }
 0x26b   : > { %v3672_v47 = vmax.f32 %v3640_v6, 0.0  ;;  %v4967_v42 = vpop.f32.mrb[20].mxu0 }
 0x26c   : > { %v4298_v58 = vpack.c.bf16 %v3673_v51, %v3673_v51  ;;  %v3674_v56 = vmax.f32 %v3642_v62, 0.0  ;;  %v5009_v25 = vadd.f32 %v4967_v42, %v6571_v44  ;;  %v3450_v53 = vpop.f32.mrb[21].mxu0 }
 0x26d   : > { %v4297_v20 = vpack.c.bf16 %v3672_v47, %v3672_v47  ;;  %v4968_v41 = vpop.f32.mrb[22].mxu0 }
 0x26e   : > { %3834 = vst.msk [vmem:[%s6595_s28 + $0x30] sm:$0xf] %vm3821_vm3, %v4298_v58  ;;  %v4299_v32 = vpack.c.bf16 %v3674_v56, %v3674_v56  ;;  %v3605_v10 = vmul.f32 %v5009_v25, %v6578_v63  ;;  %v3452_v14 = vpop.f32.mrb[23].mxu0 }
 0x26f   : > { %3833 = vst.msk [vmem:[%s6595_s28 + $0x2c] sm:$0xf] %vm3821_vm3, %v4297_v20  ;;  %v5010_v1 = vadd.f32 %v3452_v14, %v6573_v5 }
 0x270   : > { %3835 = vst.msk [vmem:[%s6595_s28 + $0x34] sm:$0xf] %vm3821_vm3, %v4299_v32  ;;  %v3644_v48 = vadd.f32 %v6583_v19, %v3605_v10 }
 0x271   : > { %v3604_v44 = vmul.f32 %v5010_v1, %v6578_v63  ;;  %v4771_v29 = vpop.f32.mrb[24].mxu1 }
 0x272   : > { %v3676_v55 = vmax.f32 %v3644_v48, 0.0  ;;  %v2266_v35 = vpop.f32.mrb[25].mxu1 }
 0x273   : > { %v3643_v28 = vadd.f32 %v6583_v19, %v3604_v44  ;;  %v4971_v0 = vpop.f32.mrb[24].mxu0  ;;  %v4772_v54 = vpop.f32.mrb[26].mxu1 }
 0x274   : > { %v4301_v12 = vpack.c.bf16 %v3676_v55, %v3676_v55  ;;  %v3464_v38 = vpop.f32.mrb[25].mxu0  ;;  %v2269_v31 = vpop.f32.mrb[27].mxu1 }
 0x275   : > { %v3675_v52 = vmax.f32 %v3643_v28, 0.0  ;;  %v5011_v5 = vadd.f32 %v3464_v38, %v2266_v35  ;;  %v4972_v39 = vpop.f32.mrb[26].mxu0 }
 0x276   : > { %3837 = vst.msk [vmem:[%s6595_s28 + $0x3c] sm:$0xf] %vm3821_vm3, %v4301_v12  ;;  %v5012_v22 = vadd.f32 %v4972_v39, %v4772_v54  ;;  %v3467_v17 = vpop.f32.mrb[27].mxu0 }
 0x277   : > { %v4300_v49 = vpack.c.bf16 %v3675_v52, %v3675_v52  ;;  %v3606_v9 = vmul.f32 %v5011_v5, %v6578_v63  ;;  %v5013_v26 = vadd.f32 %v3467_v17, %v2269_v31 }
 0x278   : > { %v3608_v8 = vmul.f32 %v5012_v22, %v6578_v63 }
 0x279   : > { %3836 = vst.msk [vmem:[%s6595_s28 + $0x38] sm:$0xf] %vm3821_vm3, %v4300_v49  ;;  %v3645_v33 = vadd.f32 %v6583_v19, %v3606_v9  ;;  %v3607_v16 = vmul.f32 %v5013_v26, %v6578_v63  ;;  %v4775_v61 = vpop.f32.mrb[28].mxu1 }
 0x27a   : > { %v3647_v50 = vadd.f32 %v6583_v19, %v3608_v8  ;;  %v2281_v46 = vpop.f32.mrb[29].mxu1 }
 0x27b   : > { %v3677_v18 = vmax.f32 %v3645_v33, 0.0  ;;  %v3646_v34 = vadd.f32 %v6583_v19, %v3607_v16  ;;  %v4975_v11 = vpop.f32.mrb[28].mxu0  ;;  %v4776_v59 = vpop.f32.mrb[30].mxu1 }
 0x27c   : > { %v3679_v43 = vmax.f32 %v3647_v50, 0.0  ;;  %v5014_v40 = vadd.f32 %v4975_v11, %v4775_v61  ;;  %v3479_v2 = vpop.f32.mrb[29].mxu0  ;;  %v2284_v13 = vpop.f32.mrb[31].mxu1 }
 0x27d   : > { %v4302_v27 = vpack.c.bf16 %v3677_v18, %v3677_v18  ;;  %v3678_v37 = vmax.f32 %v3646_v34, 0.0  ;;  %v5015_v21 = vadd.f32 %v3479_v2, %v2281_v46  ;;  %v4976_v57 = vpop.f32.mrb[30].mxu0 }
 0x27e   : > { %v4304_v60 = vpack.c.bf16 %v3679_v43, %v3679_v43  ;;  %v3610_v3 = vmul.f32 %v5014_v40, %v6578_v63  ;;  %v5016_v36 = vadd.f32 %v4976_v57, %v4776_v59  ;;  %v3482_v7 = vpop.f32.mrb[31].mxu0 }
 0x27f   : > { %3838 = vst.msk [vmem:[%s6595_s28 + $0x40] sm:$0xf] %vm3821_vm3, %v4302_v27  ;;  %v4303_v15 = vpack.c.bf16 %v3678_v37, %v3678_v37  ;;  %v3609_v30 = vmul.f32 %v5015_v21, %v6578_v63 }
 0x280   : > { %3840 = vst.msk [vmem:[%s6595_s28 + $0x48] sm:$0xf] %vm3821_vm3, %v4304_v60  ;;  %v3649_v23 = vadd.f32 %v6583_v19, %v3610_v3  ;;  %v3611_v24 = vmul.f32 %v5016_v36, %v6578_v63 }
 0x281   : > { %3839 = vst.msk [vmem:[%s6595_s28 + $0x44] sm:$0xf] %vm3821_vm3, %v4303_v15  ;;  %v3648_v45 = vadd.f32 %v6583_v19, %v3609_v30  ;;  %v4779_v4 = vpop.f32.mrb[32].mxu1 }
 0x282   : > { %v3681_v6 = vmax.f32 %v3649_v23, 0.0  ;;  %v3650_v51 = vadd.f32 %v6583_v19, %v3611_v24  ;;  %v2296_v62 = vpop.f32.mrb[33].mxu1 }
 0x283   : > { %v3680_v47 = vmax.f32 %v3648_v45, 0.0  ;;  %v4979_v42 = vpop.f32.mrb[32].mxu0  ;;  %v4780_v58 = vpop.f32.mrb[34].mxu1 }
 0x284   : > { %v4306_v56 = vpack.c.bf16 %v3681_v6, %v3681_v6  ;;  %v3682_v25 = vmax.f32 %v3650_v51, 0.0  ;;  %v5017_v53 = vadd.f32 %v4979_v42, %v4779_v4  ;;  %v3494_v20 = vpop.f32.mrb[33].mxu0  ;;  %v2298_v41 = vpop.f32.mrb[35].mxu1 }
 0x285   : > { %v4305_v32 = vpack.c.bf16 %v3680_v47, %v3680_v47  ;;  %v4980_v10 = vpop.f32.mrb[34].mxu0 }
 0x286   : > { %3842 = vst.msk [vmem:[%s6595_s28 + $0x50] sm:$0xf] %vm3821_vm3, %v4306_v56  ;;  %v4307_v14 = vpack.c.bf16 %v3682_v25, %v3682_v25  ;;  %v3613_v1 = vmul.f32 %v5017_v53, %v6578_v63  ;;  %v3496_v48 = vpop.f32.mrb[35].mxu0 }
 0x287   : > { %3841 = vst.msk [vmem:[%s6595_s28 + $0x4c] sm:$0xf] %vm3821_vm3, %v4305_v32  ;;  %v5018_v44 = vadd.f32 %v3496_v48, %v2298_v41 }
 0x288   : > { %3843 = vst.msk [vmem:[%s6595_s28 + $0x54] sm:$0xf] %vm3821_vm3, %v4307_v14  ;;  %v3652_v29 = vadd.f32 %v6583_v19, %v3613_v1 }
 0x289   : > { %v3612_v55 = vmul.f32 %v5018_v44, %v6578_v63  ;;  %v4783_v35 = vpop.f32.mrb[36].mxu1 }
 0x28a   : > { %v3684_v28 = vmax.f32 %v3652_v29, 0.0  ;;  %v2310_v0 = vpop.f32.mrb[37].mxu1 }
 0x28b   : > { %v3651_v54 = vadd.f32 %v6583_v19, %v3612_v55  ;;  %v4983_v12 = vpop.f32.mrb[36].mxu0  ;;  %v4784_v38 = vpop.f32.mrb[38].mxu1 }
 0x28c   : > { %v4309_v31 = vpack.c.bf16 %v3684_v28, %v3684_v28  ;;  %v3508_v52 = vpop.f32.mrb[37].mxu0  ;;  %v2313_v5 = vpop.f32.mrb[39].mxu1 }
 0x28d   : > { %v3683_v39 = vmax.f32 %v3651_v54, 0.0  ;;  %v5019_v22 = vadd.f32 %v3508_v52, %v2310_v0  ;;  %v4984_v17 = vpop.f32.mrb[38].mxu0 }
 0x28e   : > { %3845 = vst.msk [vmem:[%s6595_s28 + $0x5c] sm:$0xf] %vm3821_vm3, %v4309_v31  ;;  %v5020_v49 = vadd.f32 %v4984_v17, %v4784_v38  ;;  %v3511_v9 = vpop.f32.mrb[39].mxu0 }
 0x28f   : > { %v4308_v26 = vpack.c.bf16 %v3683_v39, %v3683_v39  ;;  %v3614_v8 = vmul.f32 %v5019_v22, %v6578_v63  ;;  %v5021_v33 = vadd.f32 %v3511_v9, %v2313_v5 }
 0x290   : > { %v3616_v16 = vmul.f32 %v5020_v49, %v6578_v63 }
 0x291   : > { %3844 = vst.msk [vmem:[%s6595_s28 + $0x58] sm:$0xf] %vm3821_vm3, %v4308_v26  ;;  %v3653_v61 = vadd.f32 %v6583_v19, %v3614_v8  ;;  %v3615_v50 = vmul.f32 %v5021_v33, %v6578_v63  ;;  %v4787_v46 = vpop.f32.mrb[40].mxu1 }
 0x292   : > { %v3655_v18 = vadd.f32 %v6583_v19, %v3616_v16  ;;  %v2325_v34 = vpop.f32.mrb[41].mxu1 }
 0x293   : > { %v3685_v11 = vmax.f32 %v3653_v61, 0.0  ;;  %v3654_v59 = vadd.f32 %v6583_v19, %v3615_v50  ;;  %v4987_v43 = vpop.f32.mrb[40].mxu0  ;;  %v4788_v40 = vpop.f32.mrb[42].mxu1 }
 0x294   : > { %v3687_v2 = vmax.f32 %v3655_v18, 0.0  ;;  %v5022_v13 = vadd.f32 %v4987_v43, %v4787_v46  ;;  %v3523_v27 = vpop.f32.mrb[41].mxu0  ;;  %v2328_v37 = vpop.f32.mrb[43].mxu1 }
 0x295   : > { %v4310_v21 = vpack.c.bf16 %v3685_v11, %v3685_v11  ;;  %v3686_v57 = vmax.f32 %v3654_v59, 0.0  ;;  %v5023_v60 = vadd.f32 %v3523_v27, %v2325_v34  ;;  %v4988_v3 = vpop.f32.mrb[42].mxu0 }
 0x296   : > { %v4312_v36 = vpack.c.bf16 %v3687_v2, %v3687_v2  ;;  %v3618_v7 = vmul.f32 %v5022_v13, %v6578_v63  ;;  %v5024_v15 = vadd.f32 %v4988_v3, %v4788_v40  ;;  %v3526_v30 = vpop.f32.mrb[43].mxu0 }
 0x297   : > { %3846 = vst.msk [vmem:[%s6595_s28 + $0x60] sm:$0xf] %vm3821_vm3, %v4310_v21  ;;  %v4311_v23 = vpack.c.bf16 %v3686_v57, %v3686_v57  ;;  %v3617_v24 = vmul.f32 %v5023_v60, %v6578_v63 }
 0x298   : > { %3848 = vst.msk [vmem:[%s6595_s28 + $0x68] sm:$0xf] %vm3821_vm3, %v4312_v36  ;;  %v3657_v45 = vadd.f32 %v6583_v19, %v3618_v7  ;;  %v3619_v4 = vmul.f32 %v5024_v15, %v6578_v63 }
 0x299   : > { %3847 = vst.msk [vmem:[%s6595_s28 + $0x64] sm:$0xf] %vm3821_vm3, %v4311_v23  ;;  %v3656_v6 = vadd.f32 %v6583_v19, %v3617_v24  ;;  %v4791_v51 = vpop.f32.mrb[44].mxu1 }
 0x29a   : > { %v3689_v62 = vmax.f32 %v3657_v45, 0.0  ;;  %v3658_v47 = vadd.f32 %v6583_v19, %v3619_v4  ;;  %v2340_v42 = vpop.f32.mrb[45].mxu1 }
 0x29b   : > { %v3688_v58 = vmax.f32 %v3656_v6, 0.0  ;;  %v4991_v56 = vpop.f32.mrb[44].mxu0  ;;  %v4792_v25 = vpop.f32.mrb[46].mxu1 }
 0x29c   : > { %v4314_v53 = vpack.c.bf16 %v3689_v62, %v3689_v62  ;;  %v3690_v20 = vmax.f32 %v3658_v47, 0.0  ;;  %v5025_v41 = vadd.f32 %v4991_v56, %v4791_v51  ;;  %v3538_v32 = vpop.f32.mrb[45].mxu0  ;;  %v2342_v10 = vpop.f32.mrb[47].mxu1 }
 0x29d   : > { %v4313_v14 = vpack.c.bf16 %v3688_v58, %v3688_v58  ;;  %v4992_v1 = vpop.f32.mrb[46].mxu0 }
 0x29e   : > { %3850 = vst.msk [vmem:[%s6595_s28 + $0x70] sm:$0xf] %vm3821_vm3, %v4314_v53  ;;  %v4315_v48 = vpack.c.bf16 %v3690_v20, %v3690_v20  ;;  %v3621_v44 = vmul.f32 %v5025_v41, %v6578_v63  ;;  %v3540_v29 = vpop.f32.mrb[47].mxu0 }
 0x29f   : > { %3849 = vst.msk [vmem:[%s6595_s28 + $0x6c] sm:$0xf] %vm3821_vm3, %v4313_v14  ;;  %v5026_v55 = vadd.f32 %v3540_v29, %v2342_v10 }
 0x2a0   : > { %3851 = vst.msk [vmem:[%s6595_s28 + $0x74] sm:$0xf] %vm3821_vm3, %v4315_v48  ;;  %v3660_v35 = vadd.f32 %v6583_v19, %v3621_v44 }
 0x2a1   : > { %v3620_v28 = vmul.f32 %v5026_v55, %v6578_v63 }
 0x2a2   : > { %v3692_v0 = vmax.f32 %v3660_v35, 0.0 }
 0x2a3   : > { %v3659_v54 = vadd.f32 %v6583_v19, %v3620_v28 }
 0x2a4   : > { %v4317_v12 = vpack.c.bf16 %v3692_v0, %v3692_v0 }
 0x2a5   : > { %v3691_v38 = vmax.f32 %v3659_v54, 0.0 }
 0x2a6   : > { %3853 = vst.msk [vmem:[%s6595_s28 + $0x7c] sm:$0xf] %vm3821_vm3, %v4317_v12 }
 0x2a7   : > { %v4316_v31 = vpack.c.bf16 %v3691_v38, %v3691_v38 }
 0x2a9   : > { %3852 = vst.msk [vmem:[%s6595_s28 + $0x78] sm:$0xf] %vm3821_vm3, %v4316_v31 }
 0x2aa PF: > { %s14_s17 = sadd.s32 1, %s5474_s17   ;;  %s6837_s15 = smov %s5470_s16 }
 0x2ab   : > { %p11_p5 = scmp.ge.s32.totalorder %s14_s17, 4   ;;  %s6838_s16 = smov %s6840_s18 }
 0x2ad   :  { %13 = sbr.rel (!%p11_p5) target bundleno = 2 (0x2), region = 74 }

</bundles_post_ra>
